<compile_context>
chip_gen: v7x
topology: tpu7x:2x2x1
jax: 0.10.0
libtpu: 0.0.40
codegen_flags: <defaults>
</compile_context>

<pallas_src>
import functools

import jax
import jax.numpy as jnp
from jax.experimental import pallas as pl
from jax.experimental.pallas import tpu as pltpu


def _haar_combine(v):
    """One 2-D Haar analysis butterfly over the two leading polyphase axes.

    v[r, s, n, i, j] holds samples whose row offset is r and column offset is s
    inside the current polyphase cell.  Combines the least-significant bit of r
    and s: a=(even,even), b=(even,odd), c=(odd,even), d=(odd,odd).
    Returns (LL, LH, HL, HH), each with the two leading axes halved.
    Only leading-dim reshapes / integer indexing + elementwise math are used.
    """
    P, Q = v.shape[0], v.shape[1]
    rest = v.shape[2:]
    v = v.reshape(P // 2, 2, Q, *rest)
    r_even, r_odd = v[:, 0], v[:, 1]                    # rows 2i / 2i+1
    r_even = r_even.reshape(P // 2, Q // 2, 2, *rest)
    r_odd = r_odd.reshape(P // 2, Q // 2, 2, *rest)
    a, b = r_even[:, :, 0], r_even[:, :, 1]             # (2i, 2j), (2i, 2j+1)
    c, d = r_odd[:, :, 0], r_odd[:, :, 1]               # (2i+1, 2j), (2i+1, 2j+1)
    s_ab, d_ab = a + b, a - b
    s_cd, d_cd = c + d, c - d
    ll = (s_ab + s_cd) * 0.5
    lh = (s_ab - s_cd) * 0.5    # lowpass W, highpass H  -> feat0 (recursed on)
    hl = (d_ab + d_cd) * 0.5    # feat1
    hh = (d_ab - d_cd) * 0.5    # feat2
    return ll, lh, hl, hh


def _pyramid_kernel(xp1_ref, xp2_ref, xp3_ref, out_ref, *, pad_offsets):
    """Fused 3-level Haar pyramid: DWT x3 + zero-pad + channel concat."""
    # Zero the whole padded frame once, then overwrite each band's window.
    out_ref[...] = jnp.zeros(out_ref.shape, out_ref.dtype)
    for depth, ref in enumerate((xp1_ref, xp2_ref, xp3_ref)):
        v = ref[...]                       # (2^(d+1), 2^(d+1), bn, h_d, w_d)
        for _ in range(depth):             # re-derive the LH chain at this depth
            v = _haar_combine(v)[1]
        bands = _haar_combine(v)           # each (1, 1, bn, h_d, w_d)
        bh, bw = v.shape[-2], v.shape[-1]
        p = pad_offsets[depth]
        for k, band in enumerate(bands):
            out_ref[4 * depth + k, :, pl.ds(p, bh), pl.ds(p, bw)] = (
                band[0, 0].astype(out_ref.dtype))


def _polyphase(xn, f):
    """(N, H, W) -> (f, f, N, H//f, W//f) with p[r, s, n, i, j] = x[n, f*i+r, f*j+s]."""
    N, H, W = xn.shape
    return xn.reshape(N, H // f, f, W // f, f).transpose(2, 4, 0, 1, 3)


def dwt_pyramid_block(x, og_size_list):
    """Forward pass of DwtPyramidBlock (J=1, wave='haar', mode='zero')."""
    B, C, H, W = x.shape
    target = int(og_size_list[3])
    if H % 8 != 0 or W % 8 != 0:
        raise ValueError("3-level Haar pyramid requires H and W divisible by 8")
    N = B * C

    # Band sizes & PyTorch-faithful pad offsets (get_pad_size uses the band WIDTH;
    # the reference module implicitly assumes square frames of size og_size_list[3]).
    pad_offsets = []
    for d in range(3):
        bh, bw = H >> (d + 1), W >> (d + 1)
        p = int((target - bw) / 2)
        p1 = p + 1 if bw == 1 else p
        if bh + p + p1 != target or bw + p + p1 != target:
            raise ValueError("padded sub-band does not reach og_size_list[3]; the "
                             "reference module assumes square power-of-two inputs")
        pad_offsets.append(p)

    xn = x.reshape(N, H, W)
    xp1 = _polyphase(xn, 2)     # (2, 2, N, H/2, W/2) — level-0 phases
    xp2 = _polyphase(xn, 4)     # (4, 4, N, H/4, W/4) — level-1 phases
    xp3 = _polyphase(xn, 8)     # (8, 8, N, H/8, W/8) — level-2 phases

    # Tile over the collapsed batch*channel axis with the largest block that
    # divides N (the whole axis for small problems).
    bn = N if N <= 512 else max(d for d in range(1, 513) if N % d == 0)
    grid = (N // bn,)

    in_specs = [
        pl.BlockSpec((2, 2, bn, H // 2, W // 2), lambda n: (0, 0, n, 0, 0)),
        pl.BlockSpec((4, 4, bn, H // 4, W // 4), lambda n: (0, 0, n, 0, 0)),
        pl.BlockSpec((8, 8, bn, H // 8, W // 8), lambda n: (0, 0, n, 0, 0)),
    ]
    out_specs = pl.BlockSpec((12, bn, target, target), lambda n: (0, n, 0, 0))

    out = pl.pallas_call(
        functools.partial(_pyramid_kernel, pad_offsets=tuple(pad_offsets)),
        out_shape=jax.ShapeDtypeStruct((12, N, target, target), x.dtype),
        grid=grid,
        in_specs=in_specs,
        out_specs=out_specs,
        compiler_params=pltpu.CompilerParams(dimension_semantics=("parallel",)),
    )(xp1, xp2, xp3)

    # (12, B*C, S, S) -> (B, 12*C, S, S): band-major channel concat, matching the
    # reference torch.cat over the 12 padded sub-bands.
    out = out.reshape(12, B, C, target, target)
    out = out.transpose(1, 0, 2, 3, 4).reshape(B, 12 * C, target, target)
    return out


# ----------------------------- pure-JAX reference -----------------------------

def _haar_level_ref(x):
    B, C, H, W = x.shape
    xr = x.reshape(B, C, H // 2, 2, W // 2, 2)
    a = xr[:, :, :, 0, :, 0]
    b = xr[:, :, :, 0, :, 1]
    c = xr[:, :, :, 1, :, 0]
    d = xr[:, :, :, 1, :, 1]
    return ((a + b + c + d) * 0.5, (a + b - c - d) * 0.5,
            (a - b + c - d) * 0.5, (a - b - c + d) * 0.5)


def _dwt_pyramid_ref(x, og_size_list):
    bands = []
    cur = x
    for _ in range(3):
        ll, lh, hl, hh = _haar_level_ref(cur)
        bands.extend([ll, lh, hl, hh])
        cur = lh
    target = og_size_list[3]
    padded = []
    for t in bands:
        p = int((target - t.shape[3]) / 2)
        p1 = p + 1 if t.shape[3] == 1 else p
        padded.append(jnp.pad(t, ((0, 0), (0, 0), (p, p1), (p, p1))))
    return jnp.concatenate(padded, axis=1)


if __name__ == "__main__":
    key = jax.random.PRNGKey(0)
    B, C, H, W = 2, 4, 16, 16
    x = jax.random.normal(key, (B, C, H, W), dtype=jnp.float32)
    og_size_list = [B, C, H, W]

    fwd = jax.jit(lambda inp: dwt_pyramid_block(inp, og_size_list))
    out = jax.block_until_ready(fwd(x))

    # 12 sub-bands, each padded back to HxW, concatenated on channels.
    assert out.shape == (B, 12 * C, H, W), out.shape

    ref = _dwt_pyramid_ref(x, og_size_list)
    assert jnp.allclose(out, ref, atol=1e-5), "Pallas DWT pyramid mismatch vs reference"

    print("KERNEL_OK")
</pallas_src>

<mosaic_0001>
module attributes {stable_mosaic.version = 11 : i64} {
  func.func @_pyramid_kernel(%arg0: i32, %arg1: memref<2x2x8x8x8xf32, #tpu.memory_space<vmem>>, %arg2: memref<4x4x8x4x4xf32, #tpu.memory_space<vmem>>, %arg3: memref<8x8x8x2x2xf32, #tpu.memory_space<vmem>>, %arg4: memref<12x8x16x16xf32, #tpu.memory_space<vmem>>) attributes {dimension_semantics = [#tpu.dimension_semantics<parallel>], iteration_bounds = array<i64: 1>, scalar_prefetch = 0 : i64, scratch_operands = 0 : i64, tpu.core_type = #tpu.core_type<tc>, window_params = [{transform_indices = @transform_0, window_bounds = array<i64: 2, 2, 8, 8, 8>}, {transform_indices = @transform_1, window_bounds = array<i64: 4, 4, 8, 4, 4>}, {transform_indices = @transform_2, window_bounds = array<i64: 8, 8, 8, 2, 2>}, {transform_indices = @transform_3, window_bounds = array<i64: 12, 8, 16, 16>}]} {
    %cst = arith.constant 0.000000e+00 : f32
    %0 = vector.broadcast %cst : f32 to vector<12x8x16x16xf32>
    %c0 = arith.constant 0 : index
    %c0_0 = arith.constant 0 : index
    %c0_1 = arith.constant 0 : index
    %c0_2 = arith.constant 0 : index
    %1 = vector.load %arg4[%c0, %c0_0, %c0_1, %c0_2] : memref<12x8x16x16xf32, #tpu.memory_space<vmem>>, vector<12x8x16x16xf32>
    tpu.vector_store %arg4[%c0, %c0_0, %c0_1, %c0_2], %0 {strides = array<i32>} : memref<12x8x16x16xf32, #tpu.memory_space<vmem>>, vector<12x8x16x16xf32>,
    %c0_3 = arith.constant 0 : index
    %c0_4 = arith.constant 0 : index
    %c0_5 = arith.constant 0 : index
    %c0_6 = arith.constant 0 : index
    %c0_7 = arith.constant 0 : index
    %2 = vector.load %arg1[%c0_3, %c0_4, %c0_5, %c0_6, %c0_7] : memref<2x2x8x8x8xf32, #tpu.memory_space<vmem>>, vector<2x2x8x8x8xf32>
    %3 = vector.shape_cast %2 : vector<2x2x8x8x8xf32> to vector<1x2x2x8x8x8xf32>
    %4 = vector.extract_strided_slice %3 {offsets = [0, 0, 0, 0, 0, 0], sizes = [1, 1, 2, 8, 8, 8], strides = [1, 1, 1, 1, 1, 1]} : vector<1x2x2x8x8x8xf32> to vector<1x1x2x8x8x8xf32>
    %5 = vector.shape_cast %4 : vector<1x1x2x8x8x8xf32> to vector<1x2x8x8x8xf32>
    %6 = vector.extract_strided_slice %3 {offsets = [0, 1, 0, 0, 0, 0], sizes = [1, 1, 2, 8, 8, 8], strides = [1, 1, 1, 1, 1, 1]} : vector<1x2x2x8x8x8xf32> to vector<1x1x2x8x8x8xf32>
    %7 = vector.shape_cast %6 : vector<1x1x2x8x8x8xf32> to vector<1x2x8x8x8xf32>
    %8 = vector.shape_cast %5 : vector<1x2x8x8x8xf32> to vector<1x1x2x8x8x8xf32>
    %9 = vector.shape_cast %7 : vector<1x2x8x8x8xf32> to vector<1x1x2x8x8x8xf32>
    %10 = vector.extract_strided_slice %8 {offsets = [0, 0, 0, 0, 0, 0], sizes = [1, 1, 1, 8, 8, 8], strides = [1, 1, 1, 1, 1, 1]} : vector<1x1x2x8x8x8xf32> to vector<1x1x1x8x8x8xf32>
    %11 = vector.shape_cast %10 : vector<1x1x1x8x8x8xf32> to vector<1x1x8x8x8xf32>
    %12 = vector.extract_strided_slice %8 {offsets = [0, 0, 1, 0, 0, 0], sizes = [1, 1, 1, 8, 8, 8], strides = [1, 1, 1, 1, 1, 1]} : vector<1x1x2x8x8x8xf32> to vector<1x1x1x8x8x8xf32>
    %13 = vector.shape_cast %12 : vector<1x1x1x8x8x8xf32> to vector<1x1x8x8x8xf32>
    %14 = vector.extract_strided_slice %9 {offsets = [0, 0, 0, 0, 0, 0], sizes = [1, 1, 1, 8, 8, 8], strides = [1, 1, 1, 1, 1, 1]} : vector<1x1x2x8x8x8xf32> to vector<1x1x1x8x8x8xf32>
    %15 = vector.shape_cast %14 : vector<1x1x1x8x8x8xf32> to vector<1x1x8x8x8xf32>
    %16 = vector.extract_strided_slice %9 {offsets = [0, 0, 1, 0, 0, 0], sizes = [1, 1, 1, 8, 8, 8], strides = [1, 1, 1, 1, 1, 1]} : vector<1x1x2x8x8x8xf32> to vector<1x1x1x8x8x8xf32>
    %17 = vector.shape_cast %16 : vector<1x1x1x8x8x8xf32> to vector<1x1x8x8x8xf32>
    %18 = arith.addf %11, %13 : vector<1x1x8x8x8xf32>
    %19 = arith.subf %11, %13 : vector<1x1x8x8x8xf32>
    %20 = arith.addf %15, %17 : vector<1x1x8x8x8xf32>
    %21 = arith.subf %15, %17 : vector<1x1x8x8x8xf32>
    %22 = arith.addf %18, %20 : vector<1x1x8x8x8xf32>
    %cst_8 = arith.constant 5.000000e-01 : f32
    %23 = vector.broadcast %cst_8 : f32 to vector<1x1x8x8x8xf32>
    %24 = arith.mulf %22, %23 : vector<1x1x8x8x8xf32>
    %25 = arith.subf %18, %20 : vector<1x1x8x8x8xf32>
    %cst_9 = arith.constant 5.000000e-01 : f32
    %26 = vector.broadcast %cst_9 : f32 to vector<1x1x8x8x8xf32>
    %27 = arith.mulf %25, %26 : vector<1x1x8x8x8xf32>
    %28 = arith.addf %19, %21 : vector<1x1x8x8x8xf32>
    %cst_10 = arith.constant 5.000000e-01 : f32
    %29 = vector.broadcast %cst_10 : f32 to vector<1x1x8x8x8xf32>
    %30 = arith.mulf %28, %29 : vector<1x1x8x8x8xf32>
    %31 = arith.subf %19, %21 : vector<1x1x8x8x8xf32>
    %cst_11 = arith.constant 5.000000e-01 : f32
    %32 = vector.broadcast %cst_11 : f32 to vector<1x1x8x8x8xf32>
    %33 = arith.mulf %31, %32 : vector<1x1x8x8x8xf32>
    %34 = vector.shape_cast %24 : vector<1x1x8x8x8xf32> to vector<8x8x8xf32>
    %c0_12 = arith.constant 0 : index
    %c0_13 = arith.constant 0 : index
    %c4 = arith.constant 4 : index
    %c4_14 = arith.constant 4 : index
    %35 = vector.load %arg4[%c0_12, %c0_13, %c4, %c4_14] : memref<12x8x16x16xf32, #tpu.memory_space<vmem>>, vector<1x8x8x8xf32>
    %36 = vector.shape_cast %35 : vector<1x8x8x8xf32> to vector<8x8x8xf32>
    %37 = vector.shape_cast %34 : vector<8x8x8xf32> to vector<1x8x8x8xf32>
    tpu.vector_store %arg4[%c0_12, %c0_13, %c4, %c4_14], %37 {strides = array<i32>} : memref<12x8x16x16xf32, #tpu.memory_space<vmem>>, vector<1x8x8x8xf32>,
    %38 = vector.shape_cast %27 : vector<1x1x8x8x8xf32> to vector<8x8x8xf32>
    %c1 = arith.constant 1 : index
    %c0_15 = arith.constant 0 : index
    %c4_16 = arith.constant 4 : index
    %c4_17 = arith.constant 4 : index
    %39 = vector.load %arg4[%c1, %c0_15, %c4_16, %c4_17] : memref<12x8x16x16xf32, #tpu.memory_space<vmem>>, vector<1x8x8x8xf32>
    %40 = vector.shape_cast %39 : vector<1x8x8x8xf32> to vector<8x8x8xf32>
    %41 = vector.shape_cast %38 : vector<8x8x8xf32> to vector<1x8x8x8xf32>
    tpu.vector_store %arg4[%c1, %c0_15, %c4_16, %c4_17], %41 {strides = array<i32>} : memref<12x8x16x16xf32, #tpu.memory_space<vmem>>, vector<1x8x8x8xf32>,
    %42 = vector.shape_cast %30 : vector<1x1x8x8x8xf32> to vector<8x8x8xf32>
    %c2 = arith.constant 2 : index
    %c0_18 = arith.constant 0 : index
    %c4_19 = arith.constant 4 : index
    %c4_20 = arith.constant 4 : index
    %43 = vector.load %arg4[%c2, %c0_18, %c4_19, %c4_20] : memref<12x8x16x16xf32, #tpu.memory_space<vmem>>, vector<1x8x8x8xf32>
    %44 = vector.shape_cast %43 : vector<1x8x8x8xf32> to vector<8x8x8xf32>
    %45 = vector.shape_cast %42 : vector<8x8x8xf32> to vector<1x8x8x8xf32>
    tpu.vector_store %arg4[%c2, %c0_18, %c4_19, %c4_20], %45 {strides = array<i32>} : memref<12x8x16x16xf32, #tpu.memory_space<vmem>>, vector<1x8x8x8xf32>,
    %46 = vector.shape_cast %33 : vector<1x1x8x8x8xf32> to vector<8x8x8xf32>
    %c3 = arith.constant 3 : index
    %c0_21 = arith.constant 0 : index
    %c4_22 = arith.constant 4 : index
    %c4_23 = arith.constant 4 : index
    %47 = vector.load %arg4[%c3, %c0_21, %c4_22, %c4_23] : memref<12x8x16x16xf32, #tpu.memory_space<vmem>>, vector<1x8x8x8xf32>
    %48 = vector.shape_cast %47 : vector<1x8x8x8xf32> to vector<8x8x8xf32>
    %49 = vector.shape_cast %46 : vector<8x8x8xf32> to vector<1x8x8x8xf32>
    tpu.vector_store %arg4[%c3, %c0_21, %c4_22, %c4_23], %49 {strides = array<i32>} : memref<12x8x16x16xf32, #tpu.memory_space<vmem>>, vector<1x8x8x8xf32>,
    %c0_24 = arith.constant 0 : index
    %c0_25 = arith.constant 0 : index
    %c0_26 = arith.constant 0 : index
    %c0_27 = arith.constant 0 : index
    %c0_28 = arith.constant 0 : index
    %50 = vector.load %arg2[%c0_24, %c0_25, %c0_26, %c0_27, %c0_28] : memref<4x4x8x4x4xf32, #tpu.memory_space<vmem>>, vector<4x4x8x4x4xf32>
    %51 = vector.shape_cast %50 : vector<4x4x8x4x4xf32> to vector<2x2x4x8x4x4xf32>
    %52 = vector.extract_strided_slice %51 {offsets = [0, 0, 0, 0, 0, 0], sizes = [2, 1, 4, 8, 4, 4], strides = [1, 1, 1, 1, 1, 1]} : vector<2x2x4x8x4x4xf32> to vector<2x1x4x8x4x4xf32>
    %53 = vector.shape_cast %52 : vector<2x1x4x8x4x4xf32> to vector<2x4x8x4x4xf32>
    %54 = vector.extract_strided_slice %51 {offsets = [0, 1, 0, 0, 0, 0], sizes = [2, 1, 4, 8, 4, 4], strides = [1, 1, 1, 1, 1, 1]} : vector<2x2x4x8x4x4xf32> to vector<2x1x4x8x4x4xf32>
    %55 = vector.shape_cast %54 : vector<2x1x4x8x4x4xf32> to vector<2x4x8x4x4xf32>
    %56 = vector.shape_cast %53 : vector<2x4x8x4x4xf32> to vector<2x2x2x8x4x4xf32>
    %57 = vector.shape_cast %55 : vector<2x4x8x4x4xf32> to vector<2x2x2x8x4x4xf32>
    %58 = vector.extract_strided_slice %56 {offsets = [0, 0, 0, 0, 0, 0], sizes = [2, 2, 1, 8, 4, 4], strides = [1, 1, 1, 1, 1, 1]} : vector<2x2x2x8x4x4xf32> to vector<2x2x1x8x4x4xf32>
    %59 = vector.shape_cast %58 : vector<2x2x1x8x4x4xf32> to vector<2x2x8x4x4xf32>
    %60 = vector.extract_strided_slice %56 {offsets = [0, 0, 1, 0, 0, 0], sizes = [2, 2, 1, 8, 4, 4], strides = [1, 1, 1, 1, 1, 1]} : vector<2x2x2x8x4x4xf32> to vector<2x2x1x8x4x4xf32>
    %61 = vector.shape_cast %60 : vector<2x2x1x8x4x4xf32> to vector<2x2x8x4x4xf32>
    %62 = vector.extract_strided_slice %57 {offsets = [0, 0, 0, 0, 0, 0], sizes = [2, 2, 1, 8, 4, 4], strides = [1, 1, 1, 1, 1, 1]} : vector<2x2x2x8x4x4xf32> to vector<2x2x1x8x4x4xf32>
    %63 = vector.shape_cast %62 : vector<2x2x1x8x4x4xf32> to vector<2x2x8x4x4xf32>
    %64 = vector.extract_strided_slice %57 {offsets = [0, 0, 1, 0, 0, 0], sizes = [2, 2, 1, 8, 4, 4], strides = [1, 1, 1, 1, 1, 1]} : vector<2x2x2x8x4x4xf32> to vector<2x2x1x8x4x4xf32>
    %65 = vector.shape_cast %64 : vector<2x2x1x8x4x4xf32> to vector<2x2x8x4x4xf32>
    %66 = arith.addf %59, %61 : vector<2x2x8x4x4xf32>
    %67 = arith.addf %63, %65 : vector<2x2x8x4x4xf32>
    %68 = arith.subf %66, %67 : vector<2x2x8x4x4xf32>
    %cst_29 = arith.constant 5.000000e-01 : f32
    %69 = vector.broadcast %cst_29 : f32 to vector<2x2x8x4x4xf32>
    %70 = arith.mulf %68, %69 : vector<2x2x8x4x4xf32>
    %71 = vector.shape_cast %70 : vector<2x2x8x4x4xf32> to vector<1x2x2x8x4x4xf32>
    %72 = vector.extract_strided_slice %71 {offsets = [0, 0, 0, 0, 0, 0], sizes = [1, 1, 2, 8, 4, 4], strides = [1, 1, 1, 1, 1, 1]} : vector<1x2x2x8x4x4xf32> to vector<1x1x2x8x4x4xf32>
    %73 = vector.shape_cast %72 : vector<1x1x2x8x4x4xf32> to vector<1x2x8x4x4xf32>
    %74 = vector.extract_strided_slice %71 {offsets = [0, 1, 0, 0, 0, 0], sizes = [1, 1, 2, 8, 4, 4], strides = [1, 1, 1, 1, 1, 1]} : vector<1x2x2x8x4x4xf32> to vector<1x1x2x8x4x4xf32>
    %75 = vector.shape_cast %74 : vector<1x1x2x8x4x4xf32> to vector<1x2x8x4x4xf32>
    %76 = vector.shape_cast %73 : vector<1x2x8x4x4xf32> to vector<1x1x2x8x4x4xf32>
    %77 = vector.shape_cast %75 : vector<1x2x8x4x4xf32> to vector<1x1x2x8x4x4xf32>
    %78 = vector.extract_strided_slice %76 {offsets = [0, 0, 0, 0, 0, 0], sizes = [1, 1, 1, 8, 4, 4], strides = [1, 1, 1, 1, 1, 1]} : vector<1x1x2x8x4x4xf32> to vector<1x1x1x8x4x4xf32>
    %79 = vector.shape_cast %78 : vector<1x1x1x8x4x4xf32> to vector<1x1x8x4x4xf32>
    %80 = vector.extract_strided_slice %76 {offsets = [0, 0, 1, 0, 0, 0], sizes = [1, 1, 1, 8, 4, 4], strides = [1, 1, 1, 1, 1, 1]} : vector<1x1x2x8x4x4xf32> to vector<1x1x1x8x4x4xf32>
    %81 = vector.shape_cast %80 : vector<1x1x1x8x4x4xf32> to vector<1x1x8x4x4xf32>
    %82 = vector.extract_strided_slice %77 {offsets = [0, 0, 0, 0, 0, 0], sizes = [1, 1, 1, 8, 4, 4], strides = [1, 1, 1, 1, 1, 1]} : vector<1x1x2x8x4x4xf32> to vector<1x1x1x8x4x4xf32>
    %83 = vector.shape_cast %82 : vector<1x1x1x8x4x4xf32> to vector<1x1x8x4x4xf32>
    %84 = vector.extract_strided_slice %77 {offsets = [0, 0, 1, 0, 0, 0], sizes = [1, 1, 1, 8, 4, 4], strides = [1, 1, 1, 1, 1, 1]} : vector<1x1x2x8x4x4xf32> to vector<1x1x1x8x4x4xf32>
    %85 = vector.shape_cast %84 : vector<1x1x1x8x4x4xf32> to vector<1x1x8x4x4xf32>
    %86 = arith.addf %79, %81 : vector<1x1x8x4x4xf32>
    %87 = arith.subf %79, %81 : vector<1x1x8x4x4xf32>
    %88 = arith.addf %83, %85 : vector<1x1x8x4x4xf32>
    %89 = arith.subf %83, %85 : vector<1x1x8x4x4xf32>
    %90 = arith.addf %86, %88 : vector<1x1x8x4x4xf32>
    %cst_30 = arith.constant 5.000000e-01 : f32
    %91 = vector.broadcast %cst_30 : f32 to vector<1x1x8x4x4xf32>
    %92 = arith.mulf %90, %91 : vector<1x1x8x4x4xf32>
    %93 = arith.subf %86, %88 : vector<1x1x8x4x4xf32>
    %cst_31 = arith.constant 5.000000e-01 : f32
    %94 = vector.broadcast %cst_31 : f32 to vector<1x1x8x4x4xf32>
    %95 = arith.mulf %93, %94 : vector<1x1x8x4x4xf32>
    %96 = arith.addf %87, %89 : vector<1x1x8x4x4xf32>
    %cst_32 = arith.constant 5.000000e-01 : f32
    %97 = vector.broadcast %cst_32 : f32 to vector<1x1x8x4x4xf32>
    %98 = arith.mulf %96, %97 : vector<1x1x8x4x4xf32>
    %99 = arith.subf %87, %89 : vector<1x1x8x4x4xf32>
    %cst_33 = arith.constant 5.000000e-01 : f32
    %100 = vector.broadcast %cst_33 : f32 to vector<1x1x8x4x4xf32>
    %101 = arith.mulf %99, %100 : vector<1x1x8x4x4xf32>
    %102 = vector.shape_cast %92 : vector<1x1x8x4x4xf32> to vector<8x4x4xf32>
    %c4_34 = arith.constant 4 : index
    %c0_35 = arith.constant 0 : index
    %c6 = arith.constant 6 : index
    %c6_36 = arith.constant 6 : index
    %103 = vector.load %arg4[%c4_34, %c0_35, %c6, %c6_36] : memref<12x8x16x16xf32, #tpu.memory_space<vmem>>, vector<1x8x4x4xf32>
    %104 = vector.shape_cast %103 : vector<1x8x4x4xf32> to vector<8x4x4xf32>
    %105 = vector.shape_cast %102 : vector<8x4x4xf32> to vector<1x8x4x4xf32>
    tpu.vector_store %arg4[%c4_34, %c0_35, %c6, %c6_36], %105 {strides = array<i32>} : memref<12x8x16x16xf32, #tpu.memory_space<vmem>>, vector<1x8x4x4xf32>,
    %106 = vector.shape_cast %95 : vector<1x1x8x4x4xf32> to vector<8x4x4xf32>
    %c5 = arith.constant 5 : index
    %c0_37 = arith.constant 0 : index
    %c6_38 = arith.constant 6 : index
    %c6_39 = arith.constant 6 : index
    %107 = vector.load %arg4[%c5, %c0_37, %c6_38, %c6_39] : memref<12x8x16x16xf32, #tpu.memory_space<vmem>>, vector<1x8x4x4xf32>
    %108 = vector.shape_cast %107 : vector<1x8x4x4xf32> to vector<8x4x4xf32>
    %109 = vector.shape_cast %106 : vector<8x4x4xf32> to vector<1x8x4x4xf32>
    tpu.vector_store %arg4[%c5, %c0_37, %c6_38, %c6_39], %109 {strides = array<i32>} : memref<12x8x16x16xf32, #tpu.memory_space<vmem>>, vector<1x8x4x4xf32>,
    %110 = vector.shape_cast %98 : vector<1x1x8x4x4xf32> to vector<8x4x4xf32>
    %c6_40 = arith.constant 6 : index
    %c0_41 = arith.constant 0 : index
    %c6_42 = arith.constant 6 : index
    %c6_43 = arith.constant 6 : index
    %111 = vector.load %arg4[%c6_40, %c0_41, %c6_42, %c6_43] : memref<12x8x16x16xf32, #tpu.memory_space<vmem>>, vector<1x8x4x4xf32>
    %112 = vector.shape_cast %111 : vector<1x8x4x4xf32> to vector<8x4x4xf32>
    %113 = vector.shape_cast %110 : vector<8x4x4xf32> to vector<1x8x4x4xf32>
    tpu.vector_store %arg4[%c6_40, %c0_41, %c6_42, %c6_43], %113 {strides = array<i32>} : memref<12x8x16x16xf32, #tpu.memory_space<vmem>>, vector<1x8x4x4xf32>,
    %114 = vector.shape_cast %101 : vector<1x1x8x4x4xf32> to vector<8x4x4xf32>
    %c7 = arith.constant 7 : index
    %c0_44 = arith.constant 0 : index
    %c6_45 = arith.constant 6 : index
    %c6_46 = arith.constant 6 : index
    %115 = vector.load %arg4[%c7, %c0_44, %c6_45, %c6_46] : memref<12x8x16x16xf32, #tpu.memory_space<vmem>>, vector<1x8x4x4xf32>
    %116 = vector.shape_cast %115 : vector<1x8x4x4xf32> to vector<8x4x4xf32>
    %117 = vector.shape_cast %114 : vector<8x4x4xf32> to vector<1x8x4x4xf32>
    tpu.vector_store %arg4[%c7, %c0_44, %c6_45, %c6_46], %117 {strides = array<i32>} : memref<12x8x16x16xf32, #tpu.memory_space<vmem>>, vector<1x8x4x4xf32>,
    %c0_47 = arith.constant 0 : index
    %c0_48 = arith.constant 0 : index
    %c0_49 = arith.constant 0 : index
    %c0_50 = arith.constant 0 : index
    %c0_51 = arith.constant 0 : index
    %118 = vector.load %arg3[%c0_47, %c0_48, %c0_49, %c0_50, %c0_51] : memref<8x8x8x2x2xf32, #tpu.memory_space<vmem>>, vector<8x8x8x2x2xf32>
    %119 = vector.shape_cast %118 : vector<8x8x8x2x2xf32> to vector<4x2x8x8x2x2xf32>
    %120 = vector.extract_strided_slice %119 {offsets = [0, 0, 0, 0, 0, 0], sizes = [4, 1, 8, 8, 2, 2], strides = [1, 1, 1, 1, 1, 1]} : vector<4x2x8x8x2x2xf32> to vector<4x1x8x8x2x2xf32>
    %121 = vector.shape_cast %120 : vector<4x1x8x8x2x2xf32> to vector<4x8x8x2x2xf32>
    %122 = vector.extract_strided_slice %119 {offsets = [0, 1, 0, 0, 0, 0], sizes = [4, 1, 8, 8, 2, 2], strides = [1, 1, 1, 1, 1, 1]} : vector<4x2x8x8x2x2xf32> to vector<4x1x8x8x2x2xf32>
    %123 = vector.shape_cast %122 : vector<4x1x8x8x2x2xf32> to vector<4x8x8x2x2xf32>
    %124 = vector.shape_cast %121 : vector<4x8x8x2x2xf32> to vector<4x4x2x8x2x2xf32>
    %125 = vector.shape_cast %123 : vector<4x8x8x2x2xf32> to vector<4x4x2x8x2x2xf32>
    %126 = vector.extract_strided_slice %124 {offsets = [0, 0, 0, 0, 0, 0], sizes = [4, 4, 1, 8, 2, 2], strides = [1, 1, 1, 1, 1, 1]} : vector<4x4x2x8x2x2xf32> to vector<4x4x1x8x2x2xf32>
    %127 = vector.shape_cast %126 : vector<4x4x1x8x2x2xf32> to vector<4x4x8x2x2xf32>
    %128 = vector.extract_strided_slice %124 {offsets = [0, 0, 1, 0, 0, 0], sizes = [4, 4, 1, 8, 2, 2], strides = [1, 1, 1, 1, 1, 1]} : vector<4x4x2x8x2x2xf32> to vector<4x4x1x8x2x2xf32>
    %129 = vector.shape_cast %128 : vector<4x4x1x8x2x2xf32> to vector<4x4x8x2x2xf32>
    %130 = vector.extract_strided_slice %125 {offsets = [0, 0, 0, 0, 0, 0], sizes = [4, 4, 1, 8, 2, 2], strides = [1, 1, 1, 1, 1, 1]} : vector<4x4x2x8x2x2xf32> to vector<4x4x1x8x2x2xf32>
    %131 = vector.shape_cast %130 : vector<4x4x1x8x2x2xf32> to vector<4x4x8x2x2xf32>
    %132 = vector.extract_strided_slice %125 {offsets = [0, 0, 1, 0, 0, 0], sizes = [4, 4, 1, 8, 2, 2], strides = [1, 1, 1, 1, 1, 1]} : vector<4x4x2x8x2x2xf32> to vector<4x4x1x8x2x2xf32>
    %133 = vector.shape_cast %132 : vector<4x4x1x8x2x2xf32> to vector<4x4x8x2x2xf32>
    %134 = arith.addf %127, %129 : vector<4x4x8x2x2xf32>
    %135 = arith.addf %131, %133 : vector<4x4x8x2x2xf32>
    %136 = arith.subf %134, %135 : vector<4x4x8x2x2xf32>
    %cst_52 = arith.constant 5.000000e-01 : f32
    %137 = vector.broadcast %cst_52 : f32 to vector<4x4x8x2x2xf32>
    %138 = arith.mulf %136, %137 : vector<4x4x8x2x2xf32>
    %139 = vector.shape_cast %138 : vector<4x4x8x2x2xf32> to vector<2x2x4x8x2x2xf32>
    %140 = vector.extract_strided_slice %139 {offsets = [0, 0, 0, 0, 0, 0], sizes = [2, 1, 4, 8, 2, 2], strides = [1, 1, 1, 1, 1, 1]} : vector<2x2x4x8x2x2xf32> to vector<2x1x4x8x2x2xf32>
    %141 = vector.shape_cast %140 : vector<2x1x4x8x2x2xf32> to vector<2x4x8x2x2xf32>
    %142 = vector.extract_strided_slice %139 {offsets = [0, 1, 0, 0, 0, 0], sizes = [2, 1, 4, 8, 2, 2], strides = [1, 1, 1, 1, 1, 1]} : vector<2x2x4x8x2x2xf32> to vector<2x1x4x8x2x2xf32>
    %143 = vector.shape_cast %142 : vector<2x1x4x8x2x2xf32> to vector<2x4x8x2x2xf32>
    %144 = vector.shape_cast %141 : vector<2x4x8x2x2xf32> to vector<2x2x2x8x2x2xf32>
    %145 = vector.shape_cast %143 : vector<2x4x8x2x2xf32> to vector<2x2x2x8x2x2xf32>
    %146 = vector.extract_strided_slice %144 {offsets = [0, 0, 0, 0, 0, 0], sizes = [2, 2, 1, 8, 2, 2], strides = [1, 1, 1, 1, 1, 1]} : vector<2x2x2x8x2x2xf32> to vector<2x2x1x8x2x2xf32>
    %147 = vector.shape_cast %146 : vector<2x2x1x8x2x2xf32> to vector<2x2x8x2x2xf32>
    %148 = vector.extract_strided_slice %144 {offsets = [0, 0, 1, 0, 0, 0], sizes = [2, 2, 1, 8, 2, 2], strides = [1, 1, 1, 1, 1, 1]} : vector<2x2x2x8x2x2xf32> to vector<2x2x1x8x2x2xf32>
    %149 = vector.shape_cast %148 : vector<2x2x1x8x2x2xf32> to vector<2x2x8x2x2xf32>
    %150 = vector.extract_strided_slice %145 {offsets = [0, 0, 0, 0, 0, 0], sizes = [2, 2, 1, 8, 2, 2], strides = [1, 1, 1, 1, 1, 1]} : vector<2x2x2x8x2x2xf32> to vector<2x2x1x8x2x2xf32>
    %151 = vector.shape_cast %150 : vector<2x2x1x8x2x2xf32> to vector<2x2x8x2x2xf32>
    %152 = vector.extract_strided_slice %145 {offsets = [0, 0, 1, 0, 0, 0], sizes = [2, 2, 1, 8, 2, 2], strides = [1, 1, 1, 1, 1, 1]} : vector<2x2x2x8x2x2xf32> to vector<2x2x1x8x2x2xf32>
    %153 = vector.shape_cast %152 : vector<2x2x1x8x2x2xf32> to vector<2x2x8x2x2xf32>
    %154 = arith.addf %147, %149 : vector<2x2x8x2x2xf32>
    %155 = arith.addf %151, %153 : vector<2x2x8x2x2xf32>
    %156 = arith.subf %154, %155 : vector<2x2x8x2x2xf32>
    %cst_53 = arith.constant 5.000000e-01 : f32
    %157 = vector.broadcast %cst_53 : f32 to vector<2x2x8x2x2xf32>
    %158 = arith.mulf %156, %157 : vector<2x2x8x2x2xf32>
    %159 = vector.shape_cast %158 : vector<2x2x8x2x2xf32> to vector<1x2x2x8x2x2xf32>
    %160 = vector.extract_strided_slice %159 {offsets = [0, 0, 0, 0, 0, 0], sizes = [1, 1, 2, 8, 2, 2], strides = [1, 1, 1, 1, 1, 1]} : vector<1x2x2x8x2x2xf32> to vector<1x1x2x8x2x2xf32>
    %161 = vector.shape_cast %160 : vector<1x1x2x8x2x2xf32> to vector<1x2x8x2x2xf32>
    %162 = vector.extract_strided_slice %159 {offsets = [0, 1, 0, 0, 0, 0], sizes = [1, 1, 2, 8, 2, 2], strides = [1, 1, 1, 1, 1, 1]} : vector<1x2x2x8x2x2xf32> to vector<1x1x2x8x2x2xf32>
    %163 = vector.shape_cast %162 : vector<1x1x2x8x2x2xf32> to vector<1x2x8x2x2xf32>
    %164 = vector.shape_cast %161 : vector<1x2x8x2x2xf32> to vector<1x1x2x8x2x2xf32>
    %165 = vector.shape_cast %163 : vector<1x2x8x2x2xf32> to vector<1x1x2x8x2x2xf32>
    %166 = vector.extract_strided_slice %164 {offsets = [0, 0, 0, 0, 0, 0], sizes = [1, 1, 1, 8, 2, 2], strides = [1, 1, 1, 1, 1, 1]} : vector<1x1x2x8x2x2xf32> to vector<1x1x1x8x2x2xf32>
    %167 = vector.shape_cast %166 : vector<1x1x1x8x2x2xf32> to vector<1x1x8x2x2xf32>
    %168 = vector.extract_strided_slice %164 {offsets = [0, 0, 1, 0, 0, 0], sizes = [1, 1, 1, 8, 2, 2], strides = [1, 1, 1, 1, 1, 1]} : vector<1x1x2x8x2x2xf32> to vector<1x1x1x8x2x2xf32>
    %169 = vector.shape_cast %168 : vector<1x1x1x8x2x2xf32> to vector<1x1x8x2x2xf32>
    %170 = vector.extract_strided_slice %165 {offsets = [0, 0, 0, 0, 0, 0], sizes = [1, 1, 1, 8, 2, 2], strides = [1, 1, 1, 1, 1, 1]} : vector<1x1x2x8x2x2xf32> to vector<1x1x1x8x2x2xf32>
    %171 = vector.shape_cast %170 : vector<1x1x1x8x2x2xf32> to vector<1x1x8x2x2xf32>
    %172 = vector.extract_strided_slice %165 {offsets = [0, 0, 1, 0, 0, 0], sizes = [1, 1, 1, 8, 2, 2], strides = [1, 1, 1, 1, 1, 1]} : vector<1x1x2x8x2x2xf32> to vector<1x1x1x8x2x2xf32>
    %173 = vector.shape_cast %172 : vector<1x1x1x8x2x2xf32> to vector<1x1x8x2x2xf32>
    %174 = arith.addf %167, %169 : vector<1x1x8x2x2xf32>
    %175 = arith.subf %167, %169 : vector<1x1x8x2x2xf32>
    %176 = arith.addf %171, %173 : vector<1x1x8x2x2xf32>
    %177 = arith.subf %171, %173 : vector<1x1x8x2x2xf32>
    %178 = arith.addf %174, %176 : vector<1x1x8x2x2xf32>
    %cst_54 = arith.constant 5.000000e-01 : f32
    %179 = vector.broadcast %cst_54 : f32 to vector<1x1x8x2x2xf32>
    %180 = arith.mulf %178, %179 : vector<1x1x8x2x2xf32>
    %181 = arith.subf %174, %176 : vector<1x1x8x2x2xf32>
    %cst_55 = arith.constant 5.000000e-01 : f32
    %182 = vector.broadcast %cst_55 : f32 to vector<1x1x8x2x2xf32>
    %183 = arith.mulf %181, %182 : vector<1x1x8x2x2xf32>
    %184 = arith.addf %175, %177 : vector<1x1x8x2x2xf32>
    %cst_56 = arith.constant 5.000000e-01 : f32
    %185 = vector.broadcast %cst_56 : f32 to vector<1x1x8x2x2xf32>
    %186 = arith.mulf %184, %185 : vector<1x1x8x2x2xf32>
    %187 = arith.subf %175, %177 : vector<1x1x8x2x2xf32>
    %cst_57 = arith.constant 5.000000e-01 : f32
    %188 = vector.broadcast %cst_57 : f32 to vector<1x1x8x2x2xf32>
    %189 = arith.mulf %187, %188 : vector<1x1x8x2x2xf32>
    %190 = vector.shape_cast %180 : vector<1x1x8x2x2xf32> to vector<8x2x2xf32>
    %c8 = arith.constant 8 : index
    %c0_58 = arith.constant 0 : index
    %c7_59 = arith.constant 7 : index
    %c7_60 = arith.constant 7 : index
    %191 = vector.load %arg4[%c8, %c0_58, %c7_59, %c7_60] : memref<12x8x16x16xf32, #tpu.memory_space<vmem>>, vector<1x8x2x2xf32>
    %192 = vector.shape_cast %191 : vector<1x8x2x2xf32> to vector<8x2x2xf32>
    %193 = vector.shape_cast %190 : vector<8x2x2xf32> to vector<1x8x2x2xf32>
    tpu.vector_store %arg4[%c8, %c0_58, %c7_59, %c7_60], %193 {strides = array<i32>} : memref<12x8x16x16xf32, #tpu.memory_space<vmem>>, vector<1x8x2x2xf32>,
    %194 = vector.shape_cast %183 : vector<1x1x8x2x2xf32> to vector<8x2x2xf32>
    %c9 = arith.constant 9 : index
    %c0_61 = arith.constant 0 : index
    %c7_62 = arith.constant 7 : index
    %c7_63 = arith.constant 7 : index
    %195 = vector.load %arg4[%c9, %c0_61, %c7_62, %c7_63] : memref<12x8x16x16xf32, #tpu.memory_space<vmem>>, vector<1x8x2x2xf32>
    %196 = vector.shape_cast %195 : vector<1x8x2x2xf32> to vector<8x2x2xf32>
    %197 = vector.shape_cast %194 : vector<8x2x2xf32> to vector<1x8x2x2xf32>
    tpu.vector_store %arg4[%c9, %c0_61, %c7_62, %c7_63], %197 {strides = array<i32>} : memref<12x8x16x16xf32, #tpu.memory_space<vmem>>, vector<1x8x2x2xf32>,
    %198 = vector.shape_cast %186 : vector<1x1x8x2x2xf32> to vector<8x2x2xf32>
    %c10 = arith.constant 10 : index
    %c0_64 = arith.constant 0 : index
    %c7_65 = arith.constant 7 : index
    %c7_66 = arith.constant 7 : index
    %199 = vector.load %arg4[%c10, %c0_64, %c7_65, %c7_66] : memref<12x8x16x16xf32, #tpu.memory_space<vmem>>, vector<1x8x2x2xf32>
    %200 = vector.shape_cast %199 : vector<1x8x2x2xf32> to vector<8x2x2xf32>
    %201 = vector.shape_cast %198 : vector<8x2x2xf32> to vector<1x8x2x2xf32>
    tpu.vector_store %arg4[%c10, %c0_64, %c7_65, %c7_66], %201 {strides = array<i32>} : memref<12x8x16x16xf32, #tpu.memory_space<vmem>>, vector<1x8x2x2xf32>,
    %202 = vector.shape_cast %189 : vector<1x1x8x2x2xf32> to vector<8x2x2xf32>
    %c11 = arith.constant 11 : index
    %c0_67 = arith.constant 0 : index
    %c7_68 = arith.constant 7 : index
    %c7_69 = arith.constant 7 : index
    %203 = vector.load %arg4[%c11, %c0_67, %c7_68, %c7_69] : memref<12x8x16x16xf32, #tpu.memory_space<vmem>>, vector<1x8x2x2xf32>
    %204 = vector.shape_cast %203 : vector<1x8x2x2xf32> to vector<8x2x2xf32>
    %205 = vector.shape_cast %202 : vector<8x2x2xf32> to vector<1x8x2x2xf32>
    tpu.vector_store %arg4[%c11, %c0_67, %c7_68, %c7_69], %205 {strides = array<i32>} : memref<12x8x16x16xf32, #tpu.memory_space<vmem>>, vector<1x8x2x2xf32>,
    return
  }
  func.func @transform_0(%arg0: i32) -> (i32, i32, i32, i32, i32) {
    %c0_i32 = arith.constant 0 : i32
    %c0_i32_0 = arith.constant 0 : i32
    %c0_i32_1 = arith.constant 0 : i32
    %c0_i32_2 = arith.constant 0 : i32
    %c0_i32_3 = arith.constant 0 : i32
    return %c0_i32, %c0_i32_0, %arg0, %c0_i32_1, %c0_i32_2 : i32, i32, i32, i32, i32
  }
  func.func @transform_1(%arg0: i32) -> (i32, i32, i32, i32, i32) {
    %c0_i32 = arith.constant 0 : i32
    %c0_i32_0 = arith.constant 0 : i32
    %c0_i32_1 = arith.constant 0 : i32
    %c0_i32_2 = arith.constant 0 : i32
    %c0_i32_3 = arith.constant 0 : i32
    return %c0_i32, %c0_i32_0, %arg0, %c0_i32_1, %c0_i32_2 : i32, i32, i32, i32, i32
  }
  func.func @transform_2(%arg0: i32) -> (i32, i32, i32, i32, i32) {
    %c0_i32 = arith.constant 0 : i32
    %c0_i32_0 = arith.constant 0 : i32
    %c0_i32_1 = arith.constant 0 : i32
    %c0_i32_2 = arith.constant 0 : i32
    %c0_i32_3 = arith.constant 0 : i32
    return %c0_i32, %c0_i32_0, %arg0, %c0_i32_1, %c0_i32_2 : i32, i32, i32, i32, i32
  }
  func.func @transform_3(%arg0: i32) -> (i32, i32, i32, i32) {
    %c0_i32 = arith.constant 0 : i32
    %c0_i32_0 = arith.constant 0 : i32
    %c0_i32_1 = arith.constant 0 : i32
    %c0_i32_2 = arith.constant 0 : i32
    return %c0_i32, %arg0, %c0_i32_0, %c0_i32_1 : i32, i32, i32, i32
  }
}

</mosaic_0001>

<bundles_post_ra>
// kernel: _lambda_.1
= control target key start
LH: loop header
LB: loop body
LE: loop exit
PB: predicated region body
PF: predicated region fallthrough
CT: control target
= control target key end

     0   :  { %vm14_vm0 = vcmask 130048   ;;  %v2525_v3 = vmov 0.0   ;;  %s2526_s12 = smov 4   ;;  %vm367_vm1 = vcmask 97312   ;;  %s2528_s10 = smov 7   ;;  %vm884_vm2 = vcmask 76848   ;;  %s7206_s0 = inlined_call_operand.vmem [shape: f32[2,2,8,8,8], index: 0, kind: input, shape index: {}]   ;;  %s7207_s3 = inlined_call_operand.vmem [shape: f32[12,8,16,16], index: 3, kind: output, shape index: {}]   ;;  %s7208_s1 = inlined_call_operand.vmem [shape: f32[4,4,8,4,4], index: 1, kind: input, shape index: {}]   ;;  %s7209_s2 = inlined_call_operand.vmem [shape: f32[8,8,8,2,2], index: 2, kind: input, shape index: {}]  }
   0x1   :  { %v2552_v0 = vld [vmem:[%s7206_s0 + $0x10] sm:$0xff]  ;;  %19 = vst.msk [vmem:[%s7207_s3 + $0x20] sm:$0xff] %vm14_vm0, %v2525_v3  ;;  %20 = vst.msk [vmem:[%s7207_s3 + $0x28] sm:$0xff] %vm14_vm0, %v2525_v3  ;;  %v207_v6 = vld [vmem:[%s7206_s0] sm:$0xff]  ;;  %vm2297_vm3 = vcmask 66616  }
   0x2   :  { %v2557_v1 = vld [vmem:[%s7206_s0 + $0x50] sm:$0xff]  ;;  %15 = vst.msk [vmem:[%s7207_s3] sm:$0xff] %vm14_vm0, %v2525_v3  ;;  %16 = vst.msk [vmem:[%s7207_s3 + $0x8] sm:$0xff] %vm14_vm0, %v2525_v3  ;;  %v215_v7 = vld [vmem:[%s7206_s0 + $0x40] sm:$0xff] }
   0x3   :  { %v2562_v2 = vld [vmem:[%s7206_s0 + $0x90] sm:$0xff]  ;;  %17 = vst.msk [vmem:[%s7207_s3 + $0x10] sm:$0xff] %vm14_vm0, %v2525_v3  ;;  %18 = vst.msk [vmem:[%s7207_s3 + $0x18] sm:$0xff] %vm14_vm0, %v2525_v3  ;;  %v3529_v5 = vadd.f32 %v2557_v1, %v2552_v0  ;;  %v3539_v8 = vsub.f32 %v2552_v0, %v2557_v1  ;;  %v223_v10 = vld [vmem:[%s7206_s0 + $0x80] sm:$0xff]  ;;  %v239_v12 = vadd.f32 %v215_v7, %v207_v6 }
   0x4   :  { %21 = vst.msk [vmem:[%s7207_s3 + $0x30] sm:$0xff] %vm14_vm0, %v2525_v3  ;;  %22 = vst.msk [vmem:[%s7207_s3 + $0x38] sm:$0xff] %vm14_vm0, %v2525_v3  ;;  %v233_v4 = vld [vmem:[%s7206_s0 + $0xd0] sm:$0xff]  ;;  %v231_v11 = vld [vmem:[%s7206_s0 + $0xc0] sm:$0xff]  ;;  %v3558_v15 = vsub.f32 %v207_v6, %v215_v7 }
   0x5   :  { %23 = vst.msk [vmem:[%s7207_s3 + $0x40] sm:$0xff] %vm14_vm0, %v2525_v3  ;;  %24 = vst.msk [vmem:[%s7207_s3 + $0x48] sm:$0xff] %vm14_vm0, %v2525_v3  ;;  %v3542_v9 = vadd.f32 %v233_v4, %v2562_v2  ;;  %v3553_v13 = vld [vmem:[%s7206_s0 + $0x18] sm:$0xff]  ;;  %v3556_v14 = vsub.f32 %v2562_v2, %v233_v4  ;;  %v255_v16 = vadd.f32 %v231_v11, %v223_v10  ;;  %v208_v24 = vld [vmem:[%s7206_s0 + $0x8] sm:$0xff] }
   0x6   :  { %25 = vst.msk [vmem:[%s7207_s3 + $0x50] sm:$0xff] %vm14_vm0, %v2525_v3  ;;  %26 = vst.msk [vmem:[%s7207_s3 + $0x58] sm:$0xff] %vm14_vm0, %v2525_v3  ;;  %v3560_v17 = vsub.f32 %v223_v10, %v231_v11  ;;  %v3565_v18 = vld [vmem:[%s7206_s0 + $0x58] sm:$0xff]  ;;  %v216_v25 = vld [vmem:[%s7206_s0 + $0x48] sm:$0xff] }
   0x7   :  { %27 = vst.msk [vmem:[%s7207_s3 + $0x60] sm:$0xff] %vm14_vm0, %v2525_v3  ;;  %28 = vst.msk [vmem:[%s7207_s3 + $0x68] sm:$0xff] %vm14_vm0, %v2525_v3  ;;  %v3570_v19 = vld [vmem:[%s7206_s0 + $0x98] sm:$0xff]  ;;  %v273_v21 = vadd.f32 %v3542_v9, %v3529_v5  ;;  %v242_v22 = vadd.f32 %v3565_v18, %v3553_v13  ;;  %v224_v26 = vld [vmem:[%s7206_s0 + $0x88] sm:$0xff]  ;;  %v289_v27 = vsub.f32 %v3529_v5, %v3542_v9 }
   0x8   :  { %29 = vst.msk [vmem:[%s7207_s3 + $0x70] sm:$0xff] %vm14_vm0, %v2525_v3  ;;  %30 = vst.msk [vmem:[%s7207_s3 + $0x78] sm:$0xff] %vm14_vm0, %v2525_v3  ;;  %v3575_v20 = vld [vmem:[%s7206_s0 + $0xd8] sm:$0xff]  ;;  %v271_v28 = vadd.f32 %v255_v16, %v239_v12  ;;  %v232_v29 = vld [vmem:[%s7206_s0 + $0xc8] sm:$0xff]  ;;  %v240_v30 = vadd.f32 %v216_v25, %v208_v24  ;;  %v287_v33 = vsub.f32 %v239_v12, %v255_v16 }
   0x9   :  { %31 = vst.msk [vmem:[%s7207_s3 + $0x80] sm:$0xff] %vm14_vm0, %v2525_v3  ;;  %32 = vst.msk [vmem:[%s7207_s3 + $0x88] sm:$0xff] %vm14_vm0, %v2525_v3  ;;  %v258_v23 = vadd.f32 %v3575_v20, %v3570_v19  ;;  %v3600_v31 = vld [vmem:[%s7206_s0 + $0x28] sm:$0xff]  ;;  %v3607_v34 = vsub.f32 %v208_v24, %v216_v25  ;;  %v281_v35 = vmul.f32 0.5, %v273_v21  ;;  %v256_v37 = vadd.f32 %v232_v29, %v224_v26  ;;  %v211_v41 = vld [vmem:[%s7206_s0 + $0x20] sm:$0xff] }
   0xa   :  { %33 = vst.msk [vmem:[%s7207_s3 + $0x90] sm:$0xff] %vm14_vm0, %v2525_v3  ;;  %34 = vst.msk [vmem:[%s7207_s3 + $0x98] sm:$0xff] %vm14_vm0, %v2525_v3  ;;  %v3605_v32 = vld [vmem:[%s7206_s0 + $0x68] sm:$0xff]  ;;  %v279_v42 = vmul.f32 0.5, %v271_v28  ;;  %v219_v44 = vld [vmem:[%s7206_s0 + $0x60] sm:$0xff]  ;;  %v3635_v47 = vmul.f32 0.5, %v287_v33  ;;  %v264_v24 = vsub.f32 %v224_v26, %v232_v29  ;;  %v250_v26 = vsub.f32 %v3553_v13, %v3565_v18 }
   0xb   :  { %35 = vst.msk [vmem:[%s7207_s3 + $0xa0] sm:$0xff] %vm14_vm0, %v2525_v3  ;;  %36 = vst.msk [vmem:[%s7207_s3 + $0xa8] sm:$0xff] %vm14_vm0, %v2525_v3  ;;  %v274_v36 = vadd.f32 %v258_v23, %v242_v22  ;;  %v3612_v38 = vld [vmem:[%s7206_s0 + $0xa8] sm:$0xff]  ;;  %v244_v40 = vadd.f32 %v3605_v32, %v3600_v31  ;;  %v227_v45 = vld [vmem:[%s7206_s0 + $0xa0] sm:$0xff]  ;;  %v290_v48 = vsub.f32 %v242_v22, %v258_v23  ;;  %v3667_v9 = vmul.f32 0.5, %v289_v27 }
   0xc   :  { %37 = vst.msk [vmem:[%s7207_s3 + $0xb0] sm:$0xff] %vm14_vm0, %v2525_v3  ;;  %38 = vst.msk [vmem:[%s7207_s3 + $0xb8] sm:$0xff] %vm14_vm0, %v2525_v3  ;;  %v3617_v39 = vld [vmem:[%s7206_s0 + $0xe8] sm:$0xff]  ;;  %v235_v46 = vld [vmem:[%s7206_s0 + $0xe0] sm:$0xff]  ;;  %v272_v50 = vadd.f32 %v256_v37, %v240_v30  ;;  %v243_v51 = vadd.f32 %v219_v44, %v211_v41  ;;  %v288_v61 = vsub.f32 %v240_v30, %v256_v37 }
   0xd   :  { %39 = vst.msk [vmem:[%s7207_s3 + $0xc0] sm:$0xff] %vm14_vm0, %v2525_v3  ;;  %40 = vst.msk [vmem:[%s7207_s3 + $0xc8] sm:$0xff] %vm14_vm0, %v2525_v3  ;;  %v260_v43 = vadd.f32 %v3617_v39, %v3612_v38  ;;  %347 = vrot.lane.b32.xlu1 %v281_v35, %s2526_s12  ;;  %v282_v49 = vmul.f32 0.5, %v274_v36  ;;  %v259_v52 = vadd.f32 %v235_v46, %v227_v45  ;;  %v214_v53 = vld [vmem:[%s7206_s0 + $0x38] sm:$0xff]  ;;  %v3657_v62 = vmul.f32 0.5, %v290_v48 }
   0xe   :  { %41 = vst.msk [vmem:[%s7207_s3 + $0xd0] sm:$0xff] %vm14_vm0, %v2525_v3  ;;  %42 = vst.msk [vmem:[%s7207_s3 + $0xd8] sm:$0xff] %vm14_vm0, %v2525_v3  ;;  %v222_v54 = vld [vmem:[%s7206_s0 + $0x78] sm:$0xff]  ;;  %343 = vrot.lane.b32.xlu0 %v279_v42, %s2526_s12  ;;  %v280_v63 = vmul.f32 0.5, %v272_v50  ;;  %v3665_v7 = vmul.f32 0.5, %v288_v61  ;;  %v303_v27 = vadd.f32 %v3560_v17, %v3558_v15  ;;  %v304_v37 = vadd.f32 %v264_v24, %v3607_v34 }
   0xf   :  { %43 = vst.msk [vmem:[%s7207_s3 + $0xe0] sm:$0xff] %vm14_vm0, %v2525_v3  ;;  %44 = vst.msk [vmem:[%s7207_s3 + $0xe8] sm:$0xff] %vm14_vm0, %v2525_v3  ;;  %v230_v55 = vld [vmem:[%s7206_s0 + $0xb8] sm:$0xff]  ;;  %v276_v56 = vadd.f32 %v260_v43, %v244_v40  ;;  %v246_v58 = vadd.f32 %v222_v54, %v214_v53  ;;  %v213_v59 = vld [vmem:[%s7206_s0 + $0x30] sm:$0xff]  ;;  %v275_v0 = vadd.f32 %v259_v52, %v243_v51 }
  0x10   :  { %45 = vst.msk [vmem:[%s7207_s3 + $0xf0] sm:$0xff] %vm14_vm0, %v2525_v3  ;;  %46 = vst.msk [vmem:[%s7207_s3 + $0xf8] sm:$0xff] %vm14_vm0, %v2525_v3  ;;  %v238_v57 = vld [vmem:[%s7206_s0 + $0xf8] sm:$0xff]  ;;  %v221_v60 = vld [vmem:[%s7206_s0 + $0x70] sm:$0xff]  ;;  %v292_v12 = vsub.f32 %v244_v40, %v260_v43  ;;  %v291_v16 = vsub.f32 %v243_v51, %v259_v52  ;;  %v3683_v40 = vmul.f32 0.5, %v303_v27  ;;  %v266_v29 = vsub.f32 %v3570_v19, %v3575_v20 }
  0x11   :  { %47 = vst.msk [vmem:[%s7207_s3 + $0x100] sm:$0xff] %vm14_vm0, %v2525_v3  ;;  %48 = vst.msk [vmem:[%s7207_s3 + $0x108] sm:$0xff] %vm14_vm0, %v2525_v3  ;;  %v262_v1 = vadd.f32 %v238_v57, %v230_v55  ;;  %v229_v2 = vld [vmem:[%s7206_s0 + $0xb0] sm:$0xff]  ;;  %v245_v4 = vadd.f32 %v221_v60, %v213_v59  ;;  %v284_v5 = vmul.f32 0.5, %v276_v56  ;;  %349 = vrot.lane.b32.xlu1 %v282_v49, %s2526_s12  ;;  %v283_v10 = vmul.f32 0.5, %v275_v0 }
  0x12   :  { %49 = vst.msk [vmem:[%s7207_s3 + $0x110] sm:$0xff] %vm14_vm0, %v2525_v3  ;;  %50 = vst.msk [vmem:[%s7207_s3 + $0x118] sm:$0xff] %vm14_vm0, %v2525_v3  ;;  %345 = vrot.lane.b32.xlu0 %v280_v63, %s2526_s12  ;;  %v3671_v28 = vmul.f32 0.5, %v292_v12  ;;  %v3673_v30 = vmul.f32 0.5, %v291_v16  ;;  %v305_v42 = vadd.f32 %v3556_v14, %v3539_v8  ;;  %v3692_v43 = vmul.f32 0.5, %v304_v37 }
  0x13   :  { %51 = vst.msk [vmem:[%s7207_s3 + $0x120] sm:$0xff] %vm14_vm0, %v2525_v3  ;;  %52 = vst.msk [vmem:[%s7207_s3 + $0x128] sm:$0xff] %vm14_vm0, %v2525_v3  ;;  %v278_v11 = vadd.f32 %v262_v1, %v246_v58  ;;  %v294_v22 = vsub.f32 %v246_v58, %v262_v1  ;;  %v252_v48 = vsub.f32 %v3600_v31, %v3605_v32  ;;  %v532_v1 = vld [vmem:[%s7208_s1 + $0x84] sm:$0xf] }
  0x14   :  { %53 = vst.msk [vmem:[%s7207_s3 + $0x130] sm:$0xff] %vm14_vm0, %v2525_v3  ;;  %54 = vst.msk [vmem:[%s7207_s3 + $0x138] sm:$0xff] %vm14_vm0, %v2525_v3  ;;  %v268_v49 = vsub.f32 %v3612_v38, %v3617_v39  ;;  %v3698_v50 = vsub.f32 %v211_v41, %v219_v44  ;;  %v306_v51 = vadd.f32 %v266_v29, %v250_v26  ;;  %v3700_v13 = vmul.f32 0.5, %v305_v42  ;;  %v500_v39 = vld [vmem:[%s7208_s1 + $0x4] sm:$0xf] }
  0x15   :  { %55 = vst.msk [vmem:[%s7207_s3 + $0x140] sm:$0xff] %vm14_vm0, %v2525_v3  ;;  %56 = vst.msk [vmem:[%s7207_s3 + $0x148] sm:$0xff] %vm14_vm0, %v2525_v3  ;;  %v286_v25 = vmul.f32 0.5, %v278_v11  ;;  %v3677_v35 = vmul.f32 0.5, %v294_v22  ;;  %353 = vrot.lane.b32.xlu1 %v284_v5, %s2526_s12  ;;  %v267_v18 = vsub.f32 %v227_v45, %v235_v46  ;;  %v254_v19 = vsub.f32 %v214_v53, %v222_v54  ;;  %v508_v41 = vld [vmem:[%s7208_s1 + $0x24] sm:$0xf] }
  0x16   :  { %57 = vst.msk [vmem:[%s7207_s3 + $0x150] sm:$0xff] %vm14_vm0, %v2525_v3  ;;  %58 = vst.msk [vmem:[%s7207_s3 + $0x158] sm:$0xff] %vm14_vm0, %v2525_v3  ;;  %351 = vrot.lane.b32.xlu0 %v283_v10, %s2526_s12  ;;  %v308_v20 = vadd.f32 %v268_v49, %v252_v48  ;;  %v270_v52 = vsub.f32 %v230_v55, %v238_v57  ;;  %v253_v56 = vsub.f32 %v213_v59, %v221_v60  ;;  %v516_v44 = vld [vmem:[%s7208_s1 + $0x44] sm:$0xf] }
  0x17   :  { %59 = vst.msk [vmem:[%s7207_s3 + $0x160] sm:$0xff] %vm14_vm0, %v2525_v3  ;;  %60 = vst.msk [vmem:[%s7207_s3 + $0x168] sm:$0xff] %vm14_vm0, %v2525_v3  ;;  %v3703_v61 = vmul.f32 0.5, %v306_v51  ;;  %v307_v31 = vadd.f32 %v267_v18, %v3698_v50  ;;  %v320_v32 = vsub.f32 %v3607_v34, %v264_v24  ;;  %v319_v38 = vsub.f32 %v3558_v15, %v3560_v17  ;;  %v524_v45 = vld [vmem:[%s7208_s1 + $0x64] sm:$0xf] }
  0x18   :  { %61 = vst.msk [vmem:[%s7207_s3 + $0x170] sm:$0xff] %vm14_vm0, %v2525_v3  ;;  %62 = vst.msk [vmem:[%s7207_s3 + $0x178] sm:$0xff] %vm14_vm0, %v2525_v3  ;;  %v564_v15 = vld [vmem:[%s7208_s1 + $0x104] sm:$0xf]  ;;  %v3728_v34 = vmul.f32 0.5, %v308_v20  ;;  %v310_v46 = vadd.f32 %v270_v52, %v254_v19  ;;  %v322_v54 = vsub.f32 %v250_v26, %v266_v29  ;;  %v321_v0 = vsub.f32 %v3539_v8, %v3556_v14 }
  0x19   :  { %63 = vst.msk [vmem:[%s7207_s3 + $0x180] sm:$0xff] %vm14_vm0, %v2525_v3  ;;  %64 = vst.msk [vmem:[%s7207_s3 + $0x188] sm:$0xff] %vm14_vm0, %v2525_v3  ;;  %357 = vrot.lane.b32.xlu1 %v286_v25, %s2526_s12  ;;  %v572_v17 = vld [vmem:[%s7208_s1 + $0x124] sm:$0xf]  ;;  %v3736_v59 = vmul.f32 0.5, %v307_v31  ;;  %v3738_v60 = vmul.f32 0.5, %v320_v32  ;;  %v324_v16 = vsub.f32 %v252_v48, %v268_v49  ;;  %v323_v27 = vsub.f32 %v3698_v50, %v267_v18 }
  0x1a   :  { %65 = vst.msk [vmem:[%s7207_s3 + $0x190] sm:$0xff] %vm14_vm0, %v2525_v3  ;;  %66 = vst.msk [vmem:[%s7207_s3 + $0x198] sm:$0xff] %vm14_vm0, %v2525_v3  ;;  %v580_v55 = vld [vmem:[%s7208_s1 + $0x144] sm:$0xf]  ;;  %v3740_v63 = vmul.f32 0.5, %v319_v38  ;;  %v3768_v10 = vmul.f32 0.5, %v310_v46  ;;  %v636_v48 = vadd.f32 %v524_v45, %v516_v44  ;;  %v644_v49 = vadd.f32 %v572_v17, %v564_v15 }
  0x1b   :  { %67 = vst.msk [vmem:[%s7207_s3 + $0x1a0] sm:$0xff] %vm14_vm0, %v2525_v3  ;;  %68 = vst.msk [vmem:[%s7207_s3 + $0x1a8] sm:$0xff] %vm14_vm0, %v2525_v3  ;;  %v588_v57 = vld [vmem:[%s7208_s1 + $0x164] sm:$0xf]  ;;  %v3772_v12 = vmul.f32 0.5, %v322_v54  ;;  %v3788_v25 = vmul.f32 0.5, %v321_v0 }
  0x1c   :  { %69 = vst.msk [vmem:[%s7207_s3 + $0x1b0] sm:$0xff] %vm14_vm0, %v2525_v3  ;;  %70 = vst.msk [vmem:[%s7207_s3 + $0x1b8] sm:$0xff] %vm14_vm0, %v2525_v3  ;;  %v596_v8 = vld [vmem:[%s7208_s1 + $0x184] sm:$0xf]  ;;  %v507_v22 = vld [vmem:[%s7208_s1 + $0x20] sm:$0xf]  ;;  %v652_v31 = vadd.f32 %v588_v57, %v580_v55 }
  0x1d   :  { %71 = vst.msk [vmem:[%s7207_s3 + $0x1c0] sm:$0xff] %vm14_vm0, %v2525_v3  ;;  %72 = vst.msk [vmem:[%s7207_s3 + $0x1c8] sm:$0xff] %vm14_vm0, %v2525_v3  ;;  %v604_v14 = vld [vmem:[%s7208_s1 + $0x1a4] sm:$0xf]  ;;  %v523_v24 = vld [vmem:[%s7208_s1 + $0x60] sm:$0xf] }
  0x1e   :  { %73 = vst.msk [vmem:[%s7207_s3 + $0x1d0] sm:$0xff] %vm14_vm0, %v2525_v3  ;;  %74 = vst.msk [vmem:[%s7207_s3 + $0x1d8] sm:$0xff] %vm14_vm0, %v2525_v3  ;;  %v612_v5 = vld [vmem:[%s7208_s1 + $0x1c4] sm:$0xf]  ;;  %386 = vrot.lane.b32.xlu1 %v3665_v7, %s2526_s12  ;;  %v3799_v42 = vmul.f32 0.5, %v324_v16  ;;  %v628_v7 = vadd.f32 %v508_v41, %v500_v39  ;;  %v676_v41 = vadd.f32 %v604_v14, %v596_v8 }
  0x1f   :  { %75 = vst.msk [vmem:[%s7207_s3 + $0x1e0] sm:$0xff] %vm14_vm0, %v2525_v3  ;;  %76 = vst.msk [vmem:[%s7207_s3 + $0x1e8] sm:$0xff] %vm14_vm0, %v2525_v3  ;;  %v563_v26 = vld [vmem:[%s7208_s1 + $0x100] sm:$0xf]  ;;  %v534_v16 = vld [vmem:[%s7208_s1 + $0x8c] sm:$0xf] }
  0x20   :  { %77 = vst.msk [vmem:[%s7207_s3 + $0x1f0] sm:$0xff] %vm14_vm0, %v2525_v3  ;;  %78 = vst.msk [vmem:[%s7207_s3 + $0x1f8] sm:$0xff] %vm14_vm0, %v2525_v3  ;;  %v571_v29 = vld [vmem:[%s7208_s1 + $0x120] sm:$0xf] }
  0x21   :  { %79 = vst.msk [vmem:[%s7207_s3 + $0x200] sm:$0xff] %vm14_vm0, %v2525_v3  ;;  %80 = vst.msk [vmem:[%s7207_s3 + $0x208] sm:$0xff] %vm14_vm0, %v2525_v3  ;;  %v531_v50 = vld [vmem:[%s7208_s1 + $0x80] sm:$0xf]  ;;  %v643_v54 = vadd.f32 %v571_v29, %v563_v26  ;;  %v566_v26 = vld [vmem:[%s7208_s1 + $0x10c] sm:$0xf] }
  0x22   :  { %81 = vst.msk [vmem:[%s7207_s3 + $0x210] sm:$0xff] %vm14_vm0, %v2525_v3  ;;  %82 = vst.msk [vmem:[%s7207_s3 + $0x218] sm:$0xff] %vm14_vm0, %v2525_v3  ;;  %v539_v51 = vld [vmem:[%s7208_s1 + $0xa0] sm:$0xf]  ;;  %390 = vrot.lane.b32.xlu1 %v3657_v62, %s2526_s12 }
  0x23   :  { %83 = vst.msk [vmem:[%s7207_s3 + $0x220] sm:$0xff] %vm14_vm0, %v2525_v3  ;;  %84 = vst.msk [vmem:[%s7207_s3 + $0x228] sm:$0xff] %vm14_vm0, %v2525_v3  ;;  %v547_v18 = vld [vmem:[%s7208_s1 + $0xc0] sm:$0xf]  ;;  %v518_v62 = vld [vmem:[%s7208_s1 + $0x4c] sm:$0xf]  ;;  %v659_v8 = vadd.f32 %v539_v51, %v531_v50 }
  0x24   :  { %85 = vst.msk [vmem:[%s7207_s3 + $0x230] sm:$0xff] %vm14_vm0, %v2525_v3  ;;  %86 = vst.msk [vmem:[%s7207_s3 + $0x238] sm:$0xff] %vm14_vm0, %v2525_v3  ;;  %v587_v20 = vld [vmem:[%s7208_s1 + $0x160] sm:$0xf]  ;;  %v574_v50 = vld [vmem:[%s7208_s1 + $0x12c] sm:$0xf] }
  0x25   :  { %87 = vst.msk [vmem:[%s7207_s3 + $0x240] sm:$0xff] %vm14_vm0, %v2525_v3  ;;  %88 = vst.msk [vmem:[%s7207_s3 + $0x248] sm:$0xff] %vm14_vm0, %v2525_v3  ;;  %v595_v32 = vld [vmem:[%s7208_s1 + $0x180] sm:$0xf]  ;;  %v582_v51 = vld [vmem:[%s7208_s1 + $0x14c] sm:$0xf] }
  0x26   :  { %89 = vst.msk [vmem:[%s7207_s3 + $0x250] sm:$0xff] %vm14_vm0, %v2525_v3  ;;  %90 = vst.msk [vmem:[%s7207_s3 + $0x258] sm:$0xff] %vm14_vm0, %v2525_v3  ;;  %v603_v45 = vld [vmem:[%s7208_s1 + $0x1a0] sm:$0xf]  ;;  %394 = vrot.lane.b32.xlu1 %v3671_v28, %s2526_s12 }
  0x27   :  { %91 = vst.msk [vmem:[%s7207_s3 + $0x260] sm:$0xff] %vm14_vm0, %v2525_v3  ;;  %92 = vst.msk [vmem:[%s7207_s3 + $0x268] sm:$0xff] %vm14_vm0, %v2525_v3  ;;  %v611_v15 = vld [vmem:[%s7208_s1 + $0x1c0] sm:$0xf] }
  0x28   :  { %93 = vst.msk [vmem:[%s7207_s3 + $0x270] sm:$0xff] %vm14_vm0, %v2525_v3  ;;  %94 = vst.msk [vmem:[%s7207_s3 + $0x278] sm:$0xff] %vm14_vm0, %v2525_v3  ;;  %v619_v17 = vld [vmem:[%s7208_s1 + $0x1e0] sm:$0xf] }
  0x29   :  { %95 = vst.msk [vmem:[%s7207_s3 + $0x280] sm:$0xff] %vm14_vm0, %v2525_v3  ;;  %96 = vst.msk [vmem:[%s7207_s3 + $0x288] sm:$0xff] %vm14_vm0, %v2525_v3 }
  0x2a   :  { %97 = vst.msk [vmem:[%s7207_s3 + $0x290] sm:$0xff] %vm14_vm0, %v2525_v3  ;;  %98 = vst.msk [vmem:[%s7207_s3 + $0x298] sm:$0xff] %vm14_vm0, %v2525_v3  ;;  %398 = vrot.lane.b32.xlu1 %v3677_v35, %s2526_s12 }
  0x2b   :  { %99 = vst.msk [vmem:[%s7207_s3 + $0x2a0] sm:$0xff] %vm14_vm0, %v2525_v3  ;;  %100 = vst.msk [vmem:[%s7207_s3 + $0x2a8] sm:$0xff] %vm14_vm0, %v2525_v3 }
  0x2c   :  { %101 = vst.msk [vmem:[%s7207_s3 + $0x2b0] sm:$0xff] %vm14_vm0, %v2525_v3  ;;  %102 = vst.msk [vmem:[%s7207_s3 + $0x2b8] sm:$0xff] %vm14_vm0, %v2525_v3 }
  0x2d   :  { %103 = vst.msk [vmem:[%s7207_s3 + $0x2c0] sm:$0xff] %vm14_vm0, %v2525_v3  ;;  %104 = vst.msk [vmem:[%s7207_s3 + $0x2c8] sm:$0xff] %vm14_vm0, %v2525_v3 }
  0x2e   :  { %105 = vst.msk [vmem:[%s7207_s3 + $0x2d0] sm:$0xff] %vm14_vm0, %v2525_v3  ;;  %106 = vst.msk [vmem:[%s7207_s3 + $0x2d8] sm:$0xff] %vm14_vm0, %v2525_v3  ;;  %427 = vrot.lane.b32.xlu1 %v3692_v43, %s2526_s12  ;;  %v621_v43 = vld [vmem:[%s7208_s1 + $0x1e8] sm:$0xf] }
  0x2f   :  { %107 = vst.msk [vmem:[%s7207_s3 + $0x2e0] sm:$0xff] %vm14_vm0, %v2525_v3  ;;  %108 = vst.msk [vmem:[%s7207_s3 + $0x2e8] sm:$0xff] %vm14_vm0, %v2525_v3 }
  0x30   :  { %109 = vst.msk [vmem:[%s7207_s3 + $0x2f0] sm:$0xff] %vm14_vm0, %v2525_v3  ;;  %110 = vst.msk [vmem:[%s7207_s3 + $0x2f8] sm:$0xff] %vm14_vm0, %v2525_v3 }
  0x31   :  { %111 = vst.msk [vmem:[%s7207_s3 + $0x300] sm:$0xff] %vm14_vm0, %v2525_v3  ;;  %112 = vst.msk [vmem:[%s7207_s3 + $0x308] sm:$0xff] %vm14_vm0, %v2525_v3 }
  0x32   :  { %113 = vst.msk [vmem:[%s7207_s3 + $0x310] sm:$0xff] %vm14_vm0, %v2525_v3  ;;  %114 = vst.msk [vmem:[%s7207_s3 + $0x318] sm:$0xff] %vm14_vm0, %v2525_v3  ;;  %431 = vrot.lane.b32.xlu1 %v3703_v61, %s2526_s12 }
  0x33   :  { %115 = vst.msk [vmem:[%s7207_s3 + $0x320] sm:$0xff] %vm14_vm0, %v2525_v3  ;;  %116 = vst.msk [vmem:[%s7207_s3 + $0x328] sm:$0xff] %vm14_vm0, %v2525_v3 }
  0x34   :  { %117 = vst.msk [vmem:[%s7207_s3 + $0x330] sm:$0xff] %vm14_vm0, %v2525_v3  ;;  %118 = vst.msk [vmem:[%s7207_s3 + $0x338] sm:$0xff] %vm14_vm0, %v2525_v3 }
  0x35   :  { %119 = vst.msk [vmem:[%s7207_s3 + $0x340] sm:$0xff] %vm14_vm0, %v2525_v3  ;;  %120 = vst.msk [vmem:[%s7207_s3 + $0x348] sm:$0xff] %vm14_vm0, %v2525_v3 }
  0x36   :  { %121 = vst.msk [vmem:[%s7207_s3 + $0x350] sm:$0xff] %vm14_vm0, %v2525_v3  ;;  %122 = vst.msk [vmem:[%s7207_s3 + $0x358] sm:$0xff] %vm14_vm0, %v2525_v3  ;;  %435 = vrot.lane.b32.xlu1 %v3728_v34, %s2526_s12 }
  0x37   :  { %123 = vst.msk [vmem:[%s7207_s3 + $0x360] sm:$0xff] %vm14_vm0, %v2525_v3  ;;  %124 = vst.msk [vmem:[%s7207_s3 + $0x368] sm:$0xff] %vm14_vm0, %v2525_v3 }
  0x38   :  { %125 = vst.msk [vmem:[%s7207_s3 + $0x370] sm:$0xff] %vm14_vm0, %v2525_v3  ;;  %126 = vst.msk [vmem:[%s7207_s3 + $0x378] sm:$0xff] %vm14_vm0, %v2525_v3 }
  0x39   :  { %127 = vst.msk [vmem:[%s7207_s3 + $0x380] sm:$0xff] %vm14_vm0, %v2525_v3  ;;  %128 = vst.msk [vmem:[%s7207_s3 + $0x388] sm:$0xff] %vm14_vm0, %v2525_v3 }
  0x3a   :  { %129 = vst.msk [vmem:[%s7207_s3 + $0x390] sm:$0xff] %vm14_vm0, %v2525_v3  ;;  %130 = vst.msk [vmem:[%s7207_s3 + $0x398] sm:$0xff] %vm14_vm0, %v2525_v3  ;;  %439 = vrot.lane.b32.xlu1 %v3768_v10, %s2526_s12  ;;  %v591_v10 = vld [vmem:[%s7208_s1 + $0x170] sm:$0xf] }
  0x3b   :  { %131 = vst.msk [vmem:[%s7207_s3 + $0x3a0] sm:$0xff] %vm14_vm0, %v2525_v3  ;;  %132 = vst.msk [vmem:[%s7207_s3 + $0x3a8] sm:$0xff] %vm14_vm0, %v2525_v3 }
  0x3c   :  { %133 = vst.msk [vmem:[%s7207_s3 + $0x3b0] sm:$0xff] %vm14_vm0, %v2525_v3  ;;  %134 = vst.msk [vmem:[%s7207_s3 + $0x3b8] sm:$0xff] %vm14_vm0, %v2525_v3 }
  0x3d   :  { %135 = vst.msk [vmem:[%s7207_s3 + $0x3c0] sm:$0xff] %vm14_vm0, %v2525_v3  ;;  %136 = vst.msk [vmem:[%s7207_s3 + $0x3c8] sm:$0xff] %vm14_vm0, %v2525_v3 }
  0x3e   :  { %137 = vst.msk [vmem:[%s7207_s3 + $0x3d0] sm:$0xff] %vm14_vm0, %v2525_v3  ;;  %138 = vst.msk [vmem:[%s7207_s3 + $0x3d8] sm:$0xff] %vm14_vm0, %v2525_v3  ;;  %468 = vrot.lane.b32.xlu1 %v3738_v60, %s2526_s12 }
  0x3f   :  { %139 = vst.msk [vmem:[%s7207_s3 + $0x3e0] sm:$0xff] %vm14_vm0, %v2525_v3  ;;  %140 = vst.msk [vmem:[%s7207_s3 + $0x3e8] sm:$0xff] %vm14_vm0, %v2525_v3 }
  0x40   :  { %141 = vst.msk [vmem:[%s7207_s3 + $0x3f0] sm:$0xff] %vm14_vm0, %v2525_v3  ;;  %142 = vst.msk [vmem:[%s7207_s3 + $0x3f8] sm:$0xff] %vm14_vm0, %v2525_v3 }
  0x41   :  { %143 = vst.msk [vmem:[%s7207_s3 + $0x400] sm:$0xff] %vm14_vm0, %v2525_v3  ;;  %144 = vst.msk [vmem:[%s7207_s3 + $0x408] sm:$0xff] %vm14_vm0, %v2525_v3 }
  0x42   :  { %145 = vst.msk [vmem:[%s7207_s3 + $0x410] sm:$0xff] %vm14_vm0, %v2525_v3  ;;  %146 = vst.msk [vmem:[%s7207_s3 + $0x418] sm:$0xff] %vm14_vm0, %v2525_v3  ;;  %472 = vrot.lane.b32.xlu1 %v3772_v12, %s2526_s12 }
  0x43   :  { %147 = vst.msk [vmem:[%s7207_s3 + $0x420] sm:$0xff] %vm14_vm0, %v2525_v3  ;;  %148 = vst.msk [vmem:[%s7207_s3 + $0x428] sm:$0xff] %vm14_vm0, %v2525_v3 }
  0x44   :  { %149 = vst.msk [vmem:[%s7207_s3 + $0x430] sm:$0xff] %vm14_vm0, %v2525_v3  ;;  %150 = vst.msk [vmem:[%s7207_s3 + $0x438] sm:$0xff] %vm14_vm0, %v2525_v3 }
  0x45   :  { %151 = vst.msk [vmem:[%s7207_s3 + $0x440] sm:$0xff] %vm14_vm0, %v2525_v3  ;;  %152 = vst.msk [vmem:[%s7207_s3 + $0x448] sm:$0xff] %vm14_vm0, %v2525_v3 }
  0x46   :  { %153 = vst.msk [vmem:[%s7207_s3 + $0x450] sm:$0xff] %vm14_vm0, %v2525_v3  ;;  %154 = vst.msk [vmem:[%s7207_s3 + $0x458] sm:$0xff] %vm14_vm0, %v2525_v3  ;;  %476 = vrot.lane.b32.xlu1 %v3799_v42, %s2526_s12  ;;  %v569_v42 = vld [vmem:[%s7208_s1 + $0x118] sm:$0xf] }
  0x47   :  { %155 = vst.msk [vmem:[%s7207_s3 + $0x460] sm:$0xff] %vm14_vm0, %v2525_v3  ;;  %156 = vst.msk [vmem:[%s7207_s3 + $0x468] sm:$0xff] %vm14_vm0, %v2525_v3 }
  0x48   :  { %157 = vst.msk [vmem:[%s7207_s3 + $0x470] sm:$0xff] %vm14_vm0, %v2525_v3  ;;  %158 = vst.msk [vmem:[%s7207_s3 + $0x478] sm:$0xff] %vm14_vm0, %v2525_v3 }
  0x49   :  { %159 = vst.msk [vmem:[%s7207_s3 + $0x480] sm:$0xff] %vm14_vm0, %v2525_v3  ;;  %160 = vst.msk [vmem:[%s7207_s3 + $0x488] sm:$0xff] %vm14_vm0, %v2525_v3 }
  0x4a   :  { %161 = vst.msk [vmem:[%s7207_s3 + $0x490] sm:$0xff] %vm14_vm0, %v2525_v3  ;;  %162 = vst.msk [vmem:[%s7207_s3 + $0x498] sm:$0xff] %vm14_vm0, %v2525_v3 }
  0x4b   :  { %163 = vst.msk [vmem:[%s7207_s3 + $0x4a0] sm:$0xff] %vm14_vm0, %v2525_v3  ;;  %164 = vst.msk [vmem:[%s7207_s3 + $0x4a8] sm:$0xff] %vm14_vm0, %v2525_v3 }
  0x4c   :  { %165 = vst.msk [vmem:[%s7207_s3 + $0x4b0] sm:$0xff] %vm14_vm0, %v2525_v3  ;;  %166 = vst.msk [vmem:[%s7207_s3 + $0x4b8] sm:$0xff] %vm14_vm0, %v2525_v3 }
  0x4d   :  { %167 = vst.msk [vmem:[%s7207_s3 + $0x4c0] sm:$0xff] %vm14_vm0, %v2525_v3  ;;  %168 = vst.msk [vmem:[%s7207_s3 + $0x4c8] sm:$0xff] %vm14_vm0, %v2525_v3 }
  0x4e   :  { %169 = vst.msk [vmem:[%s7207_s3 + $0x4d0] sm:$0xff] %vm14_vm0, %v2525_v3  ;;  %170 = vst.msk [vmem:[%s7207_s3 + $0x4d8] sm:$0xff] %vm14_vm0, %v2525_v3 }
  0x4f   :  { %171 = vst.msk [vmem:[%s7207_s3 + $0x4e0] sm:$0xff] %vm14_vm0, %v2525_v3  ;;  %172 = vst.msk [vmem:[%s7207_s3 + $0x4e8] sm:$0xff] %vm14_vm0, %v2525_v3 }
  0x50   :  { %173 = vst.msk [vmem:[%s7207_s3 + $0x4f0] sm:$0xff] %vm14_vm0, %v2525_v3  ;;  %174 = vst.msk [vmem:[%s7207_s3 + $0x4f8] sm:$0xff] %vm14_vm0, %v2525_v3 }
  0x51   :  { %175 = vst.msk [vmem:[%s7207_s3 + $0x500] sm:$0xff] %vm14_vm0, %v2525_v3  ;;  %176 = vst.msk [vmem:[%s7207_s3 + $0x508] sm:$0xff] %vm14_vm0, %v2525_v3 }
  0x52   :  { %177 = vst.msk [vmem:[%s7207_s3 + $0x510] sm:$0xff] %vm14_vm0, %v2525_v3  ;;  %178 = vst.msk [vmem:[%s7207_s3 + $0x518] sm:$0xff] %vm14_vm0, %v2525_v3 }
  0x53   :  { %179 = vst.msk [vmem:[%s7207_s3 + $0x520] sm:$0xff] %vm14_vm0, %v2525_v3  ;;  %180 = vst.msk [vmem:[%s7207_s3 + $0x528] sm:$0xff] %vm14_vm0, %v2525_v3 }
  0x54   :  { %181 = vst.msk [vmem:[%s7207_s3 + $0x530] sm:$0xff] %vm14_vm0, %v2525_v3  ;;  %182 = vst.msk [vmem:[%s7207_s3 + $0x538] sm:$0xff] %vm14_vm0, %v2525_v3 }
  0x55   :  { %183 = vst.msk [vmem:[%s7207_s3 + $0x540] sm:$0xff] %vm14_vm0, %v2525_v3  ;;  %184 = vst.msk [vmem:[%s7207_s3 + $0x548] sm:$0xff] %vm14_vm0, %v2525_v3 }
  0x56   :  { %185 = vst.msk [vmem:[%s7207_s3 + $0x550] sm:$0xff] %vm14_vm0, %v2525_v3  ;;  %186 = vst.msk [vmem:[%s7207_s3 + $0x558] sm:$0xff] %vm14_vm0, %v2525_v3 }
  0x57   :  { %187 = vst.msk [vmem:[%s7207_s3 + $0x560] sm:$0xff] %vm14_vm0, %v2525_v3  ;;  %188 = vst.msk [vmem:[%s7207_s3 + $0x568] sm:$0xff] %vm14_vm0, %v2525_v3 }
  0x58   :  { %189 = vst.msk [vmem:[%s7207_s3 + $0x570] sm:$0xff] %vm14_vm0, %v2525_v3  ;;  %190 = vst.msk [vmem:[%s7207_s3 + $0x578] sm:$0xff] %vm14_vm0, %v2525_v3 }
  0x59   :  { %191 = vst.msk [vmem:[%s7207_s3 + $0x580] sm:$0xff] %vm14_vm0, %v2525_v3  ;;  %192 = vst.msk [vmem:[%s7207_s3 + $0x588] sm:$0xff] %vm14_vm0, %v2525_v3 }
  0x5a   :  { %193 = vst.msk [vmem:[%s7207_s3 + $0x590] sm:$0xff] %vm14_vm0, %v2525_v3  ;;  %194 = vst.msk [vmem:[%s7207_s3 + $0x598] sm:$0xff] %vm14_vm0, %v2525_v3 }
  0x5b   :  { %195 = vst.msk [vmem:[%s7207_s3 + $0x5a0] sm:$0xff] %vm14_vm0, %v2525_v3  ;;  %196 = vst.msk [vmem:[%s7207_s3 + $0x5a8] sm:$0xff] %vm14_vm0, %v2525_v3 }
  0x5c   :  { %197 = vst.msk [vmem:[%s7207_s3 + $0x5b0] sm:$0xff] %vm14_vm0, %v2525_v3  ;;  %198 = vst.msk [vmem:[%s7207_s3 + $0x5b8] sm:$0xff] %vm14_vm0, %v2525_v3 }
  0x5d   :  { %199 = vst.msk [vmem:[%s7207_s3 + $0x5c0] sm:$0xff] %vm14_vm0, %v2525_v3  ;;  %200 = vst.msk [vmem:[%s7207_s3 + $0x5c8] sm:$0xff] %vm14_vm0, %v2525_v3 }
  0x5e   :  { %201 = vst.msk [vmem:[%s7207_s3 + $0x5d0] sm:$0xff] %vm14_vm0, %v2525_v3  ;;  %202 = vst.msk [vmem:[%s7207_s3 + $0x5d8] sm:$0xff] %vm14_vm0, %v2525_v3 }
  0x5f   :  { %203 = vst.msk [vmem:[%s7207_s3 + $0x5e0] sm:$0xff] %vm14_vm0, %v2525_v3  ;;  %204 = vst.msk [vmem:[%s7207_s3 + $0x5e8] sm:$0xff] %vm14_vm0, %v2525_v3 }
  0x60   :  { %205 = vst.msk [vmem:[%s7207_s3 + $0x5f0] sm:$0xff] %vm14_vm0, %v2525_v3  ;;  %206 = vst.msk [vmem:[%s7207_s3 + $0x5f8] sm:$0xff] %vm14_vm0, %v2525_v3  ;;  %v237_v3 = vld [vmem:[%s7206_s0 + $0xf0] sm:$0xff] }
  0x61   :  { %v261_v6 = vadd.f32 %v237_v3, %v229_v2  ;;  %v269_v58 = vsub.f32 %v229_v2, %v237_v3  ;;  %v540_v2 = vld [vmem:[%s7208_s1 + $0xa4] sm:$0xf] }
  0x62   :  { %v548_v3 = vld [vmem:[%s7208_s1 + $0xc4] sm:$0xf]  ;;  %v660_v38 = vadd.f32 %v540_v2, %v532_v1  ;;  %v708_v1 = vsub.f32 %v644_v49, %v676_v41 }
  0x63   :  { %v277_v21 = vadd.f32 %v261_v6, %v245_v4  ;;  %v293_v23 = vsub.f32 %v245_v4, %v261_v6  ;;  %v309_v53 = vadd.f32 %v269_v58, %v253_v56  ;;  %v556_v4 = vld [vmem:[%s7208_s1 + $0xe4] sm:$0xf]  ;;  %v325_v37 = vsub.f32 %v253_v56, %v269_v58 }
  0x64   :  { %v620_v6 = vld [vmem:[%s7208_s1 + $0x1e4] sm:$0xf]  ;;  %v668_v39 = vadd.f32 %v556_v4, %v548_v3  ;;  %v692_v57 = vsub.f32 %v628_v7, %v660_v38  ;;  %v502_v3 = vld [vmem:[%s7208_s1 + $0xc] sm:$0xf] }
  0x65   :  { %v285_v33 = vmul.f32 0.5, %v277_v21  ;;  %v3679_v36 = vmul.f32 0.5, %v293_v23  ;;  %v3770_v11 = vmul.f32 0.5, %v309_v53  ;;  %v499_v21 = vld [vmem:[%s7208_s1] sm:$0xf]  ;;  %v3823_v58 = vmul.f32 0.5, %v325_v37 }
  0x66   :  { %v515_v23 = vld [vmem:[%s7208_s1 + $0x40] sm:$0xf]  ;;  %v684_v44 = vadd.f32 %v620_v6, %v612_v5  ;;  %v627_v46 = vadd.f32 %v507_v22, %v499_v21  ;;  %v700_v0 = vsub.f32 %v636_v48, %v668_v39  ;;  %v510_v4 = vld [vmem:[%s7208_s1 + $0x2c] sm:$0xf]  ;;  %v675_v5 = vadd.f32 %v603_v45, %v595_v32 }
  0x67   :  { %355 = vrot.lane.b32.xlu0 %v285_v33, %s2526_s12  ;;  %v326_v33 = vsub.f32 %v254_v19, %v270_v52  ;;  %v579_v19 = vld [vmem:[%s7208_s1 + $0x140] sm:$0xf]  ;;  %v3819_v52 = vmul.f32 0.5, %v323_v27  ;;  %v635_v53 = vadd.f32 %v523_v24, %v515_v23  ;;  %v526_v6 = vld [vmem:[%s7208_s1 + $0x6c] sm:$0xf]  ;;  %v3859_v22 = vmul.f32 0.5, %v692_v57 }
  0x68   :  { %v651_v55 = vadd.f32 %v587_v20, %v579_v19  ;;  %v716_v2 = vsub.f32 %v652_v31, %v684_v44  ;;  %v542_v21 = vld [vmem:[%s7208_s1 + $0xac] sm:$0xf]  ;;  %v3861_v23 = vmul.f32 0.5, %v700_v0  ;;  %v3863_v24 = vmul.f32 0.5, %v708_v1  ;;  %v525_v1 = vld [vmem:[%s7208_s1 + $0x68] sm:$0xf] }
  0x69   :  { %v3821_v56 = vmul.f32 0.5, %v326_v33  ;;  %v550_v33 = vld [vmem:[%s7208_s1 + $0xcc] sm:$0xf]  ;;  %v691_v29 = vsub.f32 %v627_v46, %v659_v8  ;;  %v707_v48 = vsub.f32 %v643_v54, %v675_v5  ;;  %v630_v31 = vadd.f32 %v510_v4, %v502_v3  ;;  %v509_v54 = vld [vmem:[%s7208_s1 + $0x28] sm:$0xf] }
  0x6a   :  { %v3865_v27 = vmul.f32 0.5, %v716_v2  ;;  %v558_v37 = vld [vmem:[%s7208_s1 + $0xec] sm:$0xf]  ;;  %v3891_v28 = vadd.f32 %v3861_v23, %v3859_v22  ;;  %v638_v32 = vadd.f32 %v526_v6, %v518_v62  ;;  %v662_v46 = vadd.f32 %v542_v21, %v534_v16  ;;  %v533_v2 = vld [vmem:[%s7208_s1 + $0x88] sm:$0xf] }
  0x6b   :  { %384 = vrot.lane.b32.xlu0 %v3635_v47, %s2526_s12  ;;  %v555_v47 = vld [vmem:[%s7208_s1 + $0xe0] sm:$0xf]  ;;  %v598_v19 = vld [vmem:[%s7208_s1 + $0x18c] sm:$0xf]  ;;  %v3906_v38 = vmul.f32 0.5, %v691_v29  ;;  %v3910_v41 = vmul.f32 0.5, %v707_v48  ;;  %v670_v57 = vadd.f32 %v558_v37, %v550_v33  ;;  %480 = vrot.lane.b32.xlu1 %v3821_v56, %s2526_s12 }
  0x6c   :  { %v667_v14 = vadd.f32 %v555_v47, %v547_v18  ;;  %v590_v18 = vld [vmem:[%s7208_s1 + $0x16c] sm:$0xf]  ;;  %v3895_v47 = vadd.f32 %v3865_v27, %v3863_v24  ;;  %v541_v3 = vld [vmem:[%s7208_s1 + $0xa8] sm:$0xf]  ;;  %v694_v8 = vsub.f32 %v630_v31, %v662_v46  ;;  %v504_v46 = vld [vmem:[%s7208_s1 + $0x14] sm:$0xf] }
  0x6d   :  { %v606_v20 = vld [vmem:[%s7208_s1 + $0x1ac] sm:$0xf]  ;;  %v557_v5 = vld [vmem:[%s7208_s1 + $0xe8] sm:$0xf]  ;;  %v702_v6 = vsub.f32 %v638_v32, %v670_v57  ;;  %v661_v31 = vadd.f32 %v541_v3, %v533_v2  ;;  %v520_v57 = vld [vmem:[%s7208_s1 + $0x54] sm:$0xf] }
  0x6e   :  { %v699_v7 = vsub.f32 %v635_v53, %v667_v14  ;;  %v622_v45 = vld [vmem:[%s7208_s1 + $0x1ec] sm:$0xf]  ;;  %v501_v53 = vld [vmem:[%s7208_s1 + $0x8] sm:$0xf]  ;;  %v678_v0 = vadd.f32 %v606_v20, %v598_v19 }
  0x6f   :  { %388 = vrot.lane.b32.xlu0 %v3667_v9, %s2526_s12  ;;  %v683_v9 = vadd.f32 %v619_v17, %v611_v15  ;;  %v646_v15 = vadd.f32 %v574_v50, %v566_v26  ;;  %v654_v17 = vadd.f32 %v590_v18, %v582_v51  ;;  %v549_v14 = vld [vmem:[%s7208_s1 + $0xc8] sm:$0xf]  ;;  %v629_v26 = vadd.f32 %v509_v54, %v501_v53 }
  0x70   :  { %v3908_v39 = vmul.f32 0.5, %v699_v7  ;;  %v573_v21 = vld [vmem:[%s7208_s1 + $0x128] sm:$0xf]  ;;  %v3967_v7 = vmul.f32 0.5, %v694_v8  ;;  %v3977_v18 = vmul.f32 0.5, %v702_v6 }
  0x71   :  { %v715_v49 = vsub.f32 %v651_v55, %v683_v9  ;;  %v517_v55 = vld [vmem:[%s7208_s1 + $0x48] sm:$0xf]  ;;  %v788_v9 = vadd.f32 %v3895_v47, %v3891_v28  ;;  %v710_v16 = vsub.f32 %v646_v15, %v678_v0  ;;  %v669_v15 = vadd.f32 %v557_v5, %v549_v14  ;;  %v528_v0 = vld [vmem:[%s7208_s1 + $0x74] sm:$0xf] }
  0x72   :  { %v3941_v35 = vadd.f32 %v3908_v39, %v3906_v38  ;;  %v581_v33 = vld [vmem:[%s7208_s1 + $0x148] sm:$0xf]  ;;  %v637_v50 = vadd.f32 %v525_v1, %v517_v55  ;;  %v3998_v53 = vadd.f32 %v3977_v18, %v3967_v7  ;;  %v693_v54 = vsub.f32 %v629_v26, %v661_v31  ;;  %v512_v55 = vld [vmem:[%s7208_s1 + $0x34] sm:$0xf] }
  0x73   :  { %392 = vrot.lane.b32.xlu0 %v3673_v30, %s2526_s12  ;;  %v614_v30 = vld [vmem:[%s7208_s1 + $0x1cc] sm:$0xf]  ;;  %v3912_v44 = vmul.f32 0.5, %v715_v49  ;;  %v589_v37 = vld [vmem:[%s7208_s1 + $0x168] sm:$0xf]  ;;  %v3979_v19 = vmul.f32 0.5, %v710_v16  ;;  %v804_v1 = vsub.f32 %v3891_v28, %v3895_v47  ;;  %v4239_v12 = vsub.f32 %v3906_v38, %v3908_v39 }
  0x74   :  { %v686_v62 = vadd.f32 %v622_v45, %v614_v30  ;;  %v597_v48 = vld [vmem:[%s7208_s1 + $0x188] sm:$0xf]  ;;  %v653_v30 = vadd.f32 %v589_v37, %v581_v33  ;;  %v701_v3 = vsub.f32 %v637_v50, %v669_v15  ;;  %v536_v8 = vld [vmem:[%s7208_s1 + $0x94] sm:$0xf]  ;;  %v4026_v47 = vmul.f32 0.5, %v693_v54 }
  0x75   :  { %v3945_v4 = vadd.f32 %v3912_v44, %v3910_v41  ;;  %v605_v49 = vld [vmem:[%s7208_s1 + $0x1a8] sm:$0xf]  ;;  %v544_v14 = vld [vmem:[%s7208_s1 + $0xb4] sm:$0xf]  ;;  %v4048_v50 = vmul.f32 0.5, %v788_v9 }
  0x76   :  { %v718_v29 = vsub.f32 %v654_v17, %v686_v62  ;;  %v613_v20 = vld [vmem:[%s7208_s1 + $0x1c8] sm:$0xf]  ;;  %v677_v17 = vadd.f32 %v605_v49, %v597_v48  ;;  %v552_v5 = vld [vmem:[%s7208_s1 + $0xd4] sm:$0xf]  ;;  %v664_v33 = vadd.f32 %v544_v14, %v536_v8  ;;  %v4038_v61 = vmul.f32 0.5, %v701_v3 }
  0x77   :  { %396 = vrot.lane.b32.xlu0 %v3679_v36, %s2526_s12  ;;  %v565_v36 = vld [vmem:[%s7208_s1 + $0x108] sm:$0xf]  ;;  %v787_v32 = vadd.f32 %v3945_v4, %v3941_v35  ;;  %v560_v6 = vld [vmem:[%s7208_s1 + $0xf4] sm:$0xf]  ;;  %v4084_v3 = vmul.f32 0.5, %v804_v1 }
  0x78   :  { %v645_v51 = vadd.f32 %v573_v21, %v565_v36  ;;  %v3988_v45 = vmul.f32 0.5, %v718_v29  ;;  %v632_v36 = vadd.f32 %v512_v55, %v504_v46  ;;  %v568_v16 = vld [vmem:[%s7208_s1 + $0x114] sm:$0xf]  ;;  %v640_v21 = vadd.f32 %v528_v0, %v520_v57  ;;  %v503_v0 = vld [vmem:[%s7208_s1 + $0x10] sm:$0xf] }
  0x79   :  { %v576_v29 = vld [vmem:[%s7208_s1 + $0x134] sm:$0xf]  ;;  %v672_v49 = vadd.f32 %v560_v6, %v552_v5  ;;  %v4062_v15 = vadd.f32 %v4038_v61, %v4026_v47  ;;  %v519_v8 = vld [vmem:[%s7208_s1 + $0x50] sm:$0xf]  ;;  %v505_v38 = vld [vmem:[%s7208_s1 + $0x18] sm:$0xf] }
  0x7a   :  { %v4013_v2 = vadd.f32 %v3988_v45, %v3979_v19  ;;  %v709_v62 = vsub.f32 %v645_v51, %v677_v17  ;;  %v584_v48 = vld [vmem:[%s7208_s1 + $0x154] sm:$0xf]  ;;  %v696_v31 = vsub.f32 %v632_v36, %v664_v33  ;;  %v527_v1 = vld [vmem:[%s7208_s1 + $0x70] sm:$0xf] }
  0x7b   :  { %425 = vrot.lane.b32.xlu0 %v3683_v40, %s2526_s12  ;;  %v685_v40 = vadd.f32 %v621_v43, %v613_v20  ;;  %v600_v20 = vld [vmem:[%s7208_s1 + $0x194] sm:$0xf]  ;;  %v4058_v43 = vmul.f32 0.5, %v787_v32  ;;  %v704_v57 = vsub.f32 %v640_v21, %v672_v49  ;;  %v543_v5 = vld [vmem:[%s7208_s1 + $0xb0] sm:$0xf] }
  0x7c   :  { %v790_v37 = vadd.f32 %v4013_v2, %v3998_v53  ;;  %v4040_v26 = vmul.f32 0.5, %v709_v62  ;;  %v608_v9 = vld [vmem:[%s7208_s1 + $0x1b4] sm:$0xf]  ;;  %v511_v62 = vld [vmem:[%s7208_s1 + $0x30] sm:$0xf] }
  0x7d   :  { %v717_v28 = vsub.f32 %v653_v30, %v685_v40  ;;  %v648_v30 = vadd.f32 %v576_v29, %v568_v16  ;;  %v616_v17 = vld [vmem:[%s7208_s1 + $0x1d4] sm:$0xf]  ;;  %v803_v40 = vsub.f32 %v3941_v35, %v3945_v4  ;;  %v680_v55 = vadd.f32 %v608_v9, %v600_v20  ;;  %v551_v21 = vld [vmem:[%s7208_s1 + $0xd0] sm:$0xf] }
  0x7e   :  { %v624_v54 = vld [vmem:[%s7208_s1 + $0x1f4] sm:$0xf]  ;;  %v4088_v34 = vmul.f32 0.5, %v790_v37  ;;  %v4090_v4 = vmul.f32 0.5, %v696_v31  ;;  %v631_v36 = vadd.f32 %v511_v62, %v503_v0  ;;  %v559_v33 = vld [vmem:[%s7208_s1 + $0xf0] sm:$0xf]  ;;  %v639_v29 = vadd.f32 %v527_v1, %v519_v8 }
  0x7f   :  { %429 = vrot.lane.b32.xlu0 %v3700_v13, %s2526_s12  ;;  %v4050_v51 = vmul.f32 0.5, %v717_v28  ;;  %v592_v13 = vld [vmem:[%s7208_s1 + $0x174] sm:$0xf]  ;;  %v688_v35 = vadd.f32 %v624_v54, %v616_v17  ;;  %v712_v14 = vsub.f32 %v648_v30, %v680_v55  ;;  %v806_v28 = vsub.f32 %v3998_v53, %v4013_v2  ;;  %v567_v37 = vld [vmem:[%s7208_s1 + $0x110] sm:$0xf] }
  0x80   :  { %v656_v46 = vadd.f32 %v592_v13, %v584_v48  ;;  %v4122_v53 = vmul.f32 0.5, %v704_v57  ;;  %v575_v2 = vld [vmem:[%s7208_s1 + $0x130] sm:$0xf]  ;;  %v671_v13 = vadd.f32 %v559_v33, %v551_v21  ;;  %v4130_v20 = vmul.f32 0.5, %v803_v40  ;;  %v506_v1 = vld [vmem:[%s7208_s1 + $0x1c] sm:$0xf] }
  0x81   :  { %v4076_v32 = vadd.f32 %v4050_v51, %v4040_v26  ;;  %v583_v49 = vld [vmem:[%s7208_s1 + $0x150] sm:$0xf]  ;;  %v4134_v30 = vmul.f32 0.5, %v712_v14  ;;  %v647_v17 = vadd.f32 %v575_v2, %v567_v37  ;;  %v538_v33 = vld [vmem:[%s7208_s1 + $0x9c] sm:$0xf]  ;;  %v4346_v56 = vsub.f32 %v4040_v26, %v4050_v51 }
  0x82   :  { %v720_v16 = vsub.f32 %v656_v46, %v688_v35  ;;  %v599_v9 = vld [vmem:[%s7208_s1 + $0x190] sm:$0xf]  ;;  %v655_v55 = vadd.f32 %v591_v10, %v583_v49  ;;  %v703_v57 = vsub.f32 %v639_v29, %v671_v13  ;;  %v4157_v35 = vsub.f32 %v3859_v22, %v3861_v23  ;;  %v522_v23 = vld [vmem:[%s7208_s1 + $0x5c] sm:$0xf] }
  0x83   :  { %433 = vrot.lane.b32.xlu0 %v3736_v59, %s2526_s12  ;;  %v535_v59 = vld [vmem:[%s7208_s1 + $0x90] sm:$0xf]  ;;  %v789_v6 = vadd.f32 %v4076_v32, %v4062_v15  ;;  %v805_v0 = vsub.f32 %v4062_v15, %v4076_v32  ;;  %v530_v32 = vld [vmem:[%s7208_s1 + $0x7c] sm:$0xf]  ;;  %v4189_v60 = vadd.f32 %v4122_v53, %v4090_v4 }
  0x84   :  { %v663_v48 = vadd.f32 %v543_v5, %v535_v59  ;;  %v4136_v31 = vmul.f32 0.5, %v720_v16  ;;  %v607_v40 = vld [vmem:[%s7208_s1 + $0x1b0] sm:$0xf]  ;;  %v514_v59 = vld [vmem:[%s7208_s1 + $0x3c] sm:$0xf]  ;;  %v4167_v5 = vmul.f32 0.5, %v806_v28  ;;  %v4183_v28 = vsub.f32 %v3863_v24, %v3865_v27 }
  0x85   :  { %v623_v54 = vld [vmem:[%s7208_s1 + $0x1f0] sm:$0xf]  ;;  %v4159_v62 = vmul.f32 0.5, %v789_v6  ;;  %v679_v8 = vadd.f32 %v607_v40, %v599_v9  ;;  %v4173_v22 = vmul.f32 0.5, %v703_v57  ;;  %v546_v24 = vld [vmem:[%s7208_s1 + $0xbc] sm:$0xf] }
  0x86   :  { %v695_v46 = vsub.f32 %v631_v36, %v663_v48  ;;  %v634_v36 = vadd.f32 %v514_v59, %v506_v1  ;;  %v4193_v6 = vadd.f32 %v4136_v31, %v4134_v30  ;;  %v562_v27 = vld [vmem:[%s7208_s1 + $0xfc] sm:$0xf]  ;;  %v642_v48 = vadd.f32 %v530_v32, %v522_v23 }
  0x87   :  { %437 = vrot.lane.b32.xlu0 %v3770_v11, %s2526_s12  ;;  %v615_v11 = vld [vmem:[%s7208_s1 + $0x1d0] sm:$0xf]  ;;  %v711_v16 = vsub.f32 %v647_v17, %v679_v8  ;;  %v570_v37 = vld [vmem:[%s7208_s1 + $0x11c] sm:$0xf]  ;;  %v666_v2 = vadd.f32 %v546_v24, %v538_v33  ;;  %v4220_v17 = vmul.f32 0.5, %v805_v0  ;;  %v4235_v57 = vadd.f32 %v4183_v28, %v4157_v35 }
  0x88   :  { %v687_v14 = vadd.f32 %v623_v54, %v615_v11  ;;  %v4171_v15 = vmul.f32 0.5, %v695_v46  ;;  %v578_v29 = vld [vmem:[%s7208_s1 + $0x13c] sm:$0xf]  ;;  %v792_v0 = vadd.f32 %v4193_v6, %v4189_v60  ;;  %v529_v33 = vld [vmem:[%s7208_s1 + $0x78] sm:$0xf] }
  0x89   :  { %v4213_v49 = vmul.f32 0.5, %v711_v16  ;;  %v586_v10 = vld [vmem:[%s7208_s1 + $0x15c] sm:$0xf]  ;;  %v650_v9 = vadd.f32 %v578_v29, %v570_v37  ;;  %v513_v16 = vld [vmem:[%s7208_s1 + $0x38] sm:$0xf]  ;;  %v808_v37 = vsub.f32 %v4189_v60, %v4193_v6 }
  0x8a   :  { %v719_v21 = vsub.f32 %v655_v55, %v687_v14  ;;  %v594_v46 = vld [vmem:[%s7208_s1 + $0x17c] sm:$0xf]  ;;  %v698_v55 = vsub.f32 %v634_v36, %v666_v2  ;;  %v4260_v39 = vadd.f32 %v4173_v22, %v4171_v15  ;;  %v537_v24 = vld [vmem:[%s7208_s1 + $0x98] sm:$0xf] }
  0x8b   :  { %466 = vrot.lane.b32.xlu0 %v3740_v63, %s2526_s12  ;;  %v554_v63 = vld [vmem:[%s7208_s1 + $0xdc] sm:$0xf]  ;;  %v658_v1 = vadd.f32 %v594_v46, %v586_v10  ;;  %v553_v2 = vld [vmem:[%s7208_s1 + $0xd8] sm:$0xf] }
  0x8c   :  { %v4215_v13 = vmul.f32 0.5, %v719_v21  ;;  %v602_v40 = vld [vmem:[%s7208_s1 + $0x19c] sm:$0xf]  ;;  %v674_v54 = vadd.f32 %v562_v27, %v554_v63  ;;  %v4262_v36 = vmul.f32 0.5, %v698_v55  ;;  %v521_v21 = vld [vmem:[%s7208_s1 + $0x58] sm:$0xf]  ;;  %v633_v27 = vadd.f32 %v513_v16, %v505_v38 }
  0x8d   :  { %v610_v11 = vld [vmem:[%s7208_s1 + $0x1bc] sm:$0xf]  ;;  %v545_v63 = vld [vmem:[%s7208_s1 + $0xb8] sm:$0xf] }
  0x8e   :  { %v618_v8 = vld [vmem:[%s7208_s1 + $0x1dc] sm:$0xf]  ;;  %v682_v59 = vadd.f32 %v610_v11, %v602_v40  ;;  %v706_v32 = vsub.f32 %v642_v48, %v674_v54  ;;  %v561_v10 = vld [vmem:[%s7208_s1 + $0xf8] sm:$0xf]  ;;  %v665_v46 = vadd.f32 %v545_v63, %v537_v24  ;;  %v4295_v40 = vmul.f32 0.5, %v792_v0 }
  0x8f   :  { %470 = vrot.lane.b32.xlu0 %v3788_v25, %s2526_s12  ;;  %v626_v14 = vld [vmem:[%s7208_s1 + $0x1fc] sm:$0xf]  ;;  %v4256_v25 = vsub.f32 %v3910_v41, %v3912_v44  ;;  %v4272_v41 = vadd.f32 %v4215_v13, %v4213_v49  ;;  %v577_v6 = vld [vmem:[%s7208_s1 + $0x138] sm:$0xf]  ;;  %v673_v11 = vadd.f32 %v561_v10, %v553_v2  ;;  %v4340_v63 = vsub.f32 %v4026_v47, %v4038_v61 }
  0x90   :  { %v690_v23 = vadd.f32 %v626_v14, %v618_v8  ;;  %v714_v44 = vsub.f32 %v650_v9, %v682_v59  ;;  %v738_v48 = vmul.f32 0.5, %v706_v32  ;;  %v641_v9 = vadd.f32 %v529_v33, %v521_v21  ;;  %v593_v0 = vld [vmem:[%s7208_s1 + $0x178] sm:$0xf] }
  0x91   :  { %v4305_v54 = vadd.f32 %v4256_v25, %v4239_v12  ;;  %v649_v8 = vadd.f32 %v577_v6, %v569_v42  ;;  %v697_v14 = vsub.f32 %v633_v27, %v665_v46  ;;  %v791_v59 = vadd.f32 %v4272_v41, %v4260_v39  ;;  %v601_v38 = vld [vmem:[%s7208_s1 + $0x198] sm:$0xf] }
  0x92   :  { %v722_v29 = vsub.f32 %v658_v1, %v690_v23  ;;  %v746_v60 = vmul.f32 0.5, %v714_v44  ;;  %v4315_v1 = vsub.f32 %v3967_v7, %v3977_v18  ;;  %v609_v23 = vld [vmem:[%s7208_s1 + $0x1b8] sm:$0xf]  ;;  %v705_v21 = vsub.f32 %v641_v9, %v673_v11 }
  0x93   :  { %474 = vrot.lane.b32.xlu0 %v3819_v52, %s2526_s12  ;;  %v585_v52 = vld [vmem:[%s7208_s1 + $0x158] sm:$0xf]  ;;  %v4330_v7 = vsub.f32 %v3979_v19, %v3988_v45  ;;  %v762_v18 = vadd.f32 %v738_v48, %v4262_v36  ;;  %v681_v24 = vadd.f32 %v609_v23, %v601_v38  ;;  %v729_v45 = vmul.f32 0.5, %v697_v14 }
  0x94   :  { %v754_v55 = vmul.f32 0.5, %v722_v29  ;;  %v617_v32 = vld [vmem:[%s7208_s1 + $0x1d8] sm:$0xf]  ;;  %v657_v16 = vadd.f32 %v593_v0, %v585_v52  ;;  %v737_v27 = vmul.f32 0.5, %v705_v21  ;;  %v4348_v2 = vmul.f32 0.5, %v808_v37 }
  0x95   :  { %v625_v33 = vld [vmem:[%s7208_s1 + $0x1f8] sm:$0xf]  ;;  %v713_v29 = vsub.f32 %v649_v8, %v681_v24  ;;  %v807_v10 = vsub.f32 %v4260_v39, %v4272_v41  ;;  %v4354_v47 = vsub.f32 %v4090_v4, %v4122_v53  ;;  %v799_v61 = vmul.f32 0.5, %v791_v59  ;;  %s2527_s1 = smov 6   ;;  %v1049_v21 = vld [vmem:[%s7209_s2 + $0x42] sm:$0x3] }
  0x96   :  { %v778_v44 = vadd.f32 %v754_v55, %v746_v60  ;;  %v689_v19 = vadd.f32 %v625_v33, %v617_v32  ;;  %v4360_v46 = vsub.f32 %v4134_v30, %v4136_v31  ;;  %861 = vrot.lane.b32.xlu1 %v4048_v50, %s2527_s1  ;;  %v4366_v4 = vsub.f32 %v4171_v15, %v4173_v22  ;;  %v1033_v32 = vld [vmem:[%s7209_s2 + $0x22] sm:$0x3]  ;;  %v1089_v33 = vld [vmem:[%s7209_s2 + $0x92] sm:$0x3] }
  0x97   :  { %478 = vrot.lane.b32.xlu0 %v3823_v58, %s2526_s12  ;;  %v822_v58 = vadd.f32 %v4330_v7, %v4315_v1  ;;  %v745_v51 = vmul.f32 0.5, %v713_v29  ;;  %v761_v41 = vadd.f32 %v737_v27, %v729_v45  ;;  %v821_v30 = vadd.f32 %v4346_v56, %v4340_v63  ;;  %v1145_v29 = vld [vmem:[%s7209_s2 + $0x102] sm:$0x3] }
  0x98   :  { %v721_v9 = vsub.f32 %v657_v16, %v689_v19  ;;  %v794_v26 = vadd.f32 %v778_v44, %v762_v18  ;;  %v810_v39 = vsub.f32 %v762_v18, %v778_v44  ;;  %v4374_v31 = vsub.f32 %v4213_v49, %v4215_v13  ;;  %v1041_v16 = vld [vmem:[%s7209_s2 + $0x32] sm:$0x3]  ;;  %v1081_v44 = vld [vmem:[%s7209_s2 + $0x82] sm:$0x3] }
  0x99   :  { %v824_v50 = vadd.f32 %v4360_v46, %v4354_v47  ;;  %v4379_v37 = vsub.f32 %v4262_v36, %v738_v48  ;;  %v4381_v15 = vsub.f32 %v746_v60, %v754_v55  ;;  %v4383_v22 = vsub.f32 %v729_v45, %v737_v27  ;;  %v1073_v18 = vld [vmem:[%s7209_s2 + $0x72] sm:$0x3]  ;;  %v1097_v45 = vld [vmem:[%s7209_s2 + $0xa2] sm:$0x3] }
  0x9a   :  { %v753_v53 = vmul.f32 0.5, %v721_v9  ;;  %v823_v42 = vadd.f32 %v4374_v31, %v4366_v4  ;;  %v836_v49 = vsub.f32 %v4157_v35, %v4183_v28  ;;  %865 = vrot.lane.b32.xlu1 %v4088_v34, %s2527_s1  ;;  %v4393_v13 = vmul.f32 0.5, %v807_v10  ;;  %v1105_v27 = vld [vmem:[%s7209_s2 + $0xb2] sm:$0x3] }
  0x9b   :  { %859 = vrot.lane.b32.xlu0 %v4058_v43, %s2527_s1  ;;  %v826_v36 = vadd.f32 %v4381_v15, %v4379_v37  ;;  %v835_v48 = vsub.f32 %v4239_v12, %v4256_v25  ;;  %v838_v60 = vsub.f32 %v4315_v1, %v4330_v7  ;;  %v4404_v35 = vmul.f32 0.5, %v4235_v57  ;;  %v1017_v57 = vld [vmem:[%s7209_s2 + $0x2] sm:$0x3]  ;;  %v1025_v1 = vld [vmem:[%s7209_s2 + $0x12] sm:$0x3] }
  0x9c   :  { %v777_v43 = vadd.f32 %v753_v53, %v745_v51  ;;  %v4387_v6 = vsub.f32 %v745_v51, %v753_v53  ;;  %v802_v28 = vmul.f32 0.5, %v794_v26  ;;  %v4408_v52 = vmul.f32 0.5, %v810_v39  ;;  %v1065_v7 = vld [vmem:[%s7209_s2 + $0x62] sm:$0x3]  ;;  %v1153_v10 = vld [vmem:[%s7209_s2 + $0x112] sm:$0x3] }
  0x9d   :  { %v4411_v0 = vmul.f32 0.5, %v4305_v54  ;;  %v4413_v12 = vmul.f32 0.5, %v822_v58  ;;  %v4415_v25 = vmul.f32 0.5, %v821_v30  ;;  %v4417_v8 = vmul.f32 0.5, %v824_v50  ;;  %v1169_v9 = vld [vmem:[%s7209_s2 + $0x132] sm:$0x3] }
  0x9e   :  { %v793_v11 = vadd.f32 %v777_v43, %v761_v41  ;;  %v809_v55 = vsub.f32 %v761_v41, %v777_v43  ;;  %v825_v34 = vadd.f32 %v4387_v6, %v4383_v22  ;;  %v4421_v14 = vmul.f32 0.5, %v836_v49  ;;  %869 = vrot.lane.b32.xlu1 %v4295_v40, %s2527_s1  ;;  %v1057_v40 = vld [vmem:[%s7209_s2 + $0x52] sm:$0x3]  ;;  %v1177_v58 = vld [vmem:[%s7209_s2 + $0x142] sm:$0x3] }
  0x9f   :  { %863 = vrot.lane.b32.xlu0 %v4159_v62, %s2527_s1  ;;  %v4419_v62 = vmul.f32 0.5, %v823_v42  ;;  %v4431_v59 = vmul.f32 0.5, %v826_v36  ;;  %v4433_v38 = vmul.f32 0.5, %v835_v48  ;;  %v4435_v23 = vmul.f32 0.5, %v838_v60  ;;  %v1185_v26 = vld [vmem:[%s7209_s2 + $0x152] sm:$0x3] }
  0xa0   :  { %7231 = vst [vmem:[#allocation3_spill] sm:$0xff] %v4421_v14  ;;  %v801_v54 = vmul.f32 0.5, %v793_v11  ;;  %v4462_v24 = vmul.f32 0.5, %v809_v55  ;;  %v4464_v19 = vmul.f32 0.5, %v825_v34  ;;  %v1113_v51 = vld [vmem:[%s7209_s2 + $0xc2] sm:$0x3]  ;;  %v4551_v14 = vadd.f32 %v1041_v16, %v1033_v32 }
  0xa1   :  { %7230 = vst [vmem:[#allocation2_spill] sm:$0xff] %v4419_v62  ;;  %7232 = vst [vmem:[#allocation4_spill] sm:$0xff] %v4431_v59  ;;  %v1121_v39 = vld [vmem:[%s7209_s2 + $0xd2] sm:$0x3]  ;;  %v1129_v53 = vld [vmem:[%s7209_s2 + $0xe2] sm:$0x3]  ;;  %v4568_v32 = vadd.f32 %v1153_v10, %v1145_v29 }
  0xa2   :  { %7233 = vst [vmem:[#allocation5_spill] sm:$0xff] %v4433_v38  ;;  %7234 = vst [vmem:[#allocation6_spill] sm:$0xff] %v4435_v23  ;;  %v1137_v41 = vld [vmem:[%s7209_s2 + $0xf2] sm:$0x3]  ;;  %v1193_v30 = vld [vmem:[%s7209_s2 + $0x162] sm:$0x3]  ;;  %873 = vrot.lane.b32.xlu1 %v802_v28, %s2527_s1  ;;  %v4539_v38 = vadd.f32 %v1025_v1, %v1017_v57  ;;  %v4555_v57 = vadd.f32 %v1073_v18, %v1065_v7  ;;  %v4557_v1 = vadd.f32 %v1089_v33, %v1081_v44 }
  0xa3   :  { %867 = vrot.lane.b32.xlu0 %v799_v61, %s2527_s1  ;;  %7235 = vst [vmem:[#allocation7_spill] sm:$0xff] %v4464_v19  ;;  %v1161_v61 = vld [vmem:[%s7209_s2 + $0x122] sm:$0x3]  ;;  %v1201_v50 = vld [vmem:[%s7209_s2 + $0x172] sm:$0x3]  ;;  %v4553_v19 = vadd.f32 %v1057_v40, %v1049_v21  ;;  %v4572_v21 = vadd.f32 %v1185_v26, %v1177_v58  ;;  %v4574_v40 = vadd.f32 %v1105_v27, %v1097_v45 }
  0xa4   :  { %v1209_v43 = vld [vmem:[%s7209_s2 + $0x182] sm:$0x3]  ;;  %v1217_v42 = vld [vmem:[%s7209_s2 + $0x192] sm:$0x3]  ;;  %v4570_v16 = vadd.f32 %v1169_v9, %v1161_v61  ;;  %v4585_v33 = vadd.f32 %v1201_v50, %v1193_v30  ;;  %v4587_v29 = vadd.f32 %v1121_v39, %v1113_v51  ;;  %v4589_v10 = vadd.f32 %v1137_v41, %v1129_v53 }
  0xa5   :  { %v1225_v49 = vld [vmem:[%s7209_s2 + $0x1a2] sm:$0x3]  ;;  %v1233_v36 = vld [vmem:[%s7209_s2 + $0x1b2] sm:$0x3]  ;;  %v4591_v45 = vadd.f32 %v1217_v42, %v1209_v43 }
  0xa6   :  { %v1241_v48 = vld [vmem:[%s7209_s2 + $0x1c2] sm:$0x3]  ;;  %v1249_v34 = vld [vmem:[%s7209_s2 + $0x1d2] sm:$0x3]  ;;  %903 = vrot.lane.b32.xlu1 %v4084_v3, %s2527_s1  ;;  %v4606_v26 = vadd.f32 %v1233_v36, %v1225_v49 }
  0xa7   :  { %v1257_v23 = vld [vmem:[%s7209_s2 + $0x1e2] sm:$0x3]  ;;  %v1265_v28 = vld [vmem:[%s7209_s2 + $0x1f2] sm:$0x3]  ;;  %871 = vrot.lane.b32.xlu0 %v801_v54, %s2527_s1  ;;  %v4608_v51 = vadd.f32 %v1249_v34, %v1241_v48 }
  0xa8   :  { %v1273_v55 = vld [vmem:[%s7209_s2 + $0x202] sm:$0x3]  ;;  %v1281_v11 = vld [vmem:[%s7209_s2 + $0x212] sm:$0x3]  ;;  %v4610_v39 = vadd.f32 %v1265_v28, %v1257_v23  ;;  %v1785_v23 = vsub.f32 %v4539_v38, %v4557_v1 }
  0xa9   :  { %v1289_v60 = vld [vmem:[%s7209_s2 + $0x222] sm:$0x3]  ;;  %v1297_v54 = vld [vmem:[%s7209_s2 + $0x232] sm:$0x3]  ;;  %v4604_v58 = vadd.f32 %v1281_v11, %v1273_v55  ;;  %v1793_v11 = vsub.f32 %v4551_v14, %v4574_v40  ;;  %v1817_v14 = vsub.f32 %v4568_v32, %v4591_v45  ;;  %v1833_v32 = vsub.f32 %v4572_v21, %v4608_v51 }
  0xaa   :  { %v1305_v59 = vld [vmem:[%s7209_s2 + $0x242] sm:$0x3]  ;;  %v1313_v62 = vld [vmem:[%s7209_s2 + $0x252] sm:$0x3]  ;;  %v1601_v30 = vadd.f32 %v1297_v54, %v1289_v60  ;;  %907 = vrot.lane.b32.xlu1 %v4167_v5, %s2527_s1  ;;  %v1841_v5 = vsub.f32 %v4585_v33, %v4610_v39 }
  0xab   :  { %v1321_v7 = vld [vmem:[%s7209_s2 + $0x262] sm:$0x3]  ;;  %v1329_v18 = vld [vmem:[%s7209_s2 + $0x272] sm:$0x3]  ;;  %901 = vrot.lane.b32.xlu0 %v4130_v20, %s2527_s1  ;;  %v1609_v36 = vadd.f32 %v1313_v62, %v1305_v59  ;;  %v1801_v62 = vsub.f32 %v4553_v19, %v4587_v29  ;;  %v1809_v59 = vsub.f32 %v4555_v57, %v4589_v10  ;;  %v1825_v57 = vsub.f32 %v4570_v16, %v4606_v26 }
  0xac   :  { %v1337_v44 = vld [vmem:[%s7209_s2 + $0x282] sm:$0x3]  ;;  %v1345_v27 = vld [vmem:[%s7209_s2 + $0x292] sm:$0x3]  ;;  %v1617_v48 = vadd.f32 %v1329_v18, %v1321_v7 }
  0xad   :  { %v1353_v61 = vld [vmem:[%s7209_s2 + $0x2a2] sm:$0x3]  ;;  %v1361_v9 = vld [vmem:[%s7209_s2 + $0x2b2] sm:$0x3]  ;;  %v1721_v50 = vadd.f32 %v1345_v27, %v1337_v44 }
  0xae   :  { %v1369_v3 = vld [vmem:[%s7209_s2 + $0x2c2] sm:$0x3]  ;;  %v1377_v53 = vld [vmem:[%s7209_s2 + $0x2d2] sm:$0x3]  ;;  %v1729_v43 = vadd.f32 %v1361_v9, %v1353_v61  ;;  %911 = vrot.lane.b32.xlu1 %v4348_v2, %s2527_s1  ;;  %v1016_v2 = vld [vmem:[%s7209_s2] sm:$0x3] }
  0xaf   :  { %v1385_v41 = vld [vmem:[%s7209_s2 + $0x2e2] sm:$0x3]  ;;  %v1393_v20 = vld [vmem:[%s7209_s2 + $0x2f2] sm:$0x3]  ;;  %v1737_v60 = vadd.f32 %v1377_v53, %v1369_v3  ;;  %905 = vrot.lane.b32.xlu0 %v4220_v17, %s2527_s1  ;;  %v1849_v29 = vsub.f32 %v4604_v58, %v1721_v50  ;;  %v1913_v53 = vmul.f32 0.5, %v1785_v23 }
  0xb0   :  { %v1401_v42 = vld [vmem:[%s7209_s2 + $0x302] sm:$0x3]  ;;  %v1409_v49 = vld [vmem:[%s7209_s2 + $0x312] sm:$0x3]  ;;  %v1745_v28 = vadd.f32 %v1393_v20, %v1385_v41  ;;  %v1857_v33 = vsub.f32 %v1601_v30, %v1729_v43  ;;  %v1921_v41 = vmul.f32 0.5, %v1793_v11  ;;  %v1929_v43 = vmul.f32 0.5, %v1801_v62 }
  0xb1   :  { %v1417_v38 = vld [vmem:[%s7209_s2 + $0x322] sm:$0x3]  ;;  %v1425_v55 = vld [vmem:[%s7209_s2 + $0x332] sm:$0x3]  ;;  %v1625_v40 = vadd.f32 %v1409_v49, %v1401_v42  ;;  %v1865_v9 = vsub.f32 %v1609_v36, %v1737_v60  ;;  %v1937_v20 = vmul.f32 0.5, %v1809_v59  ;;  %v1945_v36 = vmul.f32 0.5, %v1817_v14 }
  0xb2   :  { %v1433_v34 = vld [vmem:[%s7209_s2 + $0x342] sm:$0x3]  ;;  %v1441_v1 = vld [vmem:[%s7209_s2 + $0x352] sm:$0x3]  ;;  %v1633_v44 = vadd.f32 %v1425_v55, %v1417_v38  ;;  %v1873_v26 = vsub.f32 %v1617_v48, %v1745_v28  ;;  %v1953_v48 = vmul.f32 0.5, %v1825_v57  ;;  %v1961_v38 = vmul.f32 0.5, %v1833_v32  ;;  %915 = vrot.lane.b32.xlu1 %v4408_v52, %s2527_s1 }
  0xb3   :  { %v1449_v54 = vld [vmem:[%s7209_s2 + $0x362] sm:$0x3]  ;;  %v1457_v19 = vld [vmem:[%s7209_s2 + $0x372] sm:$0x3]  ;;  %v1641_v21 = vadd.f32 %v1441_v1, %v1433_v34  ;;  %909 = vrot.lane.b32.xlu0 %v4393_v13, %s2527_s1  ;;  %v1969_v55 = vmul.f32 0.5, %v1841_v5  ;;  %v1977_v34 = vmul.f32 0.5, %v1849_v29  ;;  %v2041_v14 = vadd.f32 %v1921_v41, %v1913_v53 }
  0xb4   :  { %v1465_v7 = vld [vmem:[%s7209_s2 + $0x382] sm:$0x3]  ;;  %v1473_v18 = vld [vmem:[%s7209_s2 + $0x392] sm:$0x3]  ;;  %v1649_v27 = vadd.f32 %v1457_v19, %v1449_v54  ;;  %v1985_v23 = vmul.f32 0.5, %v1857_v33  ;;  %v1993_v11 = vmul.f32 0.5, %v1865_v9  ;;  %v2049_v19 = vadd.f32 %v1937_v20, %v1929_v43 }
  0xb5   :  { %v1481_v16 = vld [vmem:[%s7209_s2 + $0x3a2] sm:$0x3]  ;;  %v1489_v17 = vld [vmem:[%s7209_s2 + $0x3b2] sm:$0x3]  ;;  %v1753_v61 = vadd.f32 %v1473_v18, %v1465_v7  ;;  %v2001_v28 = vmul.f32 0.5, %v1873_v26  ;;  %v2073_v32 = vadd.f32 %v1953_v48, %v1945_v36  ;;  %v7236_v7 = vsub.f32 %v4340_v63, %v4346_v56 }
  0xb6   :  { %v1497_v10 = vld [vmem:[%s7209_s2 + $0x3c2] sm:$0x3]  ;;  %v1505_v45 = vld [vmem:[%s7209_s2 + $0x3d2] sm:$0x3]  ;;  %v1761_v39 = vadd.f32 %v1489_v17, %v1481_v16  ;;  %v1024_v54 = vld [vmem:[%s7209_s2 + $0x10] sm:$0x3]  ;;  %v2081_v16 = vadd.f32 %v1969_v55, %v1961_v38  ;;  %v7238_v33 = vsub.f32 %v4366_v4, %v4374_v31  ;;  %944 = vrot.lane.b32.xlu1 %v4404_v35, %s2527_s1 }
  0xb7   :  { %v1513_v58 = vld [vmem:[%s7209_s2 + $0x3e2] sm:$0x3]  ;;  %v1521_v51 = vld [vmem:[%s7209_s2 + $0x3f2] sm:$0x3]  ;;  %v1769_v3 = vadd.f32 %v1505_v45, %v1497_v10  ;;  %v1881_v50 = vsub.f32 %v1625_v40, %v1753_v61  ;;  %913 = vrot.lane.b32.xlu0 %v4462_v24, %s2527_s1  ;;  %v2057_v40 = vadd.f32 %v1985_v23, %v1977_v34  ;;  %v2065_v57 = vadd.f32 %v2001_v28, %v1993_v11  ;;  %v1080_v5 = vld [vmem:[%s7209_s2 + $0x80] sm:$0x3] }
  0xb8   :  { %v1777_v30 = vadd.f32 %v1521_v51, %v1513_v58  ;;  %v1889_v42 = vsub.f32 %v1633_v44, %v1761_v39  ;;  %v1088_v52 = vld [vmem:[%s7209_s2 + $0x90] sm:$0x3]  ;;  %v4718_v18 = vmul.f32 0.5, %v7236_v7  ;;  %v4728_v17 = vmul.f32 0.5, %v7238_v33  ;;  %v1032_v61 = vld [vmem:[%s7209_s2 + $0x20] sm:$0x3] }
  0xb9   :  { %v1897_v49 = vsub.f32 %v1641_v21, %v1769_v3  ;;  %v2009_v1 = vmul.f32 0.5, %v1881_v50  ;;  %v7237_v21 = vsub.f32 %v4354_v47, %v4360_v46  ;;  %v2105_v10 = vsub.f32 %v2041_v14, %v2073_v32  ;;  %v1040_v46 = vld [vmem:[%s7209_s2 + $0x30] sm:$0x3]  ;;  %v1096_v4 = vld [vmem:[%s7209_s2 + $0xa0] sm:$0x3] }
  0xba   :  { %v1905_v60 = vsub.f32 %v1649_v27, %v1777_v30  ;;  %v2017_v13 = vmul.f32 0.5, %v1889_v42  ;;  %v1528_v45 = vadd.f32 %v1024_v54, %v1016_v2  ;;  %v2113_v63 = vsub.f32 %v2049_v19, %v2081_v16  ;;  %v1104_v31 = vld [vmem:[%s7209_s2 + $0xb0] sm:$0x3]  ;;  %v1048_v35 = vld [vmem:[%s7209_s2 + $0x40] sm:$0x3]  ;;  %948 = vrot.lane.b32.xlu1 %v4413_v12, %s2527_s1 }
  0xbb   :  { %v2025_v62 = vmul.f32 0.5, %v1897_v49  ;;  %v4723_v29 = vmul.f32 0.5, %v7237_v21  ;;  %v1656_v47 = vadd.f32 %v1088_v52, %v1080_v5  ;;  %942 = vrot.lane.b32.xlu0 %v4411_v0, %s2527_s1  ;;  %v1056_v0 = vld [vmem:[%s7209_s2 + $0x50] sm:$0x3]  ;;  %v1064_v9 = vld [vmem:[%s7209_s2 + $0x60] sm:$0x3]  ;;  %v4827_v2 = vadd.f32 %v1040_v46, %v1032_v61 }
  0xbc   :  { %v2033_v59 = vmul.f32 0.5, %v1905_v60  ;;  %v2089_v44 = vadd.f32 %v2017_v13, %v2009_v1  ;;  %v1072_v26 = vld [vmem:[%s7209_s2 + $0x70] sm:$0x3]  ;;  %v1112_v58 = vld [vmem:[%s7209_s2 + $0xc0] sm:$0x3]  ;;  %v4770_v53 = vmul.f32 0.5, %v2105_v10  ;;  %v4829_v13 = vadd.f32 %v1104_v31, %v1096_v4 }
  0xbd   :  { %v1120_v51 = vld [vmem:[%s7209_s2 + $0xd0] sm:$0x3]  ;;  %v1144_v39 = vld [vmem:[%s7209_s2 + $0x100] sm:$0x3]  ;;  %v4772_v41 = vmul.f32 0.5, %v2113_v63  ;;  %v1784_v23 = vsub.f32 %v1528_v45, %v1656_v47  ;;  %v4853_v5 = vadd.f32 %v1056_v0, %v1048_v35  ;;  %v4855_v52 = vadd.f32 %v1072_v26, %v1064_v9 }
  0xbe   :  { %v2097_v24 = vadd.f32 %v2033_v59, %v2025_v62  ;;  %v2121_v56 = vsub.f32 %v2057_v40, %v2089_v44  ;;  %v1152_v3 = vld [vmem:[%s7209_s2 + $0x110] sm:$0x3]  ;;  %v1128_v43 = vld [vmem:[%s7209_s2 + $0xe0] sm:$0x3]  ;;  %v842_v62 = vsub.f32 %v4379_v37, %v4381_v15  ;;  %v841_v59 = vsub.f32 %v4383_v22, %v4387_v6  ;;  %952 = vrot.lane.b32.xlu1 %v4417_v8, %s2527_s1  ;;  %v1035_v6 = vld [vmem:[%s7209_s2 + $0x26] sm:$0x3] }
  0xbf   :  { %v1136_v20 = vld [vmem:[%s7209_s2 + $0xf0] sm:$0x3]  ;;  %v1160_v42 = vld [vmem:[%s7209_s2 + $0x120] sm:$0x3]  ;;  %946 = vrot.lane.b32.xlu0 %v4415_v25, %s2527_s1  ;;  %v4857_v7 = vadd.f32 %v1152_v3, %v1144_v39  ;;  %v4859_v16 = vadd.f32 %v1120_v51, %v1112_v58  ;;  %v4875_v45 = vmul.f32 0.5, %v1784_v23  ;;  %v4881_v8 = vadd.f32 %v4772_v41, %v4770_v53 }
  0xc0   :  { %v2129_v27 = vsub.f32 %v2065_v57, %v2097_v24  ;;  %v4774_v30 = vmul.f32 0.5, %v2121_v56  ;;  %v1168_v49 = vld [vmem:[%s7209_s2 + $0x130] sm:$0x3]  ;;  %v1176_v36 = vld [vmem:[%s7209_s2 + $0x140] sm:$0x3]  ;;  %v4873_v10 = vadd.f32 %v1136_v20, %v1128_v43  ;;  %v1792_v4 = vsub.f32 %v4827_v2, %v4829_v13 }
  0xc1   :  { %v1184_v48 = vld [vmem:[%s7209_s2 + $0x150] sm:$0x3]  ;;  %v1208_v60 = vld [vmem:[%s7209_s2 + $0x180] sm:$0x3]  ;;  %v4869_v21 = vadd.f32 %v1168_v49, %v1160_v42  ;;  %v1800_v13 = vsub.f32 %v4853_v5, %v4859_v16 }
  0xc2   :  { %v4776_v50 = vmul.f32 0.5, %v2129_v27  ;;  %v1216_v38 = vld [vmem:[%s7209_s2 + $0x190] sm:$0x3]  ;;  %v1224_v55 = vld [vmem:[%s7209_s2 + $0x1a0] sm:$0x3]  ;;  %v4871_v33 = vadd.f32 %v1184_v48, %v1176_v36 }
  0xc3   :  { %v1232_v34 = vld [vmem:[%s7209_s2 + $0x1b0] sm:$0x3]  ;;  %v1192_v12 = vld [vmem:[%s7209_s2 + $0x160] sm:$0x3]  ;;  %v4892_v47 = vadd.f32 %v1216_v38, %v1208_v60 }
  0xc4   :  { %v1200_v11 = vld [vmem:[%s7209_s2 + $0x170] sm:$0x3]  ;;  %v1240_v28 = vld [vmem:[%s7209_s2 + $0x1c0] sm:$0x3]  ;;  %v4894_v46 = vadd.f32 %v1232_v34, %v1224_v55  ;;  %v4928_v60 = vadd.f32 %v4776_v50, %v4774_v30 }
  0xc5   :  { %v1248_v1 = vld [vmem:[%s7209_s2 + $0x1d0] sm:$0x3]  ;;  %v1256_v25 = vld [vmem:[%s7209_s2 + $0x1e0] sm:$0x3]  ;;  %v4907_v9 = vadd.f32 %v1200_v11, %v1192_v12 }
  0xc6   :  { %v1264_v14 = vld [vmem:[%s7209_s2 + $0x1f0] sm:$0x3]  ;;  %v1272_v54 = vld [vmem:[%s7209_s2 + $0x200] sm:$0x3]  ;;  %v1704_v58 = vadd.f32 %v1248_v1, %v1240_v28  ;;  %v7241_v28 = vld [vmem:[#allocation7_spill] sm:$0xff] }
  0xc7   :  { %v1280_v19 = vld [vmem:[%s7209_s2 + $0x210] sm:$0x3]  ;;  %v1288_v40 = vld [vmem:[%s7209_s2 + $0x220] sm:$0x3]  ;;  %v1712_v51 = vadd.f32 %v1264_v14, %v1256_v25  ;;  %v1808_v14 = vsub.f32 %v4855_v52, %v4873_v10 }
  0xc8   :  { %v1296_v57 = vld [vmem:[%s7209_s2 + $0x230] sm:$0x3]  ;;  %v1304_v32 = vld [vmem:[%s7209_s2 + $0x240] sm:$0x3]  ;;  %v4909_v26 = vadd.f32 %v1280_v19, %v1272_v54  ;;  %v1816_v54 = vsub.f32 %v4857_v7, %v4892_v47  ;;  %v1824_v19 = vsub.f32 %v4869_v21, %v4894_v46  ;;  %v1832_v16 = vsub.f32 %v4871_v33, %v1704_v58 }
  0xc9   :  { %v1312_v44 = vld [vmem:[%s7209_s2 + $0x250] sm:$0x3]  ;;  %v1320_v24 = vld [vmem:[%s7209_s2 + $0x260] sm:$0x3]  ;;  %v4920_v20 = vadd.f32 %v1296_v57, %v1288_v40  ;;  %v1840_v7 = vsub.f32 %v4907_v9, %v1712_v51 }
  0xca   :  { %v7239_v63 = vld [vmem:[#allocation2_spill] sm:$0xff]  ;;  %v1328_v56 = vld [vmem:[%s7209_s2 + $0x270] sm:$0x3]  ;;  %v4922_v42 = vadd.f32 %v1312_v44, %v1304_v32 }
  0xcb   :  { %950 = vrot.lane.b32.xlu0 %v7239_v63, %s2527_s1  ;;  %v1336_v27 = vld [vmem:[%s7209_s2 + $0x280] sm:$0x3]  ;;  %v1344_v61 = vld [vmem:[%s7209_s2 + $0x290] sm:$0x3]  ;;  %v1616_v23 = vadd.f32 %v1328_v56, %v1320_v24 }
  0xcc   :  { %v1352_v31 = vld [vmem:[%s7209_s2 + $0x2a0] sm:$0x3]  ;;  %v1360_v35 = vld [vmem:[%s7209_s2 + $0x2b0] sm:$0x3]  ;;  %v1720_v49 = vadd.f32 %v1344_v61, %v1336_v27  ;;  %v7242_v27 = vld [vmem:[#allocation3_spill] sm:$0xff] }
  0xcd   :  { %v1368_v0 = vld [vmem:[%s7209_s2 + $0x2c0] sm:$0x3]  ;;  %v1376_v39 = vld [vmem:[%s7209_s2 + $0x2d0] sm:$0x3]  ;;  %v1728_v36 = vadd.f32 %v1360_v35, %v1352_v31 }
  0xce   :  { %v1384_v3 = vld [vmem:[%s7209_s2 + $0x2e0] sm:$0x3]  ;;  %v1392_v43 = vld [vmem:[%s7209_s2 + $0x2f0] sm:$0x3]  ;;  %v1736_v12 = vadd.f32 %v1376_v39, %v1368_v0  ;;  %v1848_v63 = vsub.f32 %v4909_v26, %v1720_v49  ;;  %v7243_v26 = vld [vmem:[#allocation5_spill] sm:$0xff]  ;;  %v1920_v39 = vmul.f32 0.5, %v1792_v4 }
  0xcf   :  { %v7240_v48 = vld [vmem:[#allocation4_spill] sm:$0xff]  ;;  %v1400_v38 = vld [vmem:[%s7209_s2 + $0x300] sm:$0x3]  ;;  %v1744_v11 = vadd.f32 %v1392_v43, %v1384_v3  ;;  %954 = vrot.lane.b32.xlu0 %v7241_v28, %s2527_s1  ;;  %v1856_v56 = vsub.f32 %v4920_v20, %v1728_v36  ;;  %v1928_v3 = vmul.f32 0.5, %v1800_v13  ;;  %v1936_v43 = vmul.f32 0.5, %v1808_v14  ;;  %v348_v20 = vpop.permute.xlu1 %347 }
  0xd0   :  { %956 = vrot.lane.b32.xlu1 %v7240_v48, %s2527_s1  ;;  %v1408_v55 = vld [vmem:[%s7209_s2 + $0x310] sm:$0x3]  ;;  %v1416_v34 = vld [vmem:[%s7209_s2 + $0x320] sm:$0x3]  ;;  %v1864_v33 = vsub.f32 %v4922_v42, %v1736_v12  ;;  %v1944_v48 = vmul.f32 0.5, %v1816_v54  ;;  %370 = vst.msk [vmem:[%s7207_s3 + $0x24] sm:$0xff] %vm367_vm1, %v348_v20 }
  0xd1   :  { %v1424_v1 = vld [vmem:[%s7209_s2 + $0x330] sm:$0x3]  ;;  %v1432_v25 = vld [vmem:[%s7209_s2 + $0x340] sm:$0x3]  ;;  %v1624_v5 = vadd.f32 %v1408_v55, %v1400_v38  ;;  %v1872_v9 = vsub.f32 %v1616_v23, %v1744_v11  ;;  %v344_v38 = vpop.permute.xlu0 %343  ;;  %v1960_v23 = vmul.f32 0.5, %v1832_v16  ;;  %v1968_v12 = vmul.f32 0.5, %v1840_v7 }
  0xd2   :  { %v1440_v2 = vld [vmem:[%s7209_s2 + $0x350] sm:$0x3]  ;;  %v1448_v40 = vld [vmem:[%s7209_s2 + $0x360] sm:$0x3]  ;;  %v1632_v52 = vadd.f32 %v1424_v1, %v1416_v34  ;;  %v1952_v34 = vmul.f32 0.5, %v1824_v19  ;;  %368 = vst.msk [vmem:[%s7207_s3 + $0x4] sm:$0xff] %vm367_vm1, %v344_v38 }
  0xd3   :  { %v1456_v57 = vld [vmem:[%s7209_s2 + $0x370] sm:$0x3]  ;;  %v1464_v32 = vld [vmem:[%s7209_s2 + $0x380] sm:$0x3]  ;;  %v1640_v10 = vadd.f32 %v1440_v2, %v1432_v25  ;;  %983 = vrot.lane.b32.xlu0 %v7243_v26, %s2527_s1  ;;  %v1976_v28 = vmul.f32 0.5, %v1848_v63  ;;  %v1984_v1 = vmul.f32 0.5, %v1856_v56  ;;  %v350_v19 = vpop.permute.xlu1 %349  ;;  %v2201_v56 = vadd.f32 %v4928_v60, %v4881_v8 }
  0xd4   :  { %v1472_v44 = vld [vmem:[%s7209_s2 + $0x390] sm:$0x3]  ;;  %v1480_v24 = vld [vmem:[%s7209_s2 + $0x3a0] sm:$0x3]  ;;  %985 = vrot.lane.b32.xlu1 %v7242_v27, %s2527_s1  ;;  %v1648_v31 = vadd.f32 %v1456_v57, %v1448_v40  ;;  %v1992_v25 = vmul.f32 0.5, %v1864_v33  ;;  %v2000_v2 = vmul.f32 0.5, %v1872_v9  ;;  %v2040_v57 = vadd.f32 %v1920_v39, %v4875_v45 }
  0xd5   :  { %v1488_v21 = vld [vmem:[%s7209_s2 + $0x3b0] sm:$0x3]  ;;  %v1496_v61 = vld [vmem:[%s7209_s2 + $0x3c0] sm:$0x3]  ;;  %v1752_v35 = vadd.f32 %v1472_v44, %v1464_v32  ;;  %v2048_v32 = vadd.f32 %v1936_v43, %v1928_v3  ;;  %371 = vst.msk [vmem:[%s7207_s3 + $0x34] sm:$0xff] %vm367_vm1, %v350_v19  ;;  %v2072_v7 = vadd.f32 %v1952_v34, %v1944_v48  ;;  %v2080_v44 = vadd.f32 %v1968_v12, %v1960_v23 }
  0xd6   :  { %v1504_v47 = vld [vmem:[%s7209_s2 + $0x3d0] sm:$0x3]  ;;  %v1512_v46 = vld [vmem:[%s7209_s2 + $0x3e0] sm:$0x3]  ;;  %v1760_v0 = vadd.f32 %v1488_v21, %v1480_v24  ;;  %v2064_v16 = vadd.f32 %v2000_v2, %v1992_v25  ;;  %v1027_v45 = vld [vmem:[%s7209_s2 + $0x16] sm:$0x3] }
  0xd7   :  { %v1520_v58 = vld [vmem:[%s7209_s2 + $0x3f0] sm:$0x3]  ;;  %v1768_v51 = vadd.f32 %v1504_v47, %v1496_v61  ;;  %v1880_v49 = vsub.f32 %v1624_v5, %v1752_v35  ;;  %v7244_v4 = vld [vmem:[#allocation6_spill] sm:$0xff]  ;;  %987 = vrot.lane.b32.xlu0 %v4718_v18, %s2527_s1  ;;  %v2056_v5 = vadd.f32 %v1984_v1, %v1976_v28  ;;  %v346_v18 = vpop.permute.xlu0 %345  ;;  %v850_v63 = vmul.f32 0.5, %v842_v62  ;;  %v1075_v39 = vld [vmem:[%s7209_s2 + $0x76] sm:$0x3] }
  0xd8   :  { %v1776_v42 = vadd.f32 %v1520_v58, %v1512_v46  ;;  %v1888_v36 = vsub.f32 %v1632_v52, %v1760_v0  ;;  %989 = vrot.lane.b32.xlu1 %v7244_v4, %s2527_s1  ;;  %v1019_v52 = vld [vmem:[%s7209_s2 + $0x6] sm:$0x3]  ;;  %369 = vst.msk [vmem:[%s7207_s3 + $0x14] sm:$0xff] %vm367_vm1, %v346_v18  ;;  %v849_v27 = vmul.f32 0.5, %v841_v59  ;;  %v2104_v61 = vsub.f32 %v2040_v57, %v2072_v7  ;;  %v1043_v59 = vld [vmem:[%s7209_s2 + $0x36] sm:$0x3] }
  0xd9   :  { %v1896_v55 = vsub.f32 %v1640_v10, %v1768_v51  ;;  %v2008_v13 = vmul.f32 0.5, %v1880_v49  ;;  %v1083_v21 = vld [vmem:[%s7209_s2 + $0x86] sm:$0x3]  ;;  %v1091_v10 = vld [vmem:[%s7209_s2 + $0x96] sm:$0x3]  ;;  %v2112_v47 = vsub.f32 %v2048_v32, %v2080_v44  ;;  %v5042_v35 = vadd.f32 %v1027_v45, %v1019_v52 }
  0xda   :  { %v1904_v11 = vsub.f32 %v1648_v31, %v1776_v42  ;;  %v2016_v14 = vmul.f32 0.5, %v1888_v36  ;;  %v354_v31 = vpop.permute.xlu1 %353  ;;  %v5044_v37 = vadd.f32 %v1091_v10, %v1083_v21  ;;  %v2209_v0 = vmul.f32 0.5, %v2201_v56  ;;  %v1051_v26 = vld [vmem:[%s7209_s2 + $0x46] sm:$0x3]  ;;  %v1059_v58 = vld [vmem:[%s7209_s2 + $0x56] sm:$0x3] }
  0xdb   :  { %v2024_v54 = vmul.f32 0.5, %v1896_v55  ;;  %991 = vrot.lane.b32.xlu0 %v4728_v17, %s2527_s1  ;;  %373 = vst.msk [vmem:[%s7207_s3 + $0x54] sm:$0xff] %vm367_vm1, %v354_v31  ;;  %v352_v15 = vpop.permute.xlu0 %351  ;;  %v5050_v17 = vmul.f32 0.5, %v2104_v61  ;;  %v5052_v62 = vmul.f32 0.5, %v2112_v47  ;;  %v1067_v51 = vld [vmem:[%s7209_s2 + $0x66] sm:$0x3]  ;;  %v5175_v44 = vadd.f32 %v1043_v59, %v1035_v6 }
  0xdc   :  { %v2032_v40 = vmul.f32 0.5, %v1904_v11  ;;  %v2088_v24 = vadd.f32 %v2016_v14, %v2008_v13  ;;  %993 = vrot.lane.b32.xlu1 %v4723_v29, %s2527_s1  ;;  %372 = vst.msk [vmem:[%s7207_s3 + $0x44] sm:$0xff] %vm367_vm1, %v352_v15  ;;  %v1099_v3 = vld [vmem:[%s7209_s2 + $0xa6] sm:$0x3]  ;;  %v1107_v43 = vld [vmem:[%s7209_s2 + $0xb6] sm:$0x3]  ;;  %v1787_v14 = vsub.f32 %v5042_v35, %v5044_v37  ;;  %v5186_v10 = vadd.f32 %v1059_v58, %v1051_v26 }
  0xdd   :  { %v1115_v20 = vld [vmem:[%s7209_s2 + $0xc6] sm:$0x3]  ;;  %v1123_v42 = vld [vmem:[%s7209_s2 + $0xd6] sm:$0x3]  ;;  %v5096_v49 = vadd.f32 %v5052_v62, %v5050_v17  ;;  %v5190_v56 = vadd.f32 %v1107_v43, %v1099_v3 }
  0xde   :  { %v2096_v33 = vadd.f32 %v2032_v40, %v2024_v54  ;;  %v2120_v46 = vsub.f32 %v2056_v5, %v2088_v24  ;;  %v1147_v36 = vld [vmem:[%s7209_s2 + $0x106] sm:$0x3]  ;;  %v1155_v48 = vld [vmem:[%s7209_s2 + $0x116] sm:$0x3]  ;;  %v358_v34 = vpop.permute.xlu1 %357  ;;  %v5204_v35 = vmul.f32 0.5, %v1787_v14 }
  0xdf   :  { %995 = vrot.lane.b32.xlu0 %v849_v27, %s2527_s1  ;;  %7245 = vst [vmem:[#allocation2_spill] sm:$0xff] %v5096_v49  ;;  %v1163_v38 = vld [vmem:[%s7209_s2 + $0x126] sm:$0x3]  ;;  %v1171_v55 = vld [vmem:[%s7209_s2 + $0x136] sm:$0x3]  ;;  %375 = vst.msk [vmem:[%s7207_s3 + $0x74] sm:$0xff] %vm367_vm1, %v358_v34  ;;  %v356_v54 = vpop.permute.xlu0 %355  ;;  %v5200_v31 = vadd.f32 %v1155_v48, %v1147_v36 }
  0xe0   :  { %v2128_v29 = vsub.f32 %v2064_v16, %v2096_v33  ;;  %v5054_v22 = vmul.f32 0.5, %v2120_v46  ;;  %997 = vrot.lane.b32.xlu1 %v850_v63, %s2527_s1  ;;  %v1131_v12 = vld [vmem:[%s7209_s2 + $0xe6] sm:$0x3]  ;;  %v1139_v4 = vld [vmem:[%s7209_s2 + $0xf6] sm:$0x3]  ;;  %374 = vst.msk [vmem:[%s7207_s3 + $0x64] sm:$0xff] %vm367_vm1, %v356_v54  ;;  %v5188_v63 = vadd.f32 %v1075_v39, %v1067_v51  ;;  %v5192_v33 = vadd.f32 %v1123_v42, %v1115_v20 }
  0xe1   :  { %v1179_v11 = vld [vmem:[%s7209_s2 + $0x146] sm:$0x3]  ;;  %v1187_v28 = vld [vmem:[%s7209_s2 + $0x156] sm:$0x3]  ;;  %v5221_v26 = vadd.f32 %v1139_v4, %v1131_v12 }
  0xe2   :  { %v5067_v9 = vmul.f32 0.5, %v2128_v29  ;;  %v1211_v1 = vld [vmem:[%s7209_s2 + $0x186] sm:$0x3]  ;;  %v1219_v25 = vld [vmem:[%s7209_s2 + $0x196] sm:$0x3]  ;;  %v387_v61 = vpop.permute.xlu1 %386  ;;  %v5202_v29 = vadd.f32 %v1171_v55, %v1163_v38 }
  0xe3   :  { %v1227_v2 = vld [vmem:[%s7209_s2 + $0x1a6] sm:$0x3]  ;;  %v1235_v13 = vld [vmem:[%s7209_s2 + $0x1b6] sm:$0x3]  ;;  %2434 = vst.msk [vmem:[%s7207_s3 + $0x94] sm:$0xff] %vm367_vm1, %v387_v61  ;;  %v385_v37 = vpop.permute.xlu0 %384  ;;  %v5223_v58 = vadd.f32 %v1219_v25, %v1211_v1 }
  0xe4   :  { %v5112_v23 = vadd.f32 %v5067_v9, %v5054_v22  ;;  %v1195_v19 = vld [vmem:[%s7209_s2 + $0x166] sm:$0x3]  ;;  %v1203_v40 = vld [vmem:[%s7209_s2 + $0x176] sm:$0x3]  ;;  %2274 = vrot.lane.b32.xlu1 %v2209_v0, %s2528_s10  ;;  %v5219_v0 = vadd.f32 %v1187_v28, %v1179_v11  ;;  %v5225_v51 = vadd.f32 %v1235_v13, %v1227_v2  ;;  %2433 = vst.msk [vmem:[%s7207_s3 + $0x84] sm:$0xff] %vm367_vm1, %v385_v37 }
  0xe5   :  { %v1243_v57 = vld [vmem:[%s7209_s2 + $0x1c6] sm:$0x3]  ;;  %v1251_v32 = vld [vmem:[%s7209_s2 + $0x1d6] sm:$0x3]  ;;  %v5241_v20 = vadd.f32 %v1203_v40, %v1195_v19  ;;  %v1795_v19 = vsub.f32 %v5175_v44, %v5190_v56 }
  0xe6   :  { %7246 = vst [vmem:[#allocation4_spill] sm:$0xff] %v5112_v23  ;;  %v1259_v5 = vld [vmem:[%s7209_s2 + $0x1e6] sm:$0x3]  ;;  %v2200_v52 = vadd.f32 %v5112_v23, %v5096_v49  ;;  %v1267_v18 = vld [vmem:[%s7209_s2 + $0x1f6] sm:$0x3]  ;;  %v5245_v36 = vadd.f32 %v1251_v32, %v1243_v57  ;;  %v391_v40 = vpop.permute.xlu1 %390 }
  0xe7   :  { %v1275_v16 = vld [vmem:[%s7209_s2 + $0x206] sm:$0x3]  ;;  %v1283_v7 = vld [vmem:[%s7209_s2 + $0x216] sm:$0x3]  ;;  %v5247_v48 = vadd.f32 %v1267_v18, %v1259_v5  ;;  %v1811_v18 = vsub.f32 %v5188_v63, %v5221_v26  ;;  %2436 = vst.msk [vmem:[%s7207_s3 + $0xb4] sm:$0xff] %vm367_vm1, %v391_v40  ;;  %v389_v44 = vpop.permute.xlu0 %388 }
  0xe8   :  { %v1291_v24 = vld [vmem:[%s7209_s2 + $0x226] sm:$0x3]  ;;  %v1299_v45 = vld [vmem:[%s7209_s2 + $0x236] sm:$0x3]  ;;  %v2208_v27 = vmul.f32 0.5, %v2200_v52  ;;  %v5243_v42 = vadd.f32 %v1283_v7, %v1275_v16  ;;  %v1803_v52 = vsub.f32 %v5186_v10, %v5192_v33  ;;  %v1819_v16 = vsub.f32 %v5200_v31, %v5223_v58  ;;  %2435 = vst.msk [vmem:[%s7207_s3 + $0xa4] sm:$0xff] %vm367_vm1, %v389_v44 }
  0xe9   :  { %v1307_v21 = vld [vmem:[%s7209_s2 + $0x246] sm:$0x3]  ;;  %v1315_v47 = vld [vmem:[%s7209_s2 + $0x256] sm:$0x3]  ;;  %v1603_v12 = vadd.f32 %v1299_v45, %v1291_v24  ;;  %v1827_v7 = vsub.f32 %v5202_v29, %v5225_v51  ;;  %v1835_v56 = vsub.f32 %v5219_v0, %v5245_v36  ;;  %v1843_v33 = vsub.f32 %v5241_v20, %v5247_v48  ;;  %v1255_v23 = vld [vmem:[%s7209_s2 + $0x1de] sm:$0x3] }
  0xea   :  { %v1323_v46 = vld [vmem:[%s7209_s2 + $0x266] sm:$0x3]  ;;  %v1331_v15 = vld [vmem:[%s7209_s2 + $0x276] sm:$0x3]  ;;  %2272 = vrot.lane.b32.xlu0 %v2208_v27, %s2528_s10  ;;  %v1611_v4 = vadd.f32 %v1315_v47, %v1307_v21  ;;  %v1923_v20 = vmul.f32 0.5, %v1795_v19  ;;  %v1939_v36 = vmul.f32 0.5, %v1811_v18 }
  0xeb   :  { %v1339_v6 = vld [vmem:[%s7209_s2 + $0x286] sm:$0x3]  ;;  %v1347_v59 = vld [vmem:[%s7209_s2 + $0x296] sm:$0x3]  ;;  %v1619_v13 = vadd.f32 %v1331_v15, %v1323_v46  ;;  %v393_v48 = vpop.permute.xlu0 %392  ;;  %v1271_v49 = vld [vmem:[%s7209_s2 + $0x1fe] sm:$0x3] }
  0xec   :  { %v1355_v39 = vld [vmem:[%s7209_s2 + $0x2a6] sm:$0x3]  ;;  %v1363_v3 = vld [vmem:[%s7209_s2 + $0x2b6] sm:$0x3]  ;;  %v1723_v11 = vadd.f32 %v1347_v59, %v1339_v6  ;;  %2437 = vst.msk [vmem:[%s7207_s3 + $0xc4] sm:$0xff] %vm367_vm1, %v393_v48 }
  0xed   :  { %v1371_v43 = vld [vmem:[%s7209_s2 + $0x2c6] sm:$0x3]  ;;  %v1379_v38 = vld [vmem:[%s7209_s2 + $0x2d6] sm:$0x3]  ;;  %v1731_v28 = vadd.f32 %v1363_v3, %v1355_v39  ;;  %v395_v39 = vpop.permute.xlu1 %394  ;;  %v1146_v48 = vld [vmem:[%s7209_s2 + $0x104] sm:$0x3] }
  0xee   :  { %v1387_v55 = vld [vmem:[%s7209_s2 + $0x2e6] sm:$0x3]  ;;  %v1395_v34 = vld [vmem:[%s7209_s2 + $0x2f6] sm:$0x3]  ;;  %v1739_v14 = vadd.f32 %v1379_v38, %v1371_v43  ;;  %v1851_v31 = vsub.f32 %v5243_v42, %v1723_v11  ;;  %v1931_v42 = vmul.f32 0.5, %v1803_v52  ;;  %2438 = vst.msk [vmem:[%s7207_s3 + $0xd4] sm:$0xff] %vm367_vm1, %v395_v39 }
  0xef   :  { %v1403_v1 = vld [vmem:[%s7209_s2 + $0x306] sm:$0x3]  ;;  %v1411_v25 = vld [vmem:[%s7209_s2 + $0x316] sm:$0x3]  ;;  %v1747_v54 = vadd.f32 %v1395_v34, %v1387_v55  ;;  %v1859_v29 = vsub.f32 %v1603_v12, %v1731_v28  ;;  %v1947_v12 = vmul.f32 0.5, %v1819_v16  ;;  %v1955_v11 = vmul.f32 0.5, %v1827_v7 }
  0xf0   :  { %v1419_v2 = vld [vmem:[%s7209_s2 + $0x326] sm:$0x3]  ;;  %v1427_v57 = vld [vmem:[%s7209_s2 + $0x336] sm:$0x3]  ;;  %v1627_v10 = vadd.f32 %v1411_v25, %v1403_v1  ;;  %v1867_v37 = vsub.f32 %v1611_v4, %v1739_v14  ;;  %v1963_v28 = vmul.f32 0.5, %v1835_v56  ;;  %v1971_v1 = vmul.f32 0.5, %v1843_v33 }
  0xf1   :  { %v1435_v32 = vld [vmem:[%s7209_s2 + $0x346] sm:$0x3]  ;;  %v1443_v5 = vld [vmem:[%s7209_s2 + $0x356] sm:$0x3]  ;;  %v1635_v63 = vadd.f32 %v1427_v57, %v1419_v2  ;;  %v1875_v51 = vsub.f32 %v1619_v13, %v1747_v54  ;;  %v1979_v2 = vmul.f32 0.5, %v1851_v31  ;;  %v1987_v13 = vmul.f32 0.5, %v1859_v29 }
  0xf2   :  { %v1451_v24 = vld [vmem:[%s7209_s2 + $0x366] sm:$0x3]  ;;  %v1459_v45 = vld [vmem:[%s7209_s2 + $0x376] sm:$0x3]  ;;  %v1643_v46 = vadd.f32 %v1443_v5, %v1435_v32  ;;  %v1995_v14 = vmul.f32 0.5, %v1867_v37  ;;  %v2043_v5 = vadd.f32 %v1923_v20, %v5204_v35  ;;  %v2051_v52 = vadd.f32 %v1939_v36, %v1931_v42 }
  0xf3   :  { %v1467_v21 = vld [vmem:[%s7209_s2 + $0x386] sm:$0x3]  ;;  %v1475_v27 = vld [vmem:[%s7209_s2 + $0x396] sm:$0x3]  ;;  %v1651_v0 = vadd.f32 %v1459_v45, %v1451_v24  ;;  %v2003_v54 = vmul.f32 0.5, %v1875_v51  ;;  %v2059_v18 = vadd.f32 %v1987_v13, %v1979_v2  ;;  %v2075_v44 = vadd.f32 %v1955_v11, %v1947_v12 }
  0xf4   :  { %v1483_v61 = vld [vmem:[%s7209_s2 + $0x3a6] sm:$0x3]  ;;  %v1491_v47 = vld [vmem:[%s7209_s2 + $0x3b6] sm:$0x3]  ;;  %v1755_v26 = vadd.f32 %v1475_v27, %v1467_v21  ;;  %v1018_v16 = vld [vmem:[%s7209_s2 + $0x4] sm:$0x3]  ;;  %v2083_v24 = vadd.f32 %v1971_v1, %v1963_v28 }
  0xf5   :  { %v1499_v15 = vld [vmem:[%s7209_s2 + $0x3c6] sm:$0x3]  ;;  %v1507_v6 = vld [vmem:[%s7209_s2 + $0x3d6] sm:$0x3]  ;;  %v1763_v58 = vadd.f32 %v1491_v47, %v1483_v61  ;;  %v2067_v7 = vadd.f32 %v2003_v54, %v1995_v14  ;;  %v1026_v21 = vld [vmem:[%s7209_s2 + $0x14] sm:$0x3]  ;;  %v2107_v56 = vsub.f32 %v2043_v5, %v2075_v44 }
  0xf6   :  { %v1515_v59 = vld [vmem:[%s7209_s2 + $0x3e6] sm:$0x3]  ;;  %v1523_v3 = vld [vmem:[%s7209_s2 + $0x3f6] sm:$0x3]  ;;  %v1771_v43 = vadd.f32 %v1507_v6, %v1499_v15  ;;  %v1883_v55 = vsub.f32 %v1627_v10, %v1755_v26  ;;  %v1082_v10 = vld [vmem:[%s7209_s2 + $0x84] sm:$0x3]  ;;  %v2115_v33 = vsub.f32 %v2051_v52, %v2083_v24 }
  0xf7   :  { %v1779_v38 = vadd.f32 %v1523_v3, %v1515_v59  ;;  %v1891_v34 = vsub.f32 %v1635_v63, %v1763_v58  ;;  %v1090_v35 = vld [vmem:[%s7209_s2 + $0x94] sm:$0x3]  ;;  %v1034_v61 = vld [vmem:[%s7209_s2 + $0x24] sm:$0x3]  ;;  %v1530_v59 = vadd.f32 %v1026_v21, %v1018_v16  ;;  %v5371_v26 = vmul.f32 0.5, %v2107_v56 }
  0xf8   :  { %v1899_v4 = vsub.f32 %v1643_v46, %v1771_v43  ;;  %v2011_v19 = vmul.f32 0.5, %v1883_v55  ;;  %v1042_v47 = vld [vmem:[%s7209_s2 + $0x34] sm:$0x3]  ;;  %v1050_v31 = vld [vmem:[%s7209_s2 + $0x44] sm:$0x3]  ;;  %v5373_v58 = vmul.f32 0.5, %v2115_v33 }
  0xf9   :  { %v1907_v25 = vsub.f32 %v1651_v0, %v1779_v38  ;;  %v2019_v40 = vmul.f32 0.5, %v1891_v34  ;;  %v1058_v29 = vld [vmem:[%s7209_s2 + $0x54] sm:$0x3]  ;;  %v1098_v37 = vld [vmem:[%s7209_s2 + $0xa4] sm:$0x3]  ;;  %v1658_v0 = vadd.f32 %v1090_v35, %v1082_v10  ;;  %v5432_v14 = vadd.f32 %v1042_v47, %v1034_v61 }
  0xfa   :  { %v2027_v57 = vmul.f32 0.5, %v1899_v4  ;;  %v1106_v15 = vld [vmem:[%s7209_s2 + $0xb4] sm:$0x3]  ;;  %v1114_v6 = vld [vmem:[%s7209_s2 + $0xc4] sm:$0x3]  ;;  %v5405_v34 = vadd.f32 %v5373_v58, %v5371_v26 }
  0xfb   :  { %v2035_v32 = vmul.f32 0.5, %v1907_v25  ;;  %v2091_v45 = vadd.f32 %v2019_v40, %v2011_v19  ;;  %v1122_v39 = vld [vmem:[%s7209_s2 + $0xd4] sm:$0x3]  ;;  %v1066_v43 = vld [vmem:[%s7209_s2 + $0x64] sm:$0x3]  ;;  %v5434_v54 = vadd.f32 %v1106_v15, %v1098_v37  ;;  %v1786_v19 = vsub.f32 %v1530_v59, %v1658_v0 }
  0xfc   :  { %v1074_v20 = vld [vmem:[%s7209_s2 + $0x74] sm:$0x3]  ;;  %v1130_v42 = vld [vmem:[%s7209_s2 + $0xe4] sm:$0x3]  ;;  %v5453_v16 = vadd.f32 %v1122_v39, %v1114_v6 }
  0xfd   :  { %v2099_v63 = vadd.f32 %v2035_v32, %v2027_v57  ;;  %v2123_v27 = vsub.f32 %v2059_v18, %v2091_v45  ;;  %v1138_v36 = vld [vmem:[%s7209_s2 + $0xf4] sm:$0x3]  ;;  %v1162_v55 = vld [vmem:[%s7209_s2 + $0x124] sm:$0x3]  ;;  %v5451_v18 = vadd.f32 %v1058_v29, %v1050_v31  ;;  %v1794_v29 = vsub.f32 %v5432_v14, %v5434_v54 }
  0xfe   :  { %v1154_v38 = vld [vmem:[%s7209_s2 + $0x114] sm:$0x3]  ;;  %v1178_v4 = vld [vmem:[%s7209_s2 + $0x144] sm:$0x3]  ;;  %v5493_v37 = vmul.f32 0.5, %v1786_v19 }
  0xff   :  { %v2131_v46 = vsub.f32 %v2067_v7, %v2099_v63  ;;  %v5375_v51 = vmul.f32 0.5, %v2123_v27  ;;  %v1170_v12 = vld [vmem:[%s7209_s2 + $0x134] sm:$0x3]  ;;  %v1210_v1 = vld [vmem:[%s7209_s2 + $0x184] sm:$0x3]  ;;  %v5475_v63 = vadd.f32 %v1074_v20, %v1066_v43  ;;  %v5477_v56 = vadd.f32 %v1154_v38, %v1146_v48 }
 0x100   :  { %v1186_v11 = vld [vmem:[%s7209_s2 + $0x154] sm:$0x3]  ;;  %v1226_v2 = vld [vmem:[%s7209_s2 + $0x1a4] sm:$0x3]  ;;  %v5479_v33 = vadd.f32 %v1170_v12, %v1162_v55  ;;  %v5481_v27 = vadd.f32 %v1138_v36, %v1130_v42  ;;  %v1802_v20 = vsub.f32 %v5451_v18, %v5453_v16 }
 0x101   :  { %v5380_v3 = vmul.f32 0.5, %v2131_v46  ;;  %v1218_v25 = vld [vmem:[%s7209_s2 + $0x194] sm:$0x3]  ;;  %v1194_v40 = vld [vmem:[%s7209_s2 + $0x164] sm:$0x3]  ;;  %v5489_v31 = vadd.f32 %v1186_v11, %v1178_v4 }
 0x102   :  { %v1234_v13 = vld [vmem:[%s7209_s2 + $0x1b4] sm:$0x3]  ;;  %v1242_v32 = vld [vmem:[%s7209_s2 + $0x1c4] sm:$0x3]  ;;  %v5504_v0 = vadd.f32 %v1218_v25, %v1210_v1  ;;  %v1810_v16 = vsub.f32 %v5475_v63, %v5481_v27 }
 0x103   :  { %v5418_v28 = vadd.f32 %v5380_v3, %v5375_v51  ;;  %v1202_v57 = vld [vmem:[%s7209_s2 + $0x174] sm:$0x3]  ;;  %v1258_v52 = vld [vmem:[%s7209_s2 + $0x1e4] sm:$0x3]  ;;  %v5506_v39 = vadd.f32 %v1234_v13, %v1226_v2 }
 0x104   :  { %v1250_v5 = vld [vmem:[%s7209_s2 + $0x1d4] sm:$0x3]  ;;  %v1274_v24 = vld [vmem:[%s7209_s2 + $0x204] sm:$0x3]  ;;  %v5522_v38 = vadd.f32 %v1202_v57, %v1194_v40 }
 0x105   :  { %v2203_v7 = vadd.f32 %v5418_v28, %v5405_v34  ;;  %v1266_v44 = vld [vmem:[%s7209_s2 + $0x1f4] sm:$0x3]  ;;  %v1290_v21 = vld [vmem:[%s7209_s2 + $0x224] sm:$0x3]  ;;  %v5508_v43 = vadd.f32 %v1250_v5, %v1242_v32  ;;  %v1826_v63 = vsub.f32 %v5479_v33, %v5506_v39 }
 0x106   :  { %v1282_v45 = vld [vmem:[%s7209_s2 + $0x214] sm:$0x3]  ;;  %v1306_v35 = vld [vmem:[%s7209_s2 + $0x244] sm:$0x3]  ;;  %v5526_v12 = vadd.f32 %v1266_v44, %v1258_v52  ;;  %v397_v44 = vpop.permute.xlu0 %396 }
 0x107   :  { %v1298_v10 = vld [vmem:[%s7209_s2 + $0x234] sm:$0x3]  ;;  %v2211_v61 = vmul.f32 0.5, %v2203_v7  ;;  %v1322_v46 = vld [vmem:[%s7209_s2 + $0x264] sm:$0x3]  ;;  %v5524_v55 = vadd.f32 %v1282_v45, %v1274_v24  ;;  %v399_v7 = vpop.permute.xlu1 %398  ;;  %v1834_v27 = vsub.f32 %v5489_v31, %v5508_v43  ;;  %2439 = vst.msk [vmem:[%s7207_s3 + $0xe4] sm:$0xff] %vm367_vm1, %v397_v44 }
 0x108   :  { %v1314_v47 = vld [vmem:[%s7209_s2 + $0x254] sm:$0x3]  ;;  %v1338_v6 = vld [vmem:[%s7209_s2 + $0x284] sm:$0x3]  ;;  %v1602_v2 = vadd.f32 %v1298_v10, %v1290_v21  ;;  %2440 = vst.msk [vmem:[%s7207_s3 + $0xf4] sm:$0xff] %vm367_vm1, %v399_v7 }
 0x109   :  { %v1330_v15 = vld [vmem:[%s7209_s2 + $0x274] sm:$0x3]  ;;  %2278 = vrot.lane.b32.xlu1 %v2211_v61, %s2528_s10  ;;  %v1354_v42 = vld [vmem:[%s7209_s2 + $0x2a4] sm:$0x3]  ;;  %v1610_v13 = vadd.f32 %v1314_v47, %v1306_v35  ;;  %v1818_v35 = vsub.f32 %v5477_v56, %v5504_v0  ;;  %v1962_v14 = vmul.f32 0.5, %v1834_v27 }
 0x10a   :  { %v1346_v59 = vld [vmem:[%s7209_s2 + $0x294] sm:$0x3]  ;;  %v1370_v48 = vld [vmem:[%s7209_s2 + $0x2c4] sm:$0x3]  ;;  %v5539_v19 = vadd.f32 %v1330_v15, %v1322_v46  ;;  %v1842_v15 = vsub.f32 %v5522_v38, %v5526_v12  ;;  %v1252_v24 = vld [vmem:[%s7209_s2 + $0x1d8] sm:$0x3] }
 0x10b   :  { %v1362_v36 = vld [vmem:[%s7209_s2 + $0x2b4] sm:$0x3]  ;;  %v5528_v4 = vadd.f32 %v1346_v59, %v1338_v6  ;;  %v1386_v1 = vld [vmem:[%s7209_s2 + $0x2e4] sm:$0x3]  ;;  %v1946_v44 = vmul.f32 0.5, %v1818_v35 }
 0x10c   :  { %v1378_v11 = vld [vmem:[%s7209_s2 + $0x2d4] sm:$0x3]  ;;  %v1730_v40 = vadd.f32 %v1362_v36, %v1354_v42  ;;  %v1402_v57 = vld [vmem:[%s7209_s2 + $0x304] sm:$0x3]  ;;  %v1970_v54 = vmul.f32 0.5, %v1842_v15 }
 0x10d   :  { %v1394_v25 = vld [vmem:[%s7209_s2 + $0x2f4] sm:$0x3]  ;;  %v1418_v5 = vld [vmem:[%s7209_s2 + $0x324] sm:$0x3]  ;;  %v1738_v52 = vadd.f32 %v1378_v11, %v1370_v48  ;;  %v1850_v6 = vsub.f32 %v5524_v55, %v5528_v4  ;;  %v1029_v15 = vld [vmem:[%s7209_s2 + $0x1a] sm:$0x3] }
 0x10e   :  { %v1410_v32 = vld [vmem:[%s7209_s2 + $0x314] sm:$0x3]  ;;  %v1746_v18 = vadd.f32 %v1394_v25, %v1386_v1  ;;  %v1434_v21 = vld [vmem:[%s7209_s2 + $0x344] sm:$0x3]  ;;  %v1858_v42 = vsub.f32 %v1602_v2, %v1730_v40  ;;  %v428_v25 = vpop.permute.xlu1 %427  ;;  %v426_v2 = vpop.permute.xlu0 %425 }
 0x10f   :  { %v1426_v45 = vld [vmem:[%s7209_s2 + $0x334] sm:$0x3]  ;;  %v1450_v56 = vld [vmem:[%s7209_s2 + $0x364] sm:$0x3]  ;;  %v1626_v46 = vadd.f32 %v1410_v32, %v1402_v57  ;;  %v1866_v36 = vsub.f32 %v1610_v13, %v1738_v52  ;;  %v1922_v57 = vmul.f32 0.5, %v1794_v29  ;;  %v1930_v32 = vmul.f32 0.5, %v1802_v20 }
 0x110   :  { %v1442_v10 = vld [vmem:[%s7209_s2 + $0x354] sm:$0x3]  ;;  %v1466_v47 = vld [vmem:[%s7209_s2 + $0x384] sm:$0x3]  ;;  %v1634_v31 = vadd.f32 %v1426_v45, %v1418_v5  ;;  %v1874_v48 = vsub.f32 %v5539_v19, %v1746_v18  ;;  %v1938_v5 = vmul.f32 0.5, %v1810_v16  ;;  %2442 = vst.msk [vmem:[%s7207_s3 + $0x114] sm:$0xff] %vm367_vm1, %v428_v25 }
 0x111   :  { %v1458_v33 = vld [vmem:[%s7209_s2 + $0x374] sm:$0x3]  ;;  %v1482_v0 = vld [vmem:[%s7209_s2 + $0x3a4] sm:$0x3]  ;;  %v1642_v43 = vadd.f32 %v1442_v10, %v1434_v21  ;;  %2441 = vst.msk [vmem:[%s7207_s3 + $0x104] sm:$0xff] %vm367_vm1, %v426_v2  ;;  %v1954_v21 = vmul.f32 0.5, %v1826_v63  ;;  %v2042_v63 = vadd.f32 %v1922_v57, %v5493_v37 }
 0x112   :  { %v1474_v59 = vld [vmem:[%s7209_s2 + $0x394] sm:$0x3]  ;;  %v1498_v38 = vld [vmem:[%s7209_s2 + $0x3c4] sm:$0x3]  ;;  %v1650_v4 = vadd.f32 %v1458_v33, %v1450_v56  ;;  %v1978_v20 = vmul.f32 0.5, %v1850_v6  ;;  %v1986_v16 = vmul.f32 0.5, %v1858_v42  ;;  %v432_v56 = vpop.permute.xlu1 %431  ;;  %v430_v33 = vpop.permute.xlu0 %429  ;;  %v2050_v27 = vadd.f32 %v1938_v5, %v1930_v32 }
 0x113   :  { %v1490_v39 = vld [vmem:[%s7209_s2 + $0x3b4] sm:$0x3]  ;;  %v1514_v12 = vld [vmem:[%s7209_s2 + $0x3e4] sm:$0x3]  ;;  %v1754_v11 = vadd.f32 %v1474_v59, %v1466_v47  ;;  %v1994_v10 = vmul.f32 0.5, %v1866_v36  ;;  %v2002_v47 = vmul.f32 0.5, %v1874_v48  ;;  %v2082_v42 = vadd.f32 %v1970_v54, %v1962_v14 }
 0x114   :  { %v1506_v55 = vld [vmem:[%s7209_s2 + $0x3d4] sm:$0x3]  ;;  %v1762_v1 = vadd.f32 %v1490_v39, %v1482_v0  ;;  %2444 = vst.msk [vmem:[%s7207_s3 + $0x134] sm:$0xff] %vm367_vm1, %v432_v56  ;;  %2443 = vst.msk [vmem:[%s7207_s3 + $0x124] sm:$0xff] %vm367_vm1, %v430_v33  ;;  %v1037_v48 = vld [vmem:[%s7209_s2 + $0x2a] sm:$0x3] }
 0x115   :  { %v1522_v19 = vld [vmem:[%s7209_s2 + $0x3f4] sm:$0x3]  ;;  %v1770_v40 = vadd.f32 %v1506_v55, %v1498_v38  ;;  %v1882_v18 = vsub.f32 %v1626_v46, %v1754_v11  ;;  %v2058_v46 = vadd.f32 %v1986_v16, %v1978_v20  ;;  %v2066_v6 = vadd.f32 %v2002_v47, %v1994_v10  ;;  %v1045_v37 = vld [vmem:[%s7209_s2 + $0x3a] sm:$0x3]  ;;  %v1085_v38 = vld [vmem:[%s7209_s2 + $0x8a] sm:$0x3] }
 0x116   :  { %v1778_v52 = vadd.f32 %v1522_v19, %v1514_v12  ;;  %v1890_v7 = vsub.f32 %v1634_v31, %v1762_v1  ;;  %v1021_v31 = vld [vmem:[%s7209_s2 + $0xa] sm:$0x3]  ;;  %v1093_v55 = vld [vmem:[%s7209_s2 + $0x9a] sm:$0x3]  ;;  %v436_v25 = vpop.permute.xlu1 %435  ;;  %v434_v2 = vpop.permute.xlu0 %433  ;;  %v1244_v13 = vld [vmem:[%s7209_s2 + $0x1c8] sm:$0x3] }
 0x117   :  { %v1898_v45 = vsub.f32 %v1642_v43, %v1770_v40  ;;  %v2010_v59 = vmul.f32 0.5, %v1882_v18  ;;  %v2074_v43 = vadd.f32 %v1954_v21, %v1946_v44  ;;  %v1061_v11 = vld [vmem:[%s7209_s2 + $0x5a] sm:$0x3]  ;;  %v1101_v1 = vld [vmem:[%s7209_s2 + $0xaa] sm:$0x3]  ;;  %v2114_v40 = vsub.f32 %v2050_v27, %v2082_v42  ;;  %2446 = vst.msk [vmem:[%s7207_s3 + $0x154] sm:$0xff] %vm367_vm1, %v436_v25 }
 0x118   :  { %v1906_v29 = vsub.f32 %v1650_v4, %v1778_v52  ;;  %v2018_v0 = vmul.f32 0.5, %v1890_v7  ;;  %v1053_v4 = vld [vmem:[%s7209_s2 + $0x4a] sm:$0x3]  ;;  %v1109_v32 = vld [vmem:[%s7209_s2 + $0xba] sm:$0x3]  ;;  %2445 = vst.msk [vmem:[%s7207_s3 + $0x144] sm:$0xff] %vm367_vm1, %v434_v2  ;;  %v1533_v54 = vadd.f32 %v1029_v15, %v1021_v31 }
 0x119   :  { %v2026_v39 = vmul.f32 0.5, %v1898_v45  ;;  %v2106_v19 = vsub.f32 %v2042_v63, %v2074_v43  ;;  %v1117_v5 = vld [vmem:[%s7209_s2 + $0xca] sm:$0x3]  ;;  %v1125_v52 = vld [vmem:[%s7209_s2 + $0xda] sm:$0x3]  ;;  %v5697_v16 = vmul.f32 0.5, %v2114_v40  ;;  %v5733_v43 = vadd.f32 %v1061_v11, %v1053_v4 }
 0x11a   :  { %v2034_v35 = vmul.f32 0.5, %v1906_v29  ;;  %v2090_v36 = vadd.f32 %v2018_v0, %v2010_v59  ;;  %v1069_v7 = vld [vmem:[%s7209_s2 + $0x6a] sm:$0x3]  ;;  %v1077_v44 = vld [vmem:[%s7209_s2 + $0x7a] sm:$0x3]  ;;  %v1661_v29 = vadd.f32 %v1093_v55, %v1085_v38  ;;  %v440_v63 = vpop.permute.xlu1 %439  ;;  %v438_v27 = vpop.permute.xlu0 %437  ;;  %v5735_v42 = vadd.f32 %v1109_v32, %v1101_v1 }
 0x11b   :  { %v1149_v45 = vld [vmem:[%s7209_s2 + $0x10a] sm:$0x3]  ;;  %v1157_v21 = vld [vmem:[%s7209_s2 + $0x11a] sm:$0x3]  ;;  %v5695_v20 = vmul.f32 0.5, %v2106_v19  ;;  %2448 = vst.msk [vmem:[%s7207_s3 + $0x174] sm:$0xff] %vm367_vm1, %v440_v63  ;;  %v5769_v25 = vadd.f32 %v1077_v44, %v1069_v7  ;;  %v5777_v40 = vsub.f32 %v5050_v17, %v5052_v62  ;;  %v5796_v62 = vsub.f32 %v5054_v22, %v5067_v9 }
 0x11c   :  { %v2098_v12 = vadd.f32 %v2034_v35, %v2026_v39  ;;  %v2122_v57 = vsub.f32 %v2058_v46, %v2090_v36  ;;  %v1165_v14 = vld [vmem:[%s7209_s2 + $0x12a] sm:$0x3]  ;;  %v1141_v33 = vld [vmem:[%s7209_s2 + $0xfa] sm:$0x3]  ;;  %v5718_v35 = vadd.f32 %v1045_v37, %v1037_v48  ;;  %v5737_v36 = vadd.f32 %v1125_v52, %v1117_v5  ;;  %2447 = vst.msk [vmem:[%s7207_s3 + $0x164] sm:$0xff] %vm367_vm1, %v438_v27 }
 0x11d   :  { %v1133_v56 = vld [vmem:[%s7209_s2 + $0xea] sm:$0x3]  ;;  %v1173_v47 = vld [vmem:[%s7209_s2 + $0x13a] sm:$0x3]  ;;  %v5722_v46 = vadd.f32 %v5697_v16, %v5695_v20  ;;  %v5771_v2 = vadd.f32 %v1157_v21, %v1149_v45  ;;  %7249 = vst [vmem:[#allocation5_spill] sm:$0xff] %v5777_v40  ;;  %7250 = vst [vmem:[#allocation6_spill] sm:$0xff] %v5796_v62 }
 0x11e   :  { %v2130_v18 = vsub.f32 %v2066_v6, %v2098_v12  ;;  %v5699_v10 = vmul.f32 0.5, %v2122_v57  ;;  %v1181_v0 = vld [vmem:[%s7209_s2 + $0x14a] sm:$0x3]  ;;  %v1189_v39 = vld [vmem:[%s7209_s2 + $0x15a] sm:$0x3]  ;;  %v1789_v12 = vsub.f32 %v1533_v54, %v1661_v29  ;;  %v5773_v19 = vadd.f32 %v1173_v47, %v1165_v14  ;;  %v469_v7 = vpop.permute.xlu1 %468  ;;  %v467_v44 = vpop.permute.xlu0 %466 }
 0x11f   :  { %7247 = vst [vmem:[#allocation7_spill] sm:$0xff] %v5722_v46  ;;  %v1197_v31 = vld [vmem:[%s7209_s2 + $0x16a] sm:$0x3]  ;;  %v1205_v15 = vld [vmem:[%s7209_s2 + $0x17a] sm:$0x3]  ;;  %v5807_v54 = vadd.f32 %v1189_v39, %v1181_v0  ;;  %v1797_v22 = vsub.f32 %v5718_v35, %v5735_v42  ;;  %v1805_v9 = vsub.f32 %v5733_v43, %v5737_v36  ;;  %2450 = vst.msk [vmem:[%s7207_s3 + $0x194] sm:$0xff] %vm367_vm1, %v469_v7 }
 0x120   :  { %v5710_v59 = vmul.f32 0.5, %v2130_v18  ;;  %v1213_v6 = vld [vmem:[%s7209_s2 + $0x18a] sm:$0x3]  ;;  %v1221_v37 = vld [vmem:[%s7209_s2 + $0x19a] sm:$0x3]  ;;  %v5790_v18 = vadd.f32 %v1141_v33, %v1133_v56  ;;  %v5809_v29 = vadd.f32 %v1205_v15, %v1197_v31  ;;  %2449 = vst.msk [vmem:[%s7207_s3 + $0x184] sm:$0xff] %vm367_vm1, %v467_v44 }
 0x121   :  { %v1229_v38 = vld [vmem:[%s7209_s2 + $0x1aa] sm:$0x3]  ;;  %v1237_v55 = vld [vmem:[%s7209_s2 + $0x1ba] sm:$0x3]  ;;  %v5829_v0 = vadd.f32 %v1221_v37, %v1213_v6  ;;  %v5833_v63 = vmul.f32 0.5, %v1789_v12 }
 0x122   :  { %v5749_v48 = vadd.f32 %v5710_v59, %v5699_v10  ;;  %v1245_v4 = vld [vmem:[%s7209_s2 + $0x1ca] sm:$0x3]  ;;  %v1253_v11 = vld [vmem:[%s7209_s2 + $0x1da] sm:$0x3]  ;;  %v5831_v39 = vadd.f32 %v1237_v55, %v1229_v38  ;;  %v5852_v38 = vadd.f32 %v5796_v62, %v5777_v40  ;;  %v471_v7 = vpop.permute.xlu0 %470  ;;  %v1316_v62 = vld [vmem:[%s7209_s2 + $0x258] sm:$0x3] }
 0x123   :  { %v1261_v1 = vld [vmem:[%s7209_s2 + $0x1ea] sm:$0x3]  ;;  %v1269_v32 = vld [vmem:[%s7209_s2 + $0x1fa] sm:$0x3]  ;;  %v5846_v6 = vadd.f32 %v1253_v11, %v1245_v4  ;;  %2451 = vst.msk [vmem:[%s7207_s3 + $0x1a4] sm:$0xff] %vm367_vm1, %v471_v7 }
 0x124   :  { %7248 = vst [vmem:[#allocation3_spill] sm:$0xff] %v5749_v48  ;;  %v2202_v57 = vadd.f32 %v5749_v48, %v5722_v46  ;;  %v1277_v5 = vld [vmem:[%s7209_s2 + $0x20a] sm:$0x3]  ;;  %v1285_v52 = vld [vmem:[%s7209_s2 + $0x21a] sm:$0x3]  ;;  %v5848_v37 = vadd.f32 %v1269_v32, %v1261_v1  ;;  %7251 = vst [vmem:[#allocation8_spill] sm:$0xff] %v5852_v38  ;;  %v5870_v32 = vsub.f32 %v5371_v26, %v5373_v58 }
 0x125   :  { %v1293_v45 = vld [vmem:[%s7209_s2 + $0x22a] sm:$0x3]  ;;  %v1301_v21 = vld [vmem:[%s7209_s2 + $0x23a] sm:$0x3]  ;;  %v1276_v38 = vld [vmem:[%s7209_s2 + $0x208] sm:$0x3] }
 0x126   :  { %v1309_v14 = vld [vmem:[%s7209_s2 + $0x24a] sm:$0x3]  ;;  %v2210_v56 = vmul.f32 0.5, %v2202_v57  ;;  %v1317_v33 = vld [vmem:[%s7209_s2 + $0x25a] sm:$0x3]  ;;  %v5844_v57 = vadd.f32 %v1285_v52, %v1277_v5  ;;  %v5864_v11 = vadd.f32 %v1301_v21, %v1293_v45  ;;  %7252 = vst [vmem:[#allocation9_spill] sm:$0xff] %v5870_v32  ;;  %v5874_v5 = vsub.f32 %v5375_v51, %v5380_v3  ;;  %v473_v52 = vpop.permute.xlu1 %472 }
 0x127   :  { %v1325_v47 = vld [vmem:[%s7209_s2 + $0x26a] sm:$0x3]  ;;  %v1333_v27 = vld [vmem:[%s7209_s2 + $0x27a] sm:$0x3]  ;;  %v5866_v1 = vadd.f32 %v1317_v33, %v1309_v14  ;;  %v5891_v51 = vsub.f32 %v5695_v20, %v5697_v16  ;;  %v5895_v3 = vsub.f32 %v5699_v10, %v5710_v59  ;;  %2452 = vst.msk [vmem:[%s7207_s3 + $0x1b4] sm:$0xff] %vm367_vm1, %v473_v52 }
 0x128   :  { %v1341_v31 = vld [vmem:[%s7209_s2 + $0x28a] sm:$0x3]  ;;  %v1349_v15 = vld [vmem:[%s7209_s2 + $0x29a] sm:$0x3]  ;;  %2276 = vrot.lane.b32.xlu0 %v2210_v56, %s2528_s10  ;;  %7253 = vst [vmem:[#allocation10_spill] sm:$0xff] %v5874_v5  ;;  %v1621_v10 = vadd.f32 %v1333_v27, %v1325_v47  ;;  %v5916_v33 = vadd.f32 %v5874_v5, %v5870_v32  ;;  %v1813_v47 = vsub.f32 %v5769_v25, %v5790_v18 }
 0x129   :  { %v1357_v55 = vld [vmem:[%s7209_s2 + $0x2aa] sm:$0x3]  ;;  %v1365_v12 = vld [vmem:[%s7209_s2 + $0x2ba] sm:$0x3]  ;;  %v5885_v26 = vadd.f32 %v1349_v15, %v1341_v31  ;;  %7254 = vst [vmem:[#allocation11_spill] sm:$0xff] %v5891_v51  ;;  %7255 = vst [vmem:[#allocation12_spill] sm:$0xff] %v5895_v3  ;;  %v1821_v27 = vsub.f32 %v5771_v2, %v5829_v0  ;;  %v1845_v0 = vsub.f32 %v5809_v29, %v5848_v37 }
 0x12a   :  { %v1373_v4 = vld [vmem:[%s7209_s2 + $0x2ca] sm:$0x3]  ;;  %v1381_v44 = vld [vmem:[%s7209_s2 + $0x2da] sm:$0x3]  ;;  %v5887_v58 = vadd.f32 %v1365_v12, %v1357_v55  ;;  %7256 = vst [vmem:[#allocation13_spill] sm:$0xff] %v5916_v33  ;;  %v1829_v12 = vsub.f32 %v5773_v19, %v5831_v39  ;;  %v1837_v19 = vsub.f32 %v5807_v54, %v5846_v6  ;;  %v477_v39 = vpop.permute.xlu1 %476 }
 0x12b   :  { %v1389_v45 = vld [vmem:[%s7209_s2 + $0x2ea] sm:$0x3]  ;;  %v1397_v21 = vld [vmem:[%s7209_s2 + $0x2fa] sm:$0x3]  ;;  %v1741_v59 = vadd.f32 %v1381_v44, %v1373_v4  ;;  %v5935_v4 = vadd.f32 %v5895_v3, %v5891_v51  ;;  %v475_v44 = vpop.permute.xlu0 %474  ;;  %v1853_v54 = vsub.f32 %v5844_v57, %v5885_v26  ;;  %2454 = vst.msk [vmem:[%s7207_s3 + $0x1d4] sm:$0xff] %vm367_vm1, %v477_v39  ;;  %v1941_v39 = vmul.f32 0.5, %v1813_v47 }
 0x12c   :  { %v1405_v14 = vld [vmem:[%s7209_s2 + $0x30a] sm:$0x3]  ;;  %v1413_v20 = vld [vmem:[%s7209_s2 + $0x31a] sm:$0x3]  ;;  %v1749_v56 = vadd.f32 %v1397_v21, %v1389_v45  ;;  %v1861_v29 = vsub.f32 %v5864_v11, %v5887_v58  ;;  %2453 = vst.msk [vmem:[%s7207_s3 + $0x1c4] sm:$0xff] %vm367_vm1, %v475_v44 }
 0x12d   :  { %v1421_v16 = vld [vmem:[%s7209_s2 + $0x32a] sm:$0x3]  ;;  %v1429_v31 = vld [vmem:[%s7209_s2 + $0x33a] sm:$0x3]  ;;  %7257 = vst [vmem:[#allocation14_spill] sm:$0xff] %v5935_v4  ;;  %v1629_v2 = vadd.f32 %v1413_v20, %v1405_v14  ;;  %v1869_v6 = vsub.f32 %v5866_v1, %v1741_v59  ;;  %v1981_v43 = vmul.f32 0.5, %v1853_v54 }
 0x12e   :  { %v1437_v15 = vld [vmem:[%s7209_s2 + $0x34a] sm:$0x3]  ;;  %v1445_v55 = vld [vmem:[%s7209_s2 + $0x35a] sm:$0x3]  ;;  %v1637_v18 = vadd.f32 %v1429_v31, %v1421_v16  ;;  %v1877_v16 = vsub.f32 %v1621_v10, %v1749_v56  ;;  %v1989_v42 = vmul.f32 0.5, %v1861_v29 }
 0x12f   :  { %v1453_v52 = vld [vmem:[%s7209_s2 + $0x36a] sm:$0x3]  ;;  %v1461_v7 = vld [vmem:[%s7209_s2 + $0x37a] sm:$0x3]  ;;  %v1645_v20 = vadd.f32 %v1445_v55, %v1437_v15  ;;  %v1925_v15 = vmul.f32 0.5, %v1797_v22  ;;  %v1933_v55 = vmul.f32 0.5, %v1805_v9  ;;  %v479_v10 = vpop.permute.xlu0 %478 }
 0x130   :  { %v1469_v25 = vld [vmem:[%s7209_s2 + $0x38a] sm:$0x3]  ;;  %v1477_v45 = vld [vmem:[%s7209_s2 + $0x39a] sm:$0x3]  ;;  %v1653_v1 = vadd.f32 %v1461_v7, %v1453_v52  ;;  %v1949_v7 = vmul.f32 0.5, %v1821_v27  ;;  %2455 = vst.msk [vmem:[%s7207_s3 + $0x1e4] sm:$0xff] %vm367_vm1, %v479_v10 }
 0x131   :  { %v1485_v21 = vld [vmem:[%s7209_s2 + $0x3aa] sm:$0x3]  ;;  %v1493_v14 = vld [vmem:[%s7209_s2 + $0x3ba] sm:$0x3]  ;;  %v1757_v26 = vadd.f32 %v1477_v45, %v1469_v25  ;;  %v481_v25 = vpop.permute.xlu1 %480  ;;  %v1957_v45 = vmul.f32 0.5, %v1829_v12  ;;  %v1997_v36 = vmul.f32 0.5, %v1869_v6 }
 0x132   :  { %v1501_v37 = vld [vmem:[%s7209_s2 + $0x3ca] sm:$0x3]  ;;  %v1509_v57 = vld [vmem:[%s7209_s2 + $0x3da] sm:$0x3]  ;;  %v1765_v58 = vadd.f32 %v1493_v14, %v1485_v21  ;;  %v1965_v21 = vmul.f32 0.5, %v1837_v19  ;;  %v1973_v14 = vmul.f32 0.5, %v1845_v0  ;;  %v2061_v19 = vadd.f32 %v1989_v42, %v1981_v43 }
 0x133   :  { %v1517_v11 = vld [vmem:[%s7209_s2 + $0x3ea] sm:$0x3]  ;;  %v1525_v59 = vld [vmem:[%s7209_s2 + $0x3fa] sm:$0x3]  ;;  %v1773_v31 = vadd.f32 %v1509_v57, %v1501_v37  ;;  %v1885_v17 = vsub.f32 %v1629_v2, %v1757_v26  ;;  %2456 = vst.msk [vmem:[%s7207_s3 + $0x1f4] sm:$0xff] %vm367_vm1, %v481_v25  ;;  %v2005_v22 = vmul.f32 0.5, %v1877_v16  ;;  %v2045_v2 = vadd.f32 %v1925_v15, %v5833_v63  ;;  %v6004_v37 = vpop.permute.xlu0 %859 }
 0x134   :  { %v1781_v44 = vadd.f32 %v1525_v59, %v1517_v11  ;;  %v1893_v52 = vsub.f32 %v1637_v18, %v1765_v58  ;;  %v2053_v18 = vadd.f32 %v1941_v39, %v1933_v55  ;;  %v1020_v0 = vld [vmem:[%s7209_s2 + $0x8] sm:$0x3]  ;;  %v2077_v29 = vadd.f32 %v1957_v45, %v1949_v7  ;;  %v1092_v11 = vld [vmem:[%s7209_s2 + $0x98] sm:$0x3]  ;;  %v1247_v46 = vld [vmem:[%s7209_s2 + $0x1ce] sm:$0x3] }
 0x135   :  { %v1901_v56 = vsub.f32 %v1645_v20, %v1773_v31  ;;  %v2013_v9 = vmul.f32 0.5, %v1885_v17  ;;  %v6002_v20 = vpop.permute.xlu1 %861  ;;  %v2069_v54 = vadd.f32 %v2005_v22, %v1997_v36  ;;  %v2085_v6 = vadd.f32 %v1973_v14, %v1965_v21  ;;  %v1028_v17 = vld [vmem:[%s7209_s2 + $0x18] sm:$0x3]  ;;  %v1084_v63 = vld [vmem:[%s7209_s2 + $0x88] sm:$0x3] }
 0x136   :  { %v1909_v35 = vsub.f32 %v1653_v1, %v1781_v44  ;;  %v2021_v47 = vmul.f32 0.5, %v1893_v52  ;;  %v2109_v26 = vsub.f32 %v2045_v2, %v2077_v29  ;;  %v1036_v59 = vld [vmem:[%s7209_s2 + $0x28] sm:$0x3]  ;;  %v1044_v31 = vld [vmem:[%s7209_s2 + $0x38] sm:$0x3]  ;;  %v1532_v10 = vadd.f32 %v1028_v17, %v1020_v0 }
 0x137   :  { %v2029_v27 = vmul.f32 0.5, %v1901_v56  ;;  %v2117_v58 = vsub.f32 %v2053_v18, %v2085_v6  ;;  %v1052_v55 = vld [vmem:[%s7209_s2 + $0x48] sm:$0x3]  ;;  %v1060_v39 = vld [vmem:[%s7209_s2 + $0x58] sm:$0x3]  ;;  %v1660_v56 = vadd.f32 %v1092_v11, %v1084_v63  ;;  %v6041_v21 = vpop.permute.xlu0 %863 }
 0x138   :  { %v2037_v12 = vmul.f32 0.5, %v1909_v35  ;;  %v2093_v57 = vadd.f32 %v2021_v47, %v2013_v9  ;;  %v1068_v44 = vld [vmem:[%s7209_s2 + $0x68] sm:$0x3]  ;;  %v1076_v52 = vld [vmem:[%s7209_s2 + $0x78] sm:$0x3]  ;;  %v2141_v14 = vmul.f32 0.5, %v2109_v26  ;;  %v6095_v26 = vadd.f32 %v1044_v31, %v1036_v59 }
 0x139   :  { %v1100_v7 = vld [vmem:[%s7209_s2 + $0xa8] sm:$0x3]  ;;  %v1108_v25 = vld [vmem:[%s7209_s2 + $0xb8] sm:$0x3]  ;;  %v6039_v45 = vpop.permute.xlu1 %865  ;;  %v2149_v35 = vmul.f32 0.5, %v2117_v58  ;;  %v1788_v58 = vsub.f32 %v1532_v10, %v1660_v56  ;;  %v6112_v31 = vadd.f32 %v1060_v39, %v1052_v55  ;;  %v6114_v10 = vadd.f32 %v1076_v52, %v1068_v44 }
 0x13a   :  { %v2101_v1 = vadd.f32 %v2037_v12, %v2029_v27  ;;  %v2125_v16 = vsub.f32 %v2061_v19, %v2093_v57  ;;  %v1116_v42 = vld [vmem:[%s7209_s2 + $0xc8] sm:$0x3]  ;;  %v1124_v36 = vld [vmem:[%s7209_s2 + $0xd8] sm:$0x3]  ;;  %v6116_v56 = vadd.f32 %v1108_v25, %v1100_v7  ;;  %2458 = vst.msk [vmem:[%s7207_s3 + $0x216] sm:$0xf] %vm884_vm2, %v6002_v20 }
 0x13b   :  { %v1132_v9 = vld [vmem:[%s7209_s2 + $0xe8] sm:$0x3]  ;;  %v1140_v47 = vld [vmem:[%s7209_s2 + $0xf8] sm:$0x3]  ;;  %v6101_v61 = vpop.permute.xlu0 %867  ;;  %v6131_v39 = vadd.f32 %v1124_v36, %v1116_v42  ;;  %2457 = vst.msk [vmem:[%s7207_s3 + $0x206] sm:$0xf] %vm884_vm2, %v6004_v37 }
 0x13c   :  { %v2133_v15 = vsub.f32 %v2069_v54, %v2101_v1  ;;  %v2157_v43 = vmul.f32 0.5, %v2125_v16  ;;  %v1148_v27 = vld [vmem:[%s7209_s2 + $0x108] sm:$0x3]  ;;  %v1156_v12 = vld [vmem:[%s7209_s2 + $0x118] sm:$0x3]  ;;  %v6073_v54 = vadd.f32 %v2149_v35, %v2141_v14  ;;  %v6097_v16 = vsub.f32 %v2141_v14, %v2149_v35 }
 0x13d   :  { %v1164_v2 = vld [vmem:[%s7209_s2 + $0x128] sm:$0x3]  ;;  %v1172_v18 = vld [vmem:[%s7209_s2 + $0x138] sm:$0x3]  ;;  %v6146_v42 = vadd.f32 %v1156_v12, %v1148_v27  ;;  %v6152_v44 = vadd.f32 %v1140_v47, %v1132_v9  ;;  %v6164_v27 = vmul.f32 0.5, %v1788_v58 }
 0x13e   :  { %v2165_v22 = vmul.f32 0.5, %v2133_v15  ;;  %v1180_v19 = vld [vmem:[%s7209_s2 + $0x148] sm:$0x3]  ;;  %v1188_v0 = vld [vmem:[%s7209_s2 + $0x158] sm:$0x3]  ;;  %7258 = vst [vmem:[#allocation15_spill] sm:$0xff] %v6097_v16  ;;  %v6099_v15 = vpop.permute.xlu1 %869  ;;  %v6148_v36 = vadd.f32 %v1172_v18, %v1164_v2 }
 0x13f   :  { %v1196_v29 = vld [vmem:[%s7209_s2 + $0x168] sm:$0x3]  ;;  %v1204_v6 = vld [vmem:[%s7209_s2 + $0x178] sm:$0x3]  ;;  %v6168_v2 = vpop.permute.xlu0 %871  ;;  %2460 = vst.msk [vmem:[%s7207_s3 + $0x236] sm:$0xf] %vm884_vm2, %v6039_v45 }
 0x140   :  { %v1212_v57 = vld [vmem:[%s7209_s2 + $0x188] sm:$0x3]  ;;  %v6084_v17 = vadd.f32 %v2165_v22, %v2157_v43  ;;  %v1220_v63 = vld [vmem:[%s7209_s2 + $0x198] sm:$0x3]  ;;  %v6118_v14 = vsub.f32 %v2157_v43, %v2165_v22  ;;  %v6150_v22 = vadd.f32 %v1188_v0, %v1180_v19  ;;  %v6160_v33 = vadd.f32 %v1204_v6, %v1196_v29  ;;  %2459 = vst.msk [vmem:[%s7207_s3 + $0x226] sm:$0xf] %vm884_vm2, %v6041_v21 }
 0x141   :  { %v1228_v11 = vld [vmem:[%s7209_s2 + $0x1a8] sm:$0x3]  ;;  %v1236_v1 = vld [vmem:[%s7209_s2 + $0x1b8] sm:$0x3]  ;;  %v6162_v48 = vadd.f32 %v1220_v63, %v1212_v57  ;;  %v6181_v0 = vadd.f32 %v1252_v24, %v1244_v13  ;;  %2462 = vst.msk [vmem:[%s7207_s3 + $0x256] sm:$0xf] %vm884_vm2, %v6099_v15 }
 0x142   :  { %v1260_v59 = vld [vmem:[%s7209_s2 + $0x1e8] sm:$0x3]  ;;  %7259 = vst [vmem:[#allocation16_spill] sm:$0xff] %v6118_v14  ;;  %v2205_v35 = vadd.f32 %v6084_v17, %v6073_v54  ;;  %v1268_v4 = vld [vmem:[%s7209_s2 + $0x1f8] sm:$0x3]  ;;  %v6166_v12 = vpop.permute.xlu1 %873  ;;  %v6179_v19 = vadd.f32 %v1236_v1, %v1228_v11  ;;  %v6185_v29 = vadd.f32 %v6118_v14, %v6097_v16 }
 0x143   :  { %v1284_v55 = vld [vmem:[%s7209_s2 + $0x218] sm:$0x3]  ;;  %v1292_v7 = vld [vmem:[%s7209_s2 + $0x228] sm:$0x3]  ;;  %v1716_v11 = vadd.f32 %v1268_v4, %v1260_v59  ;;  %2461 = vst.msk [vmem:[%s7207_s3 + $0x246] sm:$0xf] %vm884_vm2, %v6101_v61 }
 0x144   :  { %v1300_v25 = vld [vmem:[%s7209_s2 + $0x238] sm:$0x3]  ;;  %v1308_v43 = vld [vmem:[%s7209_s2 + $0x248] sm:$0x3]  ;;  %v2213_v52 = vmul.f32 0.5, %v2205_v35  ;;  %7260 = vst [vmem:[#allocation17_spill] sm:$0xff] %v6185_v29  ;;  %v6199_v13 = vadd.f32 %v1284_v55, %v1276_v38 }
 0x145   :  { %v1324_v40 = vld [vmem:[%s7209_s2 + $0x268] sm:$0x3]  ;;  %v1332_v9 = vld [vmem:[%s7209_s2 + $0x278] sm:$0x3]  ;;  %v1604_v55 = vadd.f32 %v1300_v25, %v1292_v7  ;;  %v1612_v4 = vadd.f32 %v1316_v62, %v1308_v43  ;;  %v1796_v62 = vsub.f32 %v6095_v26, %v6116_v56  ;;  %v6227_v25 = vpop.permute.xlu0 %901  ;;  %v1812_v26 = vsub.f32 %v6114_v10, %v6152_v44  ;;  %2464 = vst.msk [vmem:[%s7207_s3 + $0x276] sm:$0xf] %vm884_vm2, %v6166_v12 }
 0x146   :  { %v1340_v47 = vld [vmem:[%s7209_s2 + $0x288] sm:$0x3]  ;;  %v1348_v18 = vld [vmem:[%s7209_s2 + $0x298] sm:$0x3]  ;;  %2282 = vrot.lane.b32.xlu1 %v2213_v52, %s2528_s10  ;;  %v1620_v51 = vadd.f32 %v1332_v9, %v1324_v40  ;;  %v6225_v7 = vpop.permute.xlu1 %903  ;;  %v1804_v9 = vsub.f32 %v6112_v31, %v6131_v39  ;;  %v1820_v56 = vsub.f32 %v6146_v42, %v6162_v48  ;;  %v1836_v48 = vsub.f32 %v6150_v22, %v6181_v0 }
 0x147   :  { %v1356_v57 = vld [vmem:[%s7209_s2 + $0x2a8] sm:$0x3]  ;;  %v1364_v63 = vld [vmem:[%s7209_s2 + $0x2b8] sm:$0x3]  ;;  %v1724_v59 = vadd.f32 %v1348_v18, %v1340_v47  ;;  %v1828_v18 = vsub.f32 %v6148_v36, %v6179_v19  ;;  %v1844_v44 = vsub.f32 %v6160_v33, %v1716_v11  ;;  %2463 = vst.msk [vmem:[%s7207_s3 + $0x266] sm:$0xf] %vm884_vm2, %v6168_v2 }
 0x148   :  { %v1372_v24 = vld [vmem:[%s7209_s2 + $0x2c8] sm:$0x3]  ;;  %v1380_v35 = vld [vmem:[%s7209_s2 + $0x2d8] sm:$0x3]  ;;  %v1732_v6 = vadd.f32 %v1364_v63, %v1356_v57  ;;  %v1948_v32 = vmul.f32 0.5, %v1820_v56 }
 0x149   :  { %v1388_v52 = vld [vmem:[%s7209_s2 + $0x2e8] sm:$0x3]  ;;  %v1396_v38 = vld [vmem:[%s7209_s2 + $0x2f8] sm:$0x3]  ;;  %v1740_v14 = vadd.f32 %v1380_v35, %v1372_v24  ;;  %v1023_v56 = vld [vmem:[%s7209_s2 + $0xe] sm:$0x3] }
 0x14a   :  { %v1404_v1 = vld [vmem:[%s7209_s2 + $0x308] sm:$0x3]  ;;  %v1412_v58 = vld [vmem:[%s7209_s2 + $0x318] sm:$0x3]  ;;  %v1748_v16 = vadd.f32 %v1396_v38, %v1388_v52  ;;  %2466 = vst.msk [vmem:[%s7207_s3 + $0x296] sm:$0xf] %vm884_vm2, %v6225_v7 }
 0x14b   :  { %v1420_v3 = vld [vmem:[%s7209_s2 + $0x328] sm:$0x3]  ;;  %v1428_v43 = vld [vmem:[%s7209_s2 + $0x338] sm:$0x3]  ;;  %v1628_v39 = vadd.f32 %v1412_v58, %v1404_v1  ;;  %v1860_v1 = vsub.f32 %v1604_v55, %v1732_v6  ;;  %v1868_v58 = vsub.f32 %v1612_v4, %v1740_v14  ;;  %v1932_v55 = vmul.f32 0.5, %v1804_v9 }
 0x14c   :  { %v1436_v47 = vld [vmem:[%s7209_s2 + $0x348] sm:$0x3]  ;;  %v1444_v40 = vld [vmem:[%s7209_s2 + $0x358] sm:$0x3]  ;;  %v1636_v10 = vadd.f32 %v1428_v43, %v1420_v3  ;;  %v1852_v3 = vsub.f32 %v6199_v13, %v1724_v59  ;;  %v1876_v38 = vsub.f32 %v1620_v51, %v1748_v16  ;;  %v6277_v43 = vpop.permute.xlu1 %907  ;;  %v1924_v13 = vmul.f32 0.5, %v1796_v62  ;;  %v6282_v59 = vpop.permute.xlu0 %905 }
 0x14d   :  { %v1452_v57 = vld [vmem:[%s7209_s2 + $0x368] sm:$0x3]  ;;  %v1460_v63 = vld [vmem:[%s7209_s2 + $0x378] sm:$0x3]  ;;  %v1644_v24 = vadd.f32 %v1444_v40, %v1436_v47  ;;  %7261 = vst [vmem:[#allocation18_spill] sm:$0xff] %v6277_v43  ;;  %v1940_v4 = vmul.f32 0.5, %v1812_v26 }
 0x14e   :  { %v1468_v31 = vld [vmem:[%s7209_s2 + $0x388] sm:$0x3]  ;;  %v1476_v42 = vld [vmem:[%s7209_s2 + $0x398] sm:$0x3]  ;;  %v1652_v11 = vadd.f32 %v1460_v63, %v1452_v57  ;;  %7262 = vst [vmem:[#allocation19_spill] sm:$0xff] %v6282_v59  ;;  %v1956_v63 = vmul.f32 0.5, %v1828_v18 }
 0x14f   :  { %v1484_v36 = vld [vmem:[%s7209_s2 + $0x3a8] sm:$0x3]  ;;  %v1492_v19 = vld [vmem:[%s7209_s2 + $0x3b8] sm:$0x3]  ;;  %v1756_v35 = vadd.f32 %v1476_v42, %v1468_v31  ;;  %v1964_v31 = vmul.f32 0.5, %v1836_v48  ;;  %v1972_v51 = vmul.f32 0.5, %v1844_v44 }
 0x150   :  { %v1500_v33 = vld [vmem:[%s7209_s2 + $0x3c8] sm:$0x3]  ;;  %v1508_v22 = vld [vmem:[%s7209_s2 + $0x3d8] sm:$0x3]  ;;  %v1764_v52 = vadd.f32 %v1492_v19, %v1484_v36  ;;  %v1980_v42 = vmul.f32 0.5, %v1852_v3  ;;  %v1988_v36 = vmul.f32 0.5, %v1860_v1  ;;  %v6284_v29 = vpop.permute.xlu1 %911  ;;  %v2076_v48 = vadd.f32 %v1956_v63, %v1948_v32  ;;  %v6299_v1 = vpop.permute.xlu0 %909 }
 0x151   :  { %v1516_v0 = vld [vmem:[%s7209_s2 + $0x3e8] sm:$0x3]  ;;  %v1524_v14 = vld [vmem:[%s7209_s2 + $0x3f8] sm:$0x3]  ;;  %v1772_v6 = vadd.f32 %v1508_v22, %v1500_v33  ;;  %v1884_v40 = vsub.f32 %v1628_v39, %v1756_v35  ;;  %v1996_v19 = vmul.f32 0.5, %v1868_v58  ;;  %7263 = vst [vmem:[#allocation20_spill] sm:$0xff] %v6284_v29  ;;  %v2052_v39 = vadd.f32 %v1940_v4, %v1932_v55 }
 0x152   :  { %v1780_v47 = vadd.f32 %v1524_v14, %v1516_v0  ;;  %v1892_v5 = vsub.f32 %v1636_v10, %v1764_v52  ;;  %v2004_v33 = vmul.f32 0.5, %v1876_v38  ;;  %v2044_v0 = vadd.f32 %v1924_v13, %v6164_v27  ;;  %v1031_v3 = vld [vmem:[%s7209_s2 + $0x1e] sm:$0x3]  ;;  %7264 = vst [vmem:[#allocation21_spill] sm:$0xff] %v6299_v1  ;;  %v1039_v14 = vld [vmem:[%s7209_s2 + $0x2e] sm:$0x3] }
 0x153   :  { %v1900_v57 = vsub.f32 %v1644_v24, %v1772_v6  ;;  %v2012_v62 = vmul.f32 0.5, %v1884_v40  ;;  %v2060_v10 = vadd.f32 %v1988_v36, %v1980_v42  ;;  %v2084_v44 = vadd.f32 %v1972_v51, %v1964_v31  ;;  %v1095_v27 = vld [vmem:[%s7209_s2 + $0x9e] sm:$0x3]  ;;  %v1071_v31 = vld [vmem:[%s7209_s2 + $0x6e] sm:$0x3] }
 0x154   :  { %v1908_v16 = vsub.f32 %v1652_v11, %v1780_v47  ;;  %v2020_v9 = vmul.f32 0.5, %v1892_v5  ;;  %v2068_v18 = vadd.f32 %v2004_v33, %v1996_v19  ;;  %v1087_v5 = vld [vmem:[%s7209_s2 + $0x8e] sm:$0x3]  ;;  %v6301_v11 = vpop.permute.xlu1 %915  ;;  %v2108_v32 = vsub.f32 %v2044_v0, %v2076_v48  ;;  %v1047_v6 = vld [vmem:[%s7209_s2 + $0x3e] sm:$0x3]  ;;  %v6359_v48 = vpop.permute.xlu0 %913 }
 0x155   :  { %v2028_v26 = vmul.f32 0.5, %v1900_v57  ;;  %7265 = vst [vmem:[#allocation22_spill] sm:$0xff] %v6301_v11  ;;  %v2116_v35 = vsub.f32 %v2052_v39, %v2084_v44  ;;  %v1535_v13 = vadd.f32 %v1031_v3, %v1023_v56  ;;  %v1663_v55 = vadd.f32 %v1095_v27, %v1087_v5  ;;  %v1055_v57 = vld [vmem:[%s7209_s2 + $0x4e] sm:$0x3]  ;;  %v1063_v63 = vld [vmem:[%s7209_s2 + $0x5e] sm:$0x3] }
 0x156   :  { %v2036_v22 = vmul.f32 0.5, %v1908_v16  ;;  %v2092_v24 = vadd.f32 %v2020_v9, %v2012_v62  ;;  %v2140_v4 = vmul.f32 0.5, %v2108_v32  ;;  %v1079_v51 = vld [vmem:[%s7209_s2 + $0x7e] sm:$0x3]  ;;  %v1103_v42 = vld [vmem:[%s7209_s2 + $0xae] sm:$0x3]  ;;  %v6409_v11 = vadd.f32 %v1063_v63, %v1055_v57 }
 0x157   :  { %v2148_v47 = vmul.f32 0.5, %v2116_v35  ;;  %v1111_v36 = vld [vmem:[%s7209_s2 + $0xbe] sm:$0x3]  ;;  %v1119_v19 = vld [vmem:[%s7209_s2 + $0xce] sm:$0x3]  ;;  %7267 = vst [vmem:[#allocation24_spill] sm:$0xff] %v6359_v48  ;;  %v1791_v32 = vsub.f32 %v1535_v13, %v1663_v55  ;;  %v6394_v55 = vadd.f32 %v1047_v6, %v1039_v14  ;;  %v6411_v14 = vadd.f32 %v1079_v51, %v1071_v31 }
 0x158   :  { %v2100_v58 = vadd.f32 %v2036_v22, %v2028_v26  ;;  %v2124_v52 = vsub.f32 %v2060_v10, %v2092_v24  ;;  %v1127_v33 = vld [vmem:[%s7209_s2 + $0xde] sm:$0x3]  ;;  %v1151_v62 = vld [vmem:[%s7209_s2 + $0x10e] sm:$0x3]  ;;  %v6361_v44 = vpop.permute.xlu1 %944  ;;  %v6428_v63 = vadd.f32 %v1111_v36, %v1103_v42  ;;  %v1318_v43 = vld [vmem:[%s7209_s2 + $0x25c] sm:$0x3] }
 0x159   :  { %v1159_v9 = vld [vmem:[%s7209_s2 + $0x11e] sm:$0x3]  ;;  %v1167_v26 = vld [vmem:[%s7209_s2 + $0x12e] sm:$0x3]  ;;  %v6342_v22 = vadd.f32 %v2148_v47, %v2140_v4  ;;  %7268 = vst [vmem:[#allocation25_spill] sm:$0xff] %v6361_v44  ;;  %v6377_v35 = vsub.f32 %v2140_v4, %v2148_v47  ;;  %v6430_v31 = vadd.f32 %v1127_v33, %v1119_v19  ;;  %v7294_v61 = vld [vmem:[#allocation20_spill] sm:$0xff] }
 0x15a   :  { %v2132_v38 = vsub.f32 %v2068_v18, %v2100_v58  ;;  %v2156_v40 = vmul.f32 0.5, %v2124_v52  ;;  %v1135_v0 = vld [vmem:[%s7209_s2 + $0xee] sm:$0x3]  ;;  %v1143_v39 = vld [vmem:[%s7209_s2 + $0xfe] sm:$0x3]  ;;  %v6424_v29 = vadd.f32 %v1159_v9, %v1151_v62  ;;  %v6442_v62 = vmul.f32 0.5, %v1791_v32 }
 0x15b   :  { %7266 = vst [vmem:[#allocation23_spill] sm:$0xff] %v6342_v22  ;;  %v1175_v10 = vld [vmem:[%s7209_s2 + $0x13e] sm:$0x3]  ;;  %v1183_v56 = vld [vmem:[%s7209_s2 + $0x14e] sm:$0x3]  ;;  %7270 = vst [vmem:[#allocation27_spill] sm:$0xff] %v6377_v35  ;;  %v6440_v59 = vadd.f32 %v1143_v39, %v1135_v0  ;;  %v6463_v39 = vpop.permute.xlu0 %942 }
 0x15c   :  { %v2164_v16 = vmul.f32 0.5, %v2132_v38  ;;  %v1191_v18 = vld [vmem:[%s7209_s2 + $0x15e] sm:$0x3]  ;;  %v1215_v3 = vld [vmem:[%s7209_s2 + $0x18e] sm:$0x3]  ;;  %v6426_v57 = vadd.f32 %v1175_v10, %v1167_v26  ;;  %7273 = vst [vmem:[#allocation30_spill] sm:$0xff] %v6463_v39  ;;  %v6465_v10 = vpop.permute.xlu1 %948 }
 0x15d   :  { %v1223_v5 = vld [vmem:[%s7209_s2 + $0x19e] sm:$0x3]  ;;  %v1231_v27 = vld [vmem:[%s7209_s2 + $0x1ae] sm:$0x3]  ;;  %7274 = vst [vmem:[#allocation31_spill] sm:$0xff] %v6465_v10  ;;  %v7296_v37 = vld [vmem:[#allocation22_spill] sm:$0xff] }
 0x15e   :  { %v6363_v24 = vadd.f32 %v2164_v16, %v2156_v40  ;;  %v1239_v58 = vld [vmem:[%s7209_s2 + $0x1be] sm:$0x3]  ;;  %v1199_v52 = vld [vmem:[%s7209_s2 + $0x16e] sm:$0x3]  ;;  %v6396_v4 = vsub.f32 %v2156_v40, %v2164_v16  ;;  %v6453_v33 = vadd.f32 %v1223_v5, %v1215_v3  ;;  %2465 = vst.msk [vmem:[%s7207_s3 + $0x286] sm:$0xf] %vm884_vm2, %v6227_v25 }
 0x15f   :  { %v1207_v38 = vld [vmem:[%s7209_s2 + $0x17e] sm:$0x3]  ;;  %v1263_v13 = vld [vmem:[%s7209_s2 + $0x1ee] sm:$0x3]  ;;  %v6455_v9 = vadd.f32 %v1239_v58, %v1231_v27  ;;  %v1711_v58 = vadd.f32 %v1255_v23, %v1247_v46  ;;  %2470 = vst.msk [vmem:[%s7207_s3 + $0x2d6] sm:$0xf] %vm884_vm2, %v7294_v61 }
 0x160   :  { %7269 = vst [vmem:[#allocation26_spill] sm:$0xff] %v6363_v24  ;;  %7271 = vst [vmem:[#allocation28_spill] sm:$0xff] %v6396_v4  ;;  %v2204_v47 = vadd.f32 %v6363_v24, %v6342_v22  ;;  %v1279_v44 = vld [vmem:[%s7209_s2 + $0x20e] sm:$0x3]  ;;  %v1287_v48 = vld [vmem:[%s7209_s2 + $0x21e] sm:$0x3]  ;;  %v6438_v22 = vadd.f32 %v1191_v18, %v1183_v56  ;;  %v6459_v26 = vadd.f32 %v6396_v4, %v6377_v35 }
 0x161   :  { %v1295_v40 = vld [vmem:[%s7209_s2 + $0x22e] sm:$0x3]  ;;  %v1303_v16 = vld [vmem:[%s7209_s2 + $0x23e] sm:$0x3]  ;;  %v1591_v5 = vadd.f32 %v1207_v38, %v1199_v52  ;;  %v1599_v27 = vadd.f32 %v1287_v48, %v1279_v44  ;;  %v1719_v32 = vadd.f32 %v1271_v49, %v1263_v13  ;;  %2472 = vst.msk [vmem:[%s7207_s3 + $0x2f6] sm:$0xf] %vm884_vm2, %v7296_v37 }
 0x162   :  { %v1311_v1 = vld [vmem:[%s7209_s2 + $0x24e] sm:$0x3]  ;;  %v2212_v51 = vmul.f32 0.5, %v2204_v47  ;;  %v1319_v6 = vld [vmem:[%s7209_s2 + $0x25e] sm:$0x3]  ;;  %7272 = vst [vmem:[#allocation29_spill] sm:$0xff] %v6459_v26  ;;  %v1607_v4 = vadd.f32 %v1303_v16, %v1295_v40  ;;  %v1815_v40 = vsub.f32 %v6411_v14, %v6440_v59  ;;  %v1831_v16 = vsub.f32 %v6426_v57, %v6455_v9 }
 0x163   :  { %v1327_v24 = vld [vmem:[%s7209_s2 + $0x26e] sm:$0x3]  ;;  %v1335_v42 = vld [vmem:[%s7209_s2 + $0x27e] sm:$0x3]  ;;  %v1615_v35 = vadd.f32 %v1319_v6, %v1311_v1  ;;  %v1799_v1 = vsub.f32 %v6394_v55, %v6428_v63  ;;  %v1823_v55 = vsub.f32 %v6424_v29, %v6453_v33  ;;  %v1839_v14 = vsub.f32 %v6438_v22, %v1711_v58  ;;  %v6535_v22 = vpop.permute.xlu1 %952  ;;  %v7297_v45 = vld [vmem:[#allocation24_spill] sm:$0xff] }
 0x164   :  { %v1343_v36 = vld [vmem:[%s7209_s2 + $0x28e] sm:$0x3]  ;;  %v1351_v19 = vld [vmem:[%s7209_s2 + $0x29e] sm:$0x3]  ;;  %2280 = vrot.lane.b32.xlu0 %v2212_v51, %s2528_s10  ;;  %v1623_v48 = vadd.f32 %v1335_v42, %v1327_v24  ;;  %v1807_v24 = vsub.f32 %v6409_v11, %v6430_v31  ;;  %v1847_v29 = vsub.f32 %v1591_v5, %v1719_v32  ;;  %7276 = vst [vmem:[#allocation33_spill] sm:$0xff] %v6535_v22 }
 0x165   :  { %v1359_v56 = vld [vmem:[%s7209_s2 + $0x2ae] sm:$0x3]  ;;  %v1367_v18 = vld [vmem:[%s7209_s2 + $0x2be] sm:$0x3]  ;;  %v1727_v26 = vadd.f32 %v1351_v19, %v1343_v36  ;;  %v1967_v22 = vmul.f32 0.5, %v1839_v14 }
 0x166   :  { %v1375_v3 = vld [vmem:[%s7209_s2 + $0x2ce] sm:$0x3]  ;;  %v1383_v47 = vld [vmem:[%s7209_s2 + $0x2de] sm:$0x3]  ;;  %v1735_v10 = vadd.f32 %v1367_v18, %v1359_v56  ;;  %v6533_v18 = vpop.permute.xlu0 %946  ;;  %2471 = vst.msk [vmem:[%s7207_s3 + $0x2e6] sm:$0xf] %vm884_vm2, %v7297_v45 }
 0x167   :  { %v1391_v51 = vld [vmem:[%s7209_s2 + $0x2ee] sm:$0x3]  ;;  %v1399_v0 = vld [vmem:[%s7209_s2 + $0x2fe] sm:$0x3]  ;;  %v1743_v44 = vadd.f32 %v1383_v47, %v1375_v3  ;;  %v1855_v9 = vsub.f32 %v1599_v27, %v1727_v26  ;;  %7275 = vst [vmem:[#allocation32_spill] sm:$0xff] %v6533_v18  ;;  %v1927_v47 = vmul.f32 0.5, %v1799_v1  ;;  %v6551_v1 = vpop.permute.xlu1 %956 }
 0x168   :  { %v1407_v49 = vld [vmem:[%s7209_s2 + $0x30e] sm:$0x3]  ;;  %v1415_v23 = vld [vmem:[%s7209_s2 + $0x31e] sm:$0x3]  ;;  %v1751_v52 = vadd.f32 %v1399_v0, %v1391_v51  ;;  %v1863_v0 = vsub.f32 %v1607_v4, %v1735_v10  ;;  %v1935_v51 = vmul.f32 0.5, %v1807_v24  ;;  %v1975_v18 = vmul.f32 0.5, %v1847_v29 }
 0x169   :  { %v1423_v46 = vld [vmem:[%s7209_s2 + $0x32e] sm:$0x3]  ;;  %v1431_v38 = vld [vmem:[%s7209_s2 + $0x33e] sm:$0x3]  ;;  %v1631_v31 = vadd.f32 %v1415_v23, %v1407_v49  ;;  %v1871_v56 = vsub.f32 %v1615_v35, %v1743_v44  ;;  %v1943_v49 = vmul.f32 0.5, %v1815_v40  ;;  %7278 = vst [vmem:[#allocation35_spill] sm:$0xff] %v6551_v1  ;;  %v2047_v40 = vadd.f32 %v1927_v47, %v6442_v62 }
 0x16a   :  { %v1439_v13 = vld [vmem:[%s7209_s2 + $0x34e] sm:$0x3]  ;;  %v1447_v6 = vld [vmem:[%s7209_s2 + $0x35e] sm:$0x3]  ;;  %v1639_v59 = vadd.f32 %v1431_v38, %v1423_v46  ;;  %v1879_v35 = vsub.f32 %v1623_v48, %v1751_v52  ;;  %v1951_v38 = vmul.f32 0.5, %v1823_v55  ;;  %v2087_v29 = vadd.f32 %v1975_v18, %v1967_v22 }
 0x16b   :  { %v1455_v63 = vld [vmem:[%s7209_s2 + $0x36e] sm:$0x3]  ;;  %v1463_v42 = vld [vmem:[%s7209_s2 + $0x37e] sm:$0x3]  ;;  %v1647_v33 = vadd.f32 %v1447_v6, %v1439_v13  ;;  %v1959_v6 = vmul.f32 0.5, %v1831_v16  ;;  %v1999_v48 = vmul.f32 0.5, %v1871_v56  ;;  %v2055_v55 = vadd.f32 %v1943_v49, %v1935_v51  ;;  %v6580_v49 = vpop.permute.xlu1 %985 }
 0x16c   :  { %v1471_v11 = vld [vmem:[%s7209_s2 + $0x38e] sm:$0x3]  ;;  %v1479_v57 = vld [vmem:[%s7209_s2 + $0x39e] sm:$0x3]  ;;  %v1655_v32 = vadd.f32 %v1463_v42, %v1455_v63  ;;  %v1983_v42 = vmul.f32 0.5, %v1855_v9  ;;  %v2007_v52 = vmul.f32 0.5, %v1879_v35 }
 0x16d   :  { %v1487_v36 = vld [vmem:[%s7209_s2 + $0x3ae] sm:$0x3]  ;;  %v1495_v19 = vld [vmem:[%s7209_s2 + $0x3be] sm:$0x3]  ;;  %v1759_v26 = vadd.f32 %v1479_v57, %v1471_v11  ;;  %v1991_v11 = vmul.f32 0.5, %v1863_v0  ;;  %v2079_v14 = vadd.f32 %v1959_v6, %v1951_v38  ;;  %7283 = vst [vmem:[#allocation40_spill] sm:$0xff] %v6580_v49 }
 0x16e   :  { %v1503_v3 = vld [vmem:[%s7209_s2 + $0x3ce] sm:$0x3]  ;;  %v1511_v5 = vld [vmem:[%s7209_s2 + $0x3de] sm:$0x3]  ;;  %v1767_v4 = vadd.f32 %v1495_v19, %v1487_v36  ;;  %v1022_v16 = vld [vmem:[%s7209_s2 + $0xc] sm:$0x3] }
 0x16f   :  { %v1519_v58 = vld [vmem:[%s7209_s2 + $0x3ee] sm:$0x3]  ;;  %v1527_v10 = vld [vmem:[%s7209_s2 + $0x3fe] sm:$0x3]  ;;  %v1775_v27 = vadd.f32 %v1511_v5, %v1503_v3  ;;  %v1887_v46 = vsub.f32 %v1631_v31, %v1759_v26  ;;  %v6549_v3 = vpop.permute.xlu0 %950  ;;  %v2063_v31 = vadd.f32 %v1991_v11, %v1983_v42  ;;  %v1030_v9 = vld [vmem:[%s7209_s2 + $0x1c] sm:$0x3]  ;;  %v2111_v5 = vsub.f32 %v2047_v40, %v2079_v14 }
 0x170   :  { %v1783_v23 = vadd.f32 %v1527_v10, %v1519_v58  ;;  %v1895_v44 = vsub.f32 %v1639_v59, %v1767_v4  ;;  %7277 = vst [vmem:[#allocation34_spill] sm:$0xff] %v6549_v3  ;;  %v2071_v59 = vadd.f32 %v2007_v52, %v1999_v48  ;;  %v1086_v0 = vld [vmem:[%s7209_s2 + $0x8c] sm:$0x3]  ;;  %v1094_v62 = vld [vmem:[%s7209_s2 + $0x9c] sm:$0x3]  ;;  %v2119_v58 = vsub.f32 %v2055_v55, %v2087_v29  ;;  %v6699_v3 = vpop.permute.xlu1 %989  ;;  %v7301_v15 = vld [vmem:[#allocation32_spill] sm:$0xff] }
 0x171   :  { %v1903_v13 = vsub.f32 %v1647_v33, %v1775_v27  ;;  %v2015_v57 = vmul.f32 0.5, %v1887_v46  ;;  %v1534_v4 = vadd.f32 %v1030_v9, %v1022_v16  ;;  %v1662_v18 = vadd.f32 %v1094_v62, %v1086_v0  ;;  %v1038_v27 = vld [vmem:[%s7209_s2 + $0x2c] sm:$0x3]  ;;  %v1046_v47 = vld [vmem:[%s7209_s2 + $0x3c] sm:$0x3]  ;;  %7286 = vst [vmem:[#allocation43_spill] sm:$0xff] %v6699_v3 }
 0x172   :  { %v1911_v63 = vsub.f32 %v1655_v32, %v1783_v23  ;;  %v2023_v36 = vmul.f32 0.5, %v1895_v44  ;;  %v6566_v22 = vmul.f32 0.5, %v2111_v5  ;;  %v6568_v35 = vmul.f32 0.5, %v2119_v58  ;;  %v1054_v46 = vld [vmem:[%s7209_s2 + $0x4c] sm:$0x3]  ;;  %v7295_v20 = vld [vmem:[#allocation21_spill] sm:$0xff] }
 0x173   :  { %v2031_v19 = vmul.f32 0.5, %v1903_v13  ;;  %v6578_v51 = vpop.permute.xlu0 %954  ;;  %v1062_v44 = vld [vmem:[%s7209_s2 + $0x5c] sm:$0x3]  ;;  %v1070_v38 = vld [vmem:[%s7209_s2 + $0x6c] sm:$0x3]  ;;  %v1790_v9 = vsub.f32 %v1534_v4, %v1662_v18 }
 0x174   :  { %v2039_v24 = vmul.f32 0.5, %v1911_v63  ;;  %v2095_v33 = vadd.f32 %v2023_v36, %v2015_v57  ;;  %7279 = vst [vmem:[#allocation36_spill] sm:$0xff] %v6566_v22  ;;  %7280 = vst [vmem:[#allocation37_spill] sm:$0xff] %v6568_v35  ;;  %v1078_v13 = vld [vmem:[%s7209_s2 + $0x7c] sm:$0x3]  ;;  %v6610_v48 = vadd.f32 %v6568_v35, %v6566_v22  ;;  %v6689_v49 = vadd.f32 %v1062_v44, %v1054_v46  ;;  %v7304_v7 = vld [vmem:[#allocation35_spill] sm:$0xff] }
 0x175   :  { %7282 = vst [vmem:[#allocation39_spill] sm:$0xff] %v6578_v51  ;;  %v1102_v6 = vld [vmem:[%s7209_s2 + $0xac] sm:$0x3]  ;;  %v1110_v63 = vld [vmem:[%s7209_s2 + $0xbc] sm:$0x3]  ;;  %v6691_v51 = vadd.f32 %v1078_v13, %v1070_v38  ;;  %v6711_v13 = vmul.f32 0.5, %v1790_v9 }
 0x176   :  { %v2103_v56 = vadd.f32 %v2039_v24, %v2031_v19  ;;  %v2127_v32 = vsub.f32 %v2063_v31, %v2095_v33  ;;  %v1118_v42 = vld [vmem:[%s7209_s2 + $0xcc] sm:$0x3]  ;;  %v1126_v11 = vld [vmem:[%s7209_s2 + $0xdc] sm:$0x3]  ;;  %v6693_v1 = vadd.f32 %v1110_v63, %v1102_v6  ;;  %2469 = vst.msk [vmem:[%s7207_s3 + $0x2c6] sm:$0xf] %vm884_vm2, %v7295_v20 }
 0x177   :  { %v1150_v52 = vld [vmem:[%s7209_s2 + $0x10c] sm:$0x3]  ;;  %v1158_v57 = vld [vmem:[%s7209_s2 + $0x11c] sm:$0x3]  ;;  %2475 = vst.msk [vmem:[%s7207_s3 + $0x326] sm:$0xf] %vm884_vm2, %v7301_v15 }
 0x178   :  { %v2135_v26 = vsub.f32 %v2071_v59, %v2103_v56  ;;  %v6570_v10 = vmul.f32 0.5, %v2127_v32  ;;  %v1166_v36 = vld [vmem:[%s7209_s2 + $0x12c] sm:$0x3]  ;;  %v1174_v19 = vld [vmem:[%s7209_s2 + $0x13c] sm:$0x3]  ;;  %v6707_v44 = vadd.f32 %v1158_v57, %v1150_v52  ;;  %v7303_v2 = vld [vmem:[#allocation34_spill] sm:$0xff] }
 0x179   :  { %v1134_v40 = vld [vmem:[%s7209_s2 + $0xec] sm:$0x3]  ;;  %v1142_v55 = vld [vmem:[%s7209_s2 + $0xfc] sm:$0x3]  ;;  %v6709_v38 = vadd.f32 %v1174_v19, %v1166_v36  ;;  %2477 = vst.msk [vmem:[%s7207_s3 + $0x346] sm:$0xf] %vm884_vm2, %v7303_v2 }
 0x17a   :  { %7281 = vst [vmem:[#allocation38_spill] sm:$0xff] %v6570_v10  ;;  %v6582_v23 = vmul.f32 0.5, %v2135_v26  ;;  %v1182_v31 = vld [vmem:[%s7209_s2 + $0x14c] sm:$0x3]  ;;  %v1190_v16 = vld [vmem:[%s7209_s2 + $0x15c] sm:$0x3]  ;;  %v1686_v52 = vadd.f32 %v1142_v55, %v1134_v40 }
 0x17b   :  { %v1214_v59 = vld [vmem:[%s7209_s2 + $0x18c] sm:$0x3]  ;;  %v1222_v14 = vld [vmem:[%s7209_s2 + $0x19c] sm:$0x3]  ;;  %2480 = vst.msk [vmem:[%s7207_s3 + $0x376] sm:$0xf] %vm884_vm2, %v7304_v7 }
 0x17c   :  { %7284 = vst [vmem:[#allocation41_spill] sm:$0xff] %v6582_v23  ;;  %v6626_v24 = vadd.f32 %v6582_v23, %v6570_v10  ;;  %v1230_v29 = vld [vmem:[%s7209_s2 + $0x1ac] sm:$0x3]  ;;  %v1238_v33 = vld [vmem:[%s7209_s2 + $0x1bc] sm:$0x3]  ;;  %v6678_v10 = vadd.f32 %v1046_v47, %v1038_v27  ;;  %v6695_v27 = vadd.f32 %v1126_v11, %v1118_v42  ;;  %v6697_v47 = vpop.permute.xlu0 %983  ;;  %v6722_v11 = vadd.f32 %v1190_v16, %v1182_v31  ;;  %v7336_v15 = vld [vmem:[#allocation6_spill] sm:$0xff] }
 0x17d   :  { %v1198_v0 = vld [vmem:[%s7209_s2 + $0x16c] sm:$0x3]  ;;  %v1206_v62 = vld [vmem:[%s7209_s2 + $0x17c] sm:$0x3]  ;;  %7285 = vst [vmem:[#allocation42_spill] sm:$0xff] %v6697_v47  ;;  %v1694_v57 = vadd.f32 %v1222_v14, %v1214_v59  ;;  %v6724_v36 = vadd.f32 %v1238_v33, %v1230_v29 }
 0x17e   :  { %v1246_v56 = vld [vmem:[%s7209_s2 + $0x1cc] sm:$0x3]  ;;  %v1254_v5 = vld [vmem:[%s7209_s2 + $0x1dc] sm:$0x3]  ;;  %v2207_v32 = vadd.f32 %v6626_v24, %v6610_v48  ;;  %v1590_v31 = vadd.f32 %v1206_v62, %v1198_v0 }
 0x17f   :  { %v1262_v58 = vld [vmem:[%s7209_s2 + $0x1ec] sm:$0x3]  ;;  %v1270_v26 = vld [vmem:[%s7209_s2 + $0x1fc] sm:$0x3]  ;;  %v1710_v40 = vadd.f32 %v1254_v5, %v1246_v56 }
 0x180   :  { %v1278_v4 = vld [vmem:[%s7209_s2 + $0x20c] sm:$0x3]  ;;  %v1286_v18 = vld [vmem:[%s7209_s2 + $0x21c] sm:$0x3]  ;;  %v2215_v39 = vmul.f32 0.5, %v2207_v32  ;;  %v1718_v55 = vadd.f32 %v1270_v26, %v1262_v58 }
 0x181   :  { %v1294_v23 = vld [vmem:[%s7209_s2 + $0x22c] sm:$0x3]  ;;  %v1302_v22 = vld [vmem:[%s7209_s2 + $0x23c] sm:$0x3]  ;;  %v6736_v16 = vadd.f32 %v1286_v18, %v1278_v4  ;;  %v1806_v18 = vsub.f32 %v6689_v49, %v6695_v27 }
 0x182   :  { %v1310_v35 = vld [vmem:[%s7209_s2 + $0x24c] sm:$0x3]  ;;  %v1334_v6 = vld [vmem:[%s7209_s2 + $0x27c] sm:$0x3]  ;;  %2286 = vrot.lane.b32.xlu1 %v2215_v39, %s2528_s10  ;;  %v1606_v29 = vadd.f32 %v1302_v22, %v1294_v23 }
 0x183   :  { %v1326_v46 = vld [vmem:[%s7209_s2 + $0x26c] sm:$0x3]  ;;  %v1350_v42 = vld [vmem:[%s7209_s2 + $0x29c] sm:$0x3]  ;;  %v1614_v33 = vadd.f32 %v1318_v43, %v1310_v35  ;;  %v1798_v43 = vsub.f32 %v6678_v10, %v6693_v1  ;;  %v1830_v1 = vsub.f32 %v6709_v38, %v6724_v36  ;;  %v6773_v10 = vpop.permute.xlu0 %987  ;;  %v1846_v38 = vsub.f32 %v1590_v31, %v1718_v55 }
 0x184   :  { %v1342_v63 = vld [vmem:[%s7209_s2 + $0x28c] sm:$0x3]  ;;  %v1366_v9 = vld [vmem:[%s7209_s2 + $0x2bc] sm:$0x3]  ;;  %v1622_v58 = vadd.f32 %v1334_v6, %v1326_v46  ;;  %v1814_v46 = vsub.f32 %v6691_v51, %v1686_v52  ;;  %v1822_v6 = vsub.f32 %v6707_v44, %v1694_v57  ;;  %7287 = vst [vmem:[#allocation44_spill] sm:$0xff] %v6773_v10  ;;  %v1838_v44 = vsub.f32 %v6722_v11, %v1710_v40 }
 0x185   :  { %v1358_v19 = vld [vmem:[%s7209_s2 + $0x2ac] sm:$0x3]  ;;  %v1382_v39 = vld [vmem:[%s7209_s2 + $0x2dc] sm:$0x3]  ;;  %v1726_v3 = vadd.f32 %v1350_v42, %v1342_v63  ;;  %v6775_v63 = vpop.permute.xlu1 %993  ;;  %v1974_v47 = vmul.f32 0.5, %v1846_v38 }
 0x186   :  { %v1374_v32 = vld [vmem:[%s7209_s2 + $0x2cc] sm:$0x3]  ;;  %v1398_v14 = vld [vmem:[%s7209_s2 + $0x2fc] sm:$0x3]  ;;  %v1734_v0 = vadd.f32 %v1366_v9, %v1358_v19  ;;  %7288 = vst [vmem:[#allocation45_spill] sm:$0xff] %v6775_v63  ;;  %v1958_v63 = vmul.f32 0.5, %v1830_v1 }
 0x187   :  { %v1390_v59 = vld [vmem:[%s7209_s2 + $0x2ec] sm:$0x3]  ;;  %v1414_v56 = vld [vmem:[%s7209_s2 + $0x31c] sm:$0x3]  ;;  %v1742_v26 = vadd.f32 %v1382_v39, %v1374_v32  ;;  %v1854_v32 = vsub.f32 %v6736_v16, %v1726_v3  ;;  %v1966_v10 = vmul.f32 0.5, %v1838_v44 }
 0x188   :  { %v1406_v62 = vld [vmem:[%s7209_s2 + $0x30c] sm:$0x3]  ;;  %v1750_v4 = vadd.f32 %v1398_v14, %v1390_v59  ;;  %v1430_v22 = vld [vmem:[%s7209_s2 + $0x33c] sm:$0x3]  ;;  %v1862_v39 = vsub.f32 %v1606_v29, %v1734_v0  ;;  %v1926_v29 = vmul.f32 0.5, %v1798_v43  ;;  %v1942_v0 = vmul.f32 0.5, %v1814_v46 }
 0x189   :  { %v1422_v5 = vld [vmem:[%s7209_s2 + $0x32c] sm:$0x3]  ;;  %v1446_v23 = vld [vmem:[%s7209_s2 + $0x35c] sm:$0x3]  ;;  %v1630_v49 = vadd.f32 %v1414_v56, %v1406_v62  ;;  %v1870_v59 = vsub.f32 %v1614_v33, %v1742_v26  ;;  %v1934_v33 = vmul.f32 0.5, %v1806_v18  ;;  %v2086_v38 = vadd.f32 %v1974_v47, %v1966_v10 }
 0x18a   :  { %v1438_v35 = vld [vmem:[%s7209_s2 + $0x34c] sm:$0x3]  ;;  %v1462_v19 = vld [vmem:[%s7209_s2 + $0x37c] sm:$0x3]  ;;  %v1638_v27 = vadd.f32 %v1430_v22, %v1422_v5  ;;  %v1878_v56 = vsub.f32 %v1622_v58, %v1750_v4  ;;  %v1982_v4 = vmul.f32 0.5, %v1854_v32 }
 0x18b   :  { %v1454_v42 = vld [vmem:[%s7209_s2 + $0x36c] sm:$0x3]  ;;  %v1478_v52 = vld [vmem:[%s7209_s2 + $0x39c] sm:$0x3]  ;;  %v1646_v9 = vadd.f32 %v1446_v23, %v1438_v35  ;;  %v1950_v35 = vmul.f32 0.5, %v1822_v6  ;;  %v2054_v6 = vadd.f32 %v1942_v0, %v1934_v33  ;;  %v6849_v33 = vsub.f32 %v4774_v30, %v4776_v50  ;;  %v7292_v30 = vld [vmem:[#allocation18_spill] sm:$0xff] }
 0x18c   :  { %v1470_v51 = vld [vmem:[%s7209_s2 + $0x38c] sm:$0x3]  ;;  %v1494_v36 = vld [vmem:[%s7209_s2 + $0x3bc] sm:$0x3]  ;;  %v1654_v55 = vadd.f32 %v1462_v19, %v1454_v42  ;;  %v6809_v42 = vpop.permute.xlu0 %991  ;;  %v6811_v19 = vpop.permute.xlu1 %997  ;;  %2468 = vst.msk [vmem:[%s7207_s3 + $0x2b6] sm:$0xf] %vm884_vm2, %v7292_v30 }
 0x18d   :  { %v1486_v57 = vld [vmem:[%s7209_s2 + $0x3ac] sm:$0x3]  ;;  %v1510_v31 = vld [vmem:[%s7209_s2 + $0x3dc] sm:$0x3]  ;;  %v1758_v14 = vadd.f32 %v1478_v52, %v1470_v51  ;;  %v1990_v51 = vmul.f32 0.5, %v1862_v39  ;;  %v1998_v52 = vmul.f32 0.5, %v1870_v59  ;;  %v2078_v44 = vadd.f32 %v1958_v63, %v1950_v35 }
 0x18e   :  { %v1502_v11 = vld [vmem:[%s7209_s2 + $0x3cc] sm:$0x3]  ;;  %v1766_v62 = vadd.f32 %v1494_v36, %v1486_v57  ;;  %v1526_v3 = vld [vmem:[%s7209_s2 + $0x3fc] sm:$0x3]  ;;  %v2006_v57 = vmul.f32 0.5, %v1878_v56  ;;  %v2118_v59 = vsub.f32 %v2054_v6, %v2086_v38  ;;  %v7321_v38 = vld [vmem:[#allocation38_spill] sm:$0xff] }
 0x18f   :  { %v1518_v40 = vld [vmem:[%s7209_s2 + $0x3ec] sm:$0x3]  ;;  %v1774_v16 = vadd.f32 %v1510_v31, %v1502_v11  ;;  %v1886_v26 = vsub.f32 %v1630_v49, %v1758_v14  ;;  %v2046_v49 = vadd.f32 %v1926_v29, %v6711_v13  ;;  %v7289_v31 = vsub.f32 %v4881_v8, %v4928_v60  ;;  %v7298_v21 = vld [vmem:[#allocation25_spill] sm:$0xff]  ;;  %2485 = vst.msk [vmem:[%s7207_s3 + $0x3c6] sm:$0xf] %vm884_vm2, %v6809_v42  ;;  %v7311_v42 = vld [vmem:[#allocation2_spill] sm:$0xff] }
 0x190   :  { %v1782_v5 = vadd.f32 %v1526_v3, %v1518_v40  ;;  %v1894_v22 = vsub.f32 %v1638_v27, %v1766_v62  ;;  %v2062_v27 = vadd.f32 %v1990_v51, %v1982_v4  ;;  %v2070_v1 = vadd.f32 %v2006_v57, %v1998_v52  ;;  %v2275_v14 = vpop.permute.xlu1 %2274  ;;  %v7293_v50 = vld [vmem:[#allocation19_spill] sm:$0xff]  ;;  %2474 = vst.msk [vmem:[%s7207_s3 + $0x316] sm:$0xf] %vm884_vm2, %v7298_v21  ;;  %v7302_v12 = vld [vmem:[#allocation33_spill] sm:$0xff]  ;;  %v7333_v21 = vld [vmem:[#allocation16_spill] sm:$0xff] }
 0x191   :  { %v1902_v23 = vsub.f32 %v1646_v9, %v1774_v16  ;;  %v2014_v43 = vmul.f32 0.5, %v1886_v26  ;;  %v2225_v32 = vmul.f32 0.5, %v7289_v31  ;;  %v2110_v39 = vsub.f32 %v2046_v49, %v2078_v44  ;;  %2467 = vst.msk [vmem:[%s7207_s3 + $0x2a6] sm:$0xf] %vm884_vm2, %v7293_v50  ;;  %2478 = vst.msk [vmem:[%s7207_s3 + $0x356] sm:$0xf] %vm884_vm2, %v7302_v12 }
 0x192   :  { %v1910_v58 = vsub.f32 %v1654_v55, %v1782_v5  ;;  %v2022_v18 = vmul.f32 0.5, %v1894_v22  ;;  %v996_v55 = vpop.permute.xlu0 %995  ;;  %v7290_v13 = vsub.f32 %v5405_v34, %v5418_v28  ;;  %v6823_v47 = vmul.f32 0.5, %v2118_v59  ;;  %v7305_v25 = vld [vmem:[#allocation39_spill] sm:$0xff]  ;;  %v7309_v26 = vld [vmem:[#allocation44_spill] sm:$0xff]  ;;  %v7310_v22 = vld [vmem:[#allocation45_spill] sm:$0xff] }
 0x193   :  { %v2030_v46 = vmul.f32 0.5, %v1902_v23  ;;  %2316 = vrot.lane.b32.xlu1 %v2225_v32, %s2528_s10  ;;  %v6821_v63 = vmul.f32 0.5, %v2110_v39  ;;  %v6835_v3 = vsub.f32 %v4770_v53, %v4772_v41  ;;  %v7291_v28 = vsub.f32 %v6073_v54, %v6084_v17  ;;  %v7299_v54 = vld [vmem:[#allocation30_spill] sm:$0xff]  ;;  %v7300_v17 = vld [vmem:[#allocation31_spill] sm:$0xff]  ;;  %2479 = vst.msk [vmem:[%s7207_s3 + $0x366] sm:$0xf] %vm884_vm2, %v7305_v25 }
 0x194   :  { %v2038_v36 = vmul.f32 0.5, %v1910_v58  ;;  %v2094_v9 = vadd.f32 %v2022_v18, %v2014_v43  ;;  %v2227_v56 = vmul.f32 0.5, %v7290_v13  ;;  %v2223_v29 = vsub.f32 %v6610_v48, %v6626_v24  ;;  %v2279_v41 = vpop.permute.xlu1 %2278  ;;  %2473 = vst.msk [vmem:[%s7207_s3 + $0x306] sm:$0xf] %vm884_vm2, %v7299_v54  ;;  %2476 = vst.msk [vmem:[%s7207_s3 + $0x336] sm:$0xf] %vm884_vm2, %v7300_v17 }
 0x195   :  { %v6831_v60 = vadd.f32 %v6823_v47, %v6821_v63  ;;  %v2229_v16 = vmul.f32 0.5, %v7291_v28  ;;  %v7306_v48 = vld [vmem:[#allocation40_spill] sm:$0xff]  ;;  %v7307_v24 = vld [vmem:[#allocation42_spill] sm:$0xff]  ;;  %v7308_v5 = vld [vmem:[#allocation43_spill] sm:$0xff]  ;;  %2483 = vst.msk [vmem:[%s7207_s3 + $0x3a6] sm:$0xf] %vm884_vm2, %v7309_v26  ;;  %v2233_v58 = vadd.f32 %v6849_v33, %v6835_v3 }
 0x196   :  { %v2102_v11 = vadd.f32 %v2038_v36, %v2030_v46  ;;  %v2126_v40 = vsub.f32 %v2062_v27, %v2094_v9  ;;  %v2273_v53 = vpop.permute.xlu0 %2272  ;;  %2482 = vst.msk [vmem:[%s7207_s3 + $0x396] sm:$0xf] %vm884_vm2, %v7306_v48  ;;  %2481 = vst.msk [vmem:[%s7207_s3 + $0x386] sm:$0xf] %vm884_vm2, %v7307_v24  ;;  %v2231_v23 = vmul.f32 0.5, %v2223_v29  ;;  %v7314_v57 = vld [vmem:[#allocation7_spill] sm:$0xff] }
 0x197   :  { %2320 = vrot.lane.b32.xlu1 %v2227_v56, %s2528_s10  ;;  %2484 = vst.msk [vmem:[%s7207_s3 + $0x3b6] sm:$0xf] %vm884_vm2, %v7308_v5  ;;  %2486 = vst.msk [vmem:[%s7207_s3 + $0x3d6] sm:$0xf] %vm884_vm2, %v7310_v22  ;;  %v2241_v52 = vmul.f32 0.5, %v2233_v58  ;;  %v7315_v43 = vld [vmem:[#allocation3_spill] sm:$0xff] }
 0x198   :  { %v2134_v62 = vsub.f32 %v2070_v1, %v2102_v11  ;;  %v6825_v10 = vmul.f32 0.5, %v2126_v40  ;;  %2488 = vst.msk [vmem:[%s7207_s3 + $0x3f6] sm:$0xf] %vm884_vm2, %v6811_v19  ;;  %2487 = vst.msk [vmem:[%s7207_s3 + $0x3e6] sm:$0xf] %vm884_vm2, %v996_v55  ;;  %v7312_v19 = vld [vmem:[#allocation4_spill] sm:$0xff]  ;;  %v7316_v18 = vsub.f32 %v7314_v57, %v7315_v43 }
 0x199   :  { %2490 = vst.msk [vmem:[%s7207_s3 + $0x417] sm:$0x3] %vm2297_vm3, %v2275_v14  ;;  %2489 = vst.msk [vmem:[%s7207_s3 + $0x407] sm:$0x3] %vm2297_vm3, %v2273_v53  ;;  %v7313_v4 = vsub.f32 %v7311_v42, %v7312_v19  ;;  %v7317_v36 = vld [vmem:[#allocation13_spill] sm:$0xff]  ;;  %v7319_v27 = vld [vmem:[#allocation36_spill] sm:$0xff] }
 0x19a   :  { %v6827_v8 = vmul.f32 0.5, %v2134_v62  ;;  %2492 = vst.msk [vmem:[%s7207_s3 + $0x437] sm:$0x3] %vm2297_vm3, %v2279_v41  ;;  %v2226_v46 = vmul.f32 0.5, %v7316_v18  ;;  %v2243_v49 = vmul.f32 0.5, %v7317_v36  ;;  %v7318_v6 = vld [vmem:[#allocation37_spill] sm:$0xff]  ;;  %v2277_v62 = vpop.permute.xlu0 %2276  ;;  %v2182_v41 = vsub.f32 %v6821_v63, %v6823_v47 }
 0x19b   :  { %2324 = vrot.lane.b32.xlu1 %v2229_v16, %s2528_s10  ;;  %v2224_v51 = vmul.f32 0.5, %v7313_v4  ;;  %v2183_v1 = vsub.f32 %v7319_v27, %v7318_v6  ;;  %v7320_v44 = vld [vmem:[#allocation41_spill] sm:$0xff]  ;;  %v7322_v11 = vld [vmem:[#allocation23_spill] sm:$0xff]  ;;  %v7323_v31 = vld [vmem:[#allocation26_spill] sm:$0xff]  ;;  %2491 = vst.msk [vmem:[%s7207_s3 + $0x427] sm:$0x3] %vm2297_vm3, %v2277_v62 }
 0x19c   :  { %v6839_v34 = vadd.f32 %v6827_v8, %v6825_v10  ;;  %v2199_v9 = vsub.f32 %v7321_v38, %v7320_v44  ;;  %v7324_v32 = vsub.f32 %v7322_v11, %v7323_v31  ;;  %v7325_v40 = vld [vmem:[#allocation17_spill] sm:$0xff]  ;;  %v7327_v29 = vld [vmem:[#allocation14_spill] sm:$0xff]  ;;  %v7332_v45 = vld [vmem:[#allocation15_spill] sm:$0xff] }
 0x19d   :  { %v2245_v55 = vmul.f32 0.5, %v7325_v40  ;;  %v2242_v53 = vmul.f32 0.5, %v7327_v29  ;;  %v7331_v61 = vld [vmem:[#allocation29_spill] sm:$0xff]  ;;  %v7334_v54 = vsub.f32 %v7332_v45, %v7333_v21  ;;  %v7338_v7 = vld [vmem:[#allocation11_spill] sm:$0xff]  ;;  %v7339_v25 = vld [vmem:[#allocation12_spill] sm:$0xff] }
 0x19e   :  { %v2206_v0 = vadd.f32 %v6839_v34, %v6831_v60  ;;  %v2228_v39 = vmul.f32 0.5, %v7324_v32  ;;  %v2222_v59 = vsub.f32 %v6831_v60, %v6839_v34  ;;  %v2239_v14 = vadd.f32 %v2199_v9, %v2183_v1  ;;  %v7326_v34 = vld [vmem:[#allocation8_spill] sm:$0xff]  ;;  %v7335_v17 = vld [vmem:[#allocation5_spill] sm:$0xff]  ;;  %v7341_v26 = vld [vmem:[#allocation27_spill] sm:$0xff] }
 0x19f   :  { %2328 = vrot.lane.b32.xlu1 %v2231_v23, %s2528_s10  ;;  %v2249_v60 = vsub.f32 %v6835_v3, %v6849_v33  ;;  %v2240_v28 = vmul.f32 0.5, %v7326_v34  ;;  %v7328_v3 = vld [vmem:[#allocation9_spill] sm:$0xff]  ;;  %v7329_v33 = vld [vmem:[#allocation10_spill] sm:$0xff]  ;;  %v2244_v20 = vmul.f32 0.5, %v7331_v61  ;;  %v2261_v63 = vmul.f32 0.5, %v7334_v54  ;;  %v7342_v22 = vld [vmem:[#allocation28_spill] sm:$0xff] }
 0x1a0   :  { %v2214_v35 = vmul.f32 0.5, %v2206_v0  ;;  %v2230_v13 = vmul.f32 0.5, %v2222_v59  ;;  %v2247_v56 = vmul.f32 0.5, %v2239_v14  ;;  %v2198_v0 = vsub.f32 %v6825_v10, %v6827_v8 }
 0x1a1   :  { %v2257_v16 = vmul.f32 0.5, %v2249_v60  ;;  %v7330_v30 = vsub.f32 %v7328_v3, %v7329_v33  ;;  %v2255_v47 = vsub.f32 %v2183_v1, %v2199_v9  ;;  %v7337_v12 = vsub.f32 %v7335_v17, %v7336_v15 }
 0x1a2   :  { %2284 = vrot.lane.b32.xlu0 %v2214_v35, %s2528_s10  ;;  %v2238_v37 = vadd.f32 %v2198_v0, %v2182_v41  ;;  %v7340_v48 = vsub.f32 %v7338_v7, %v7339_v25  ;;  %v7343_v35 = vsub.f32 %v7341_v26, %v7342_v22  ;;  %v2254_v58 = vsub.f32 %v2182_v41, %v2198_v0 }
 0x1a3   :  { %2357 = vrot.lane.b32.xlu1 %v2241_v52, %s2528_s10  ;;  %v2259_v50 = vmul.f32 0.5, %v7330_v30  ;;  %v2263_v8 = vmul.f32 0.5, %v2255_v47  ;;  %v2256_v2 = vmul.f32 0.5, %v7337_v12 }
 0x1a4   :  { %v2246_v10 = vmul.f32 0.5, %v2238_v37  ;;  %v2258_v24 = vmul.f32 0.5, %v7340_v48  ;;  %v2260_v23 = vmul.f32 0.5, %v7343_v35  ;;  %v2262_v42 = vmul.f32 0.5, %v2254_v58 }
 0x1a6   :  { %2314 = vrot.lane.b32.xlu0 %v2224_v51, %s2528_s10 }
 0x1a7   :  { %2361 = vrot.lane.b32.xlu1 %v2243_v49, %s2528_s10 }
 0x1aa   :  { %2318 = vrot.lane.b32.xlu0 %v2226_v46, %s2528_s10 }
 0x1ab   :  { %2365 = vrot.lane.b32.xlu1 %v2245_v55, %s2528_s10 }
 0x1ae   :  { %2322 = vrot.lane.b32.xlu0 %v2228_v39, %s2528_s10 }
 0x1af   :  { %2369 = vrot.lane.b32.xlu1 %v2247_v56, %s2528_s10 }
 0x1b2   :  { %2326 = vrot.lane.b32.xlu0 %v2230_v13, %s2528_s10 }
 0x1b3   :  { %2398 = vrot.lane.b32.xlu1 %v2257_v16, %s2528_s10 }
 0x1b6   :  { %2355 = vrot.lane.b32.xlu0 %v2240_v28, %s2528_s10 }
 0x1b7   :  { %2402 = vrot.lane.b32.xlu1 %v2259_v50, %s2528_s10 }
 0x1b8   :  { %v2283_v5 = vpop.permute.xlu1 %2282 }
 0x1b9   :  { %2494 = vst.msk [vmem:[%s7207_s3 + $0x457] sm:$0x3] %vm2297_vm3, %v2283_v5 }
 0x1ba   :  { %2359 = vrot.lane.b32.xlu0 %v2242_v53, %s2528_s10 }
 0x1bb   :  { %2406 = vrot.lane.b32.xlu1 %v2261_v63, %s2528_s10 }
 0x1be   :  { %2363 = vrot.lane.b32.xlu0 %v2244_v20, %s2528_s10 }
 0x1bf   :  { %2410 = vrot.lane.b32.xlu1 %v2263_v8, %s2528_s10 }
 0x1c2   :  { %2367 = vrot.lane.b32.xlu0 %v2246_v10, %s2528_s10 }
 0x1c6   :  { %2396 = vrot.lane.b32.xlu0 %v2256_v2, %s2528_s10 }
 0x1ca   :  { %2400 = vrot.lane.b32.xlu0 %v2258_v24, %s2528_s10 }
 0x1ce   :  { %2404 = vrot.lane.b32.xlu0 %v2260_v23, %s2528_s10 }
 0x1d2   :  { %2408 = vrot.lane.b32.xlu0 %v2262_v42, %s2528_s10 }
 0x1d6   :  { %v2281_v19 = vpop.permute.xlu0 %2280 }
 0x1d7   :  { %2493 = vst.msk [vmem:[%s7207_s3 + $0x447] sm:$0x3] %vm2297_vm3, %v2281_v19 }
 0x1f4   :  { %v2287_v4 = vpop.permute.xlu1 %2286 }
 0x1f5   :  { %2496 = vst.msk [vmem:[%s7207_s3 + $0x477] sm:$0x3] %vm2297_vm3, %v2287_v4 }
 0x205   :  { %v2317_v51 = vpop.permute.xlu1 %2316 }
 0x206   :  { %2498 = vst.msk [vmem:[%s7207_s3 + $0x497] sm:$0x3] %vm2297_vm3, %v2317_v51 }
 0x209   :  { %v2321_v52 = vpop.permute.xlu1 %2320 }
 0x20a   :  { %2500 = vst.msk [vmem:[%s7207_s3 + $0x4b7] sm:$0x3] %vm2297_vm3, %v2321_v52 }
 0x20d   :  { %v2325_v57 = vpop.permute.xlu1 %2324 }
 0x20e   :  { %2502 = vst.msk [vmem:[%s7207_s3 + $0x4d7] sm:$0x3] %vm2297_vm3, %v2325_v57 }
 0x211   :  { %v2329_v18 = vpop.permute.xlu1 %2328 }
 0x212   :  { %2504 = vst.msk [vmem:[%s7207_s3 + $0x4f7] sm:$0x3] %vm2297_vm3, %v2329_v18 }
 0x214   :  { %v2285_v43 = vpop.permute.xlu0 %2284 }
 0x215   :  { %2495 = vst.msk [vmem:[%s7207_s3 + $0x467] sm:$0x3] %vm2297_vm3, %v2285_v43  ;;  %v2358_v36 = vpop.permute.xlu1 %2357 }
 0x216   :  { %2506 = vst.msk [vmem:[%s7207_s3 + $0x517] sm:$0x3] %vm2297_vm3, %v2358_v36 }
 0x218   :  { %v2315_v46 = vpop.permute.xlu0 %2314 }
 0x219   :  { %2497 = vst.msk [vmem:[%s7207_s3 + $0x487] sm:$0x3] %vm2297_vm3, %v2315_v46  ;;  %v2362_v6 = vpop.permute.xlu1 %2361 }
 0x21a   :  { %2508 = vst.msk [vmem:[%s7207_s3 + $0x537] sm:$0x3] %vm2297_vm3, %v2362_v6 }
 0x21c   :  { %v2319_v49 = vpop.permute.xlu0 %2318 }
 0x21d   :  { %2499 = vst.msk [vmem:[%s7207_s3 + $0x4a7] sm:$0x3] %vm2297_vm3, %v2319_v49  ;;  %v2366_v1 = vpop.permute.xlu1 %2365 }
 0x21e   :  { %2510 = vst.msk [vmem:[%s7207_s3 + $0x557] sm:$0x3] %vm2297_vm3, %v2366_v1 }
 0x220   :  { %v2323_v27 = vpop.permute.xlu0 %2322 }
 0x221   :  { %2501 = vst.msk [vmem:[%s7207_s3 + $0x4c7] sm:$0x3] %vm2297_vm3, %v2323_v27  ;;  %v2370_v38 = vpop.permute.xlu1 %2369 }
 0x222   :  { %2512 = vst.msk [vmem:[%s7207_s3 + $0x577] sm:$0x3] %vm2297_vm3, %v2370_v38 }
 0x224   :  { %v2327_v44 = vpop.permute.xlu0 %2326 }
 0x225   :  { %2503 = vst.msk [vmem:[%s7207_s3 + $0x4e7] sm:$0x3] %vm2297_vm3, %v2327_v44  ;;  %v2399_v11 = vpop.permute.xlu1 %2398 }
 0x226   :  { %2514 = vst.msk [vmem:[%s7207_s3 + $0x597] sm:$0x3] %vm2297_vm3, %v2399_v11 }
 0x228   :  { %v2356_v9 = vpop.permute.xlu0 %2355 }
 0x229   :  { %2505 = vst.msk [vmem:[%s7207_s3 + $0x507] sm:$0x3] %vm2297_vm3, %v2356_v9  ;;  %v2403_v32 = vpop.permute.xlu1 %2402 }
 0x22a   :  { %2516 = vst.msk [vmem:[%s7207_s3 + $0x5b7] sm:$0x3] %vm2297_vm3, %v2403_v32 }
 0x22c   :  { %v2360_v31 = vpop.permute.xlu0 %2359 }
 0x22d   :  { %2507 = vst.msk [vmem:[%s7207_s3 + $0x527] sm:$0x3] %vm2297_vm3, %v2360_v31  ;;  %v2407_v59 = vpop.permute.xlu1 %2406 }
 0x22e   :  { %2518 = vst.msk [vmem:[%s7207_s3 + $0x5d7] sm:$0x3] %vm2297_vm3, %v2407_v59 }
 0x230   :  { %v2364_v39 = vpop.permute.xlu0 %2363 }
 0x231   :  { %2509 = vst.msk [vmem:[%s7207_s3 + $0x547] sm:$0x3] %vm2297_vm3, %v2364_v39  ;;  %v2411_v55 = vpop.permute.xlu1 %2410 }
 0x232   :  { %2520 = vst.msk [vmem:[%s7207_s3 + $0x5f7] sm:$0x3] %vm2297_vm3, %v2411_v55 }
 0x234   :  { %v2368_v40 = vpop.permute.xlu0 %2367 }
 0x235   :  { %2511 = vst.msk [vmem:[%s7207_s3 + $0x567] sm:$0x3] %vm2297_vm3, %v2368_v40 }
 0x238   :  { %v2397_v14 = vpop.permute.xlu0 %2396 }
 0x239   :  { %2513 = vst.msk [vmem:[%s7207_s3 + $0x587] sm:$0x3] %vm2297_vm3, %v2397_v14 }
 0x23c   :  { %v2401_v62 = vpop.permute.xlu0 %2400 }
 0x23d   :  { %2515 = vst.msk [vmem:[%s7207_s3 + $0x5a7] sm:$0x3] %vm2297_vm3, %v2401_v62 }
 0x240   :  { %v2405_v13 = vpop.permute.xlu0 %2404 }
 0x241   :  { %2517 = vst.msk [vmem:[%s7207_s3 + $0x5c7] sm:$0x3] %vm2297_vm3, %v2405_v13 }
 0x244   :  { %v2409_v56 = vpop.permute.xlu0 %2408 }
 0x245   :  { %2519 = vst.msk [vmem:[%s7207_s3 + $0x5e7] sm:$0x3] %vm2297_vm3, %v2409_v56 }

</bundles_post_ra>
